<compile_context>
chip_gen: v6e
topology: v6e:2x2x1
jax: 0.10.0
libtpu: 0.0.40
codegen_flags: <defaults>
</compile_context>

<pallas_src>
import jax
import jax.numpy as jnp
from jax.experimental import pallas as pl
from jax.experimental.pallas import tpu as pltpu

OUT_CHANNEL = 8
KERNEL_SIZE = 24

BT = 8          # batch rows per grid step (mapped to the sublane axis)
SUB = 128       # in-kernel lane sub-tile (one output vreg column group)
MAX_T = 1024    # max output-lane tile per grid step (bounds unroll size + VMEM)


def _round_up(v, m):
    return (v + m - 1) // m * m


def conv1d_bias_relu_kernel(x_ref, w_ref, b_ref, o_ref):
    """
    x_ref: (BT, L_in_pad)  VMEM  zero-padded input rows, batch on sublanes
    w_ref: (C, K)          SMEM  conv weights, read as true scalars (splat on use)
    b_ref: (C,)            SMEM  bias scalars
    o_ref: (C, BT, T)      VMEM  output tile: channel-major, batch on sublanes,
                                 conv positions lane-dense
    """
    c_out, bt, t = o_ref.shape
    k = w_ref.shape[1]

    # Hoist every scalar weight / bias read out of the vector loops.
    w_s = [[w_ref[c, kk] for kk in range(k)] for c in range(c_out)]
    b_s = [b_ref[c] for c in range(c_out)]

    base = pl.multiple_of(pl.program_id(1) * t, 128)

    # Static loop over 128-lane sub-tiles keeps register pressure bounded while one
    # grid step still produces C * T / 128 output vregs.
    for s in range(t // SUB):
        off = s * SUB
        # One aligned (BT, SUB+128) load covers every tap window of this sub-tile;
        # the K shifted windows are then cheap lane shifts of register-resident data.
        start = pl.multiple_of(base + off, 128)
        chunk = x_ref[:, pl.ds(start, SUB + 128)]                     # (BT, SUB+128)

        accs = [jnp.full((bt, SUB), b_s[c], dtype=jnp.float32) for c in range(c_out)]
        for kk in range(k):
            win = chunk[:, kk:kk + SUB]                               # shared across channels
            for c in range(c_out):
                accs[c] = accs[c] + w_s[c][kk] * win                  # scalar splat * (BT, SUB)
        for c in range(c_out):
            o_ref[c, :, off:off + SUB] = jnp.maximum(accs[c], 0.0)    # dense, lane-aligned store


def cnn_forward(x, weight, bias):
    """Equivalent of CNN.forward.

    x:      (N, 1, L)   torch NCW input
    weight: (C, 1, K)   torch Conv1d weight
    bias:   (C,)        torch Conv1d bias
    returns (N, L_out, C) float32, matching relu(conv1d(x)).permute(0, 2, 1)
    """
    x = x.astype(jnp.float32)
    n, cin, l = x.shape
    assert cin == 1, "module is defined with in_channels=1"
    c, _, k = weight.shape
    l_out = l - k + 1
    assert l_out >= 1

    # Lane tiling of the conv-output axis: largest tile <= MAX_T so every grid step
    # produces many output vregs, while padding waste stays < 128 lanes per tile.
    l_out_128 = _round_up(l_out, SUB)
    n_lt = -(-l_out_128 // MAX_T)                # number of lane tiles
    t = _round_up(-(-l_out_128 // n_lt), SUB)    # lanes per tile (multiple of SUB)
    l_out_pad = n_lt * t
    l_in_pad = l_out_pad + SUB                   # +128 so aligned (SUB+128) chunk loads stay in range

    n_pad = _round_up(n, BT)

    # (N, 1, L) -> zero-padded (N_pad, L_in_pad); batch rows land on the sublane axis.
    x2 = jnp.pad(x.reshape(n, l), ((0, n_pad - n), (0, l_in_pad - l)))
    w2 = weight.reshape(c, k).astype(jnp.float32)        # (C, K) scalars -> SMEM
    b1 = bias.reshape(c).astype(jnp.float32)             # (C,)   scalars -> SMEM

    out = pl.pallas_call(
        conv1d_bias_relu_kernel,
        out_shape=jax.ShapeDtypeStruct((c, n_pad, l_out_pad), jnp.float32),
        grid=(n_pad // BT, n_lt),
        in_specs=[
            # Full (padded) input rows stay VMEM-resident across the inner lane-tile axis.
            # TODO(synk): halo-tile this input block for very long signals (L ~ 1M) to stay
            # under v7x's 64 MiB VMEM; not needed at these sizes.
            pl.BlockSpec((BT, l_in_pad), lambda bt, lt: (bt, 0)),
            pl.BlockSpec(memory_space=pltpu.MemorySpace.SMEM),       # weights as scalars
            pl.BlockSpec(memory_space=pltpu.MemorySpace.SMEM),       # bias as scalars
        ],
        out_specs=pl.BlockSpec((c, BT, t), lambda bt, lt: (0, bt, lt)),
        compiler_params=pltpu.CompilerParams(
            dimension_semantics=("parallel", "parallel"),            # v7x: shard on both TCs
        ),
    )(x2, w2, b1)                                                    # (C, N_pad, L_out_pad)

    # TODO(synk): if the consumer can accept channel-major (N, C, L_out), drop this
    # transpose and save a full-output HBM pass; torch semantics require (N, L_out, C).
    return jnp.transpose(out[:, :n, :l_out], (1, 2, 0))              # (N, L_out, C)


def _reference_forward(x, weight, bias):
    # Pure-JAX reference of the torch forward, for a sanity check.
    out = jax.lax.conv_general_dilated(
        x.astype(jnp.float32), weight.astype(jnp.float32),
        window_strides=(1,), padding="VALID",
        dimension_numbers=("NCH", "OIH", "NCH"),
    ) + bias.reshape(1, -1, 1)
    out = jnp.maximum(out, 0.0)
    return jnp.transpose(out, (0, 2, 1))


if __name__ == "__main__":
    key = jax.random.PRNGKey(0)
    kx, kw, kb = jax.random.split(key, 3)

    N, L = 2, 64                      # small shapes; L_out = 64 - 24 + 1 = 41
    x = jax.random.normal(kx, (N, 1, L), dtype=jnp.float32)
    weight = 0.1 * jax.random.normal(kw, (OUT_CHANNEL, 1, KERNEL_SIZE), dtype=jnp.float32)
    bias = 0.1 * jax.random.normal(kb, (OUT_CHANNEL,), dtype=jnp.float32)

    out = jax.jit(cnn_forward)(x, weight, bias)
    out = jax.block_until_ready(out)

    assert out.shape == (N, L - KERNEL_SIZE + 1, OUT_CHANNEL), out.shape
    ref = _reference_forward(x, weight, bias)
    assert jnp.allclose(out, ref, atol=1e-5, rtol=1e-5), "mismatch vs reference"

    print("KERNEL_OK")
</pallas_src>

<mosaic_0001>
module attributes {stable_mosaic.version = 11 : i64} {
  func.func @conv1d_bias_relu_kernel(%arg0: i32, %arg1: i32, %arg2: memref<8x256xf32, #tpu.memory_space<vmem>>, %arg3: memref<8x24xf32, #tpu.memory_space<smem>>, %arg4: memref<8xf32, #tpu.memory_space<smem>>, %arg5: memref<8x8x128xf32, #tpu.memory_space<vmem>>) attributes {dimension_semantics = [#tpu.dimension_semantics<parallel>, #tpu.dimension_semantics<parallel>], iteration_bounds = array<i64: 1, 1>, scalar_prefetch = 0 : i64, scratch_operands = 0 : i64, tpu.core_type = #tpu.core_type<tc>, window_params = [{transform_indices = @transform_0, window_bounds = array<i64: 8, 256>}, {transform_indices = @transform_1, window_bounds = array<i64: 8, 24>}, {transform_indices = @transform_2, window_bounds = array<i64: 8>}, {transform_indices = @transform_3, window_bounds = array<i64: 8, 8, 128>}]} {
    %c0 = arith.constant 0 : index
    %c0_0 = arith.constant 0 : index
    %0 = memref.load %arg3[%c0, %c0_0] : memref<8x24xf32, #tpu.memory_space<smem>>
    %c0_1 = arith.constant 0 : index
    %c1 = arith.constant 1 : index
    %1 = memref.load %arg3[%c0_1, %c1] : memref<8x24xf32, #tpu.memory_space<smem>>
    %c0_2 = arith.constant 0 : index
    %c2 = arith.constant 2 : index
    %2 = memref.load %arg3[%c0_2, %c2] : memref<8x24xf32, #tpu.memory_space<smem>>
    %c0_3 = arith.constant 0 : index
    %c3 = arith.constant 3 : index
    %3 = memref.load %arg3[%c0_3, %c3] : memref<8x24xf32, #tpu.memory_space<smem>>
    %c0_4 = arith.constant 0 : index
    %c4 = arith.constant 4 : index
    %4 = memref.load %arg3[%c0_4, %c4] : memref<8x24xf32, #tpu.memory_space<smem>>
    %c0_5 = arith.constant 0 : index
    %c5 = arith.constant 5 : index
    %5 = memref.load %arg3[%c0_5, %c5] : memref<8x24xf32, #tpu.memory_space<smem>>
    %c0_6 = arith.constant 0 : index
    %c6 = arith.constant 6 : index
    %6 = memref.load %arg3[%c0_6, %c6] : memref<8x24xf32, #tpu.memory_space<smem>>
    %c0_7 = arith.constant 0 : index
    %c7 = arith.constant 7 : index
    %7 = memref.load %arg3[%c0_7, %c7] : memref<8x24xf32, #tpu.memory_space<smem>>
    %c0_8 = arith.constant 0 : index
    %c8 = arith.constant 8 : index
    %8 = memref.load %arg3[%c0_8, %c8] : memref<8x24xf32, #tpu.memory_space<smem>>
    %c0_9 = arith.constant 0 : index
    %c9 = arith.constant 9 : index
    %9 = memref.load %arg3[%c0_9, %c9] : memref<8x24xf32, #tpu.memory_space<smem>>
    %c0_10 = arith.constant 0 : index
    %c10 = arith.constant 10 : index
    %10 = memref.load %arg3[%c0_10, %c10] : memref<8x24xf32, #tpu.memory_space<smem>>
    %c0_11 = arith.constant 0 : index
    %c11 = arith.constant 11 : index
    %11 = memref.load %arg3[%c0_11, %c11] : memref<8x24xf32, #tpu.memory_space<smem>>
    %c0_12 = arith.constant 0 : index
    %c12 = arith.constant 12 : index
    %12 = memref.load %arg3[%c0_12, %c12] : memref<8x24xf32, #tpu.memory_space<smem>>
    %c0_13 = arith.constant 0 : index
    %c13 = arith.constant 13 : index
    %13 = memref.load %arg3[%c0_13, %c13] : memref<8x24xf32, #tpu.memory_space<smem>>
    %c0_14 = arith.constant 0 : index
    %c14 = arith.constant 14 : index
    %14 = memref.load %arg3[%c0_14, %c14] : memref<8x24xf32, #tpu.memory_space<smem>>
    %c0_15 = arith.constant 0 : index
    %c15 = arith.constant 15 : index
    %15 = memref.load %arg3[%c0_15, %c15] : memref<8x24xf32, #tpu.memory_space<smem>>
    %c0_16 = arith.constant 0 : index
    %c16 = arith.constant 16 : index
    %16 = memref.load %arg3[%c0_16, %c16] : memref<8x24xf32, #tpu.memory_space<smem>>
    %c0_17 = arith.constant 0 : index
    %c17 = arith.constant 17 : index
    %17 = memref.load %arg3[%c0_17, %c17] : memref<8x24xf32, #tpu.memory_space<smem>>
    %c0_18 = arith.constant 0 : index
    %c18 = arith.constant 18 : index
    %18 = memref.load %arg3[%c0_18, %c18] : memref<8x24xf32, #tpu.memory_space<smem>>
    %c0_19 = arith.constant 0 : index
    %c19 = arith.constant 19 : index
    %19 = memref.load %arg3[%c0_19, %c19] : memref<8x24xf32, #tpu.memory_space<smem>>
    %c0_20 = arith.constant 0 : index
    %c20 = arith.constant 20 : index
    %20 = memref.load %arg3[%c0_20, %c20] : memref<8x24xf32, #tpu.memory_space<smem>>
    %c0_21 = arith.constant 0 : index
    %c21 = arith.constant 21 : index
    %21 = memref.load %arg3[%c0_21, %c21] : memref<8x24xf32, #tpu.memory_space<smem>>
    %c0_22 = arith.constant 0 : index
    %c22 = arith.constant 22 : index
    %22 = memref.load %arg3[%c0_22, %c22] : memref<8x24xf32, #tpu.memory_space<smem>>
    %c0_23 = arith.constant 0 : index
    %c23 = arith.constant 23 : index
    %23 = memref.load %arg3[%c0_23, %c23] : memref<8x24xf32, #tpu.memory_space<smem>>
    %c1_24 = arith.constant 1 : index
    %c0_25 = arith.constant 0 : index
    %24 = memref.load %arg3[%c1_24, %c0_25] : memref<8x24xf32, #tpu.memory_space<smem>>
    %c1_26 = arith.constant 1 : index
    %c1_27 = arith.constant 1 : index
    %25 = memref.load %arg3[%c1_26, %c1_27] : memref<8x24xf32, #tpu.memory_space<smem>>
    %c1_28 = arith.constant 1 : index
    %c2_29 = arith.constant 2 : index
    %26 = memref.load %arg3[%c1_28, %c2_29] : memref<8x24xf32, #tpu.memory_space<smem>>
    %c1_30 = arith.constant 1 : index
    %c3_31 = arith.constant 3 : index
    %27 = memref.load %arg3[%c1_30, %c3_31] : memref<8x24xf32, #tpu.memory_space<smem>>
    %c1_32 = arith.constant 1 : index
    %c4_33 = arith.constant 4 : index
    %28 = memref.load %arg3[%c1_32, %c4_33] : memref<8x24xf32, #tpu.memory_space<smem>>
    %c1_34 = arith.constant 1 : index
    %c5_35 = arith.constant 5 : index
    %29 = memref.load %arg3[%c1_34, %c5_35] : memref<8x24xf32, #tpu.memory_space<smem>>
    %c1_36 = arith.constant 1 : index
    %c6_37 = arith.constant 6 : index
    %30 = memref.load %arg3[%c1_36, %c6_37] : memref<8x24xf32, #tpu.memory_space<smem>>
    %c1_38 = arith.constant 1 : index
    %c7_39 = arith.constant 7 : index
    %31 = memref.load %arg3[%c1_38, %c7_39] : memref<8x24xf32, #tpu.memory_space<smem>>
    %c1_40 = arith.constant 1 : index
    %c8_41 = arith.constant 8 : index
    %32 = memref.load %arg3[%c1_40, %c8_41] : memref<8x24xf32, #tpu.memory_space<smem>>
    %c1_42 = arith.constant 1 : index
    %c9_43 = arith.constant 9 : index
    %33 = memref.load %arg3[%c1_42, %c9_43] : memref<8x24xf32, #tpu.memory_space<smem>>
    %c1_44 = arith.constant 1 : index
    %c10_45 = arith.constant 10 : index
    %34 = memref.load %arg3[%c1_44, %c10_45] : memref<8x24xf32, #tpu.memory_space<smem>>
    %c1_46 = arith.constant 1 : index
    %c11_47 = arith.constant 11 : index
    %35 = memref.load %arg3[%c1_46, %c11_47] : memref<8x24xf32, #tpu.memory_space<smem>>
    %c1_48 = arith.constant 1 : index
    %c12_49 = arith.constant 12 : index
    %36 = memref.load %arg3[%c1_48, %c12_49] : memref<8x24xf32, #tpu.memory_space<smem>>
    %c1_50 = arith.constant 1 : index
    %c13_51 = arith.constant 13 : index
    %37 = memref.load %arg3[%c1_50, %c13_51] : memref<8x24xf32, #tpu.memory_space<smem>>
    %c1_52 = arith.constant 1 : index
    %c14_53 = arith.constant 14 : index
    %38 = memref.load %arg3[%c1_52, %c14_53] : memref<8x24xf32, #tpu.memory_space<smem>>
    %c1_54 = arith.constant 1 : index
    %c15_55 = arith.constant 15 : index
    %39 = memref.load %arg3[%c1_54, %c15_55] : memref<8x24xf32, #tpu.memory_space<smem>>
    %c1_56 = arith.constant 1 : index
    %c16_57 = arith.constant 16 : index
    %40 = memref.load %arg3[%c1_56, %c16_57] : memref<8x24xf32, #tpu.memory_space<smem>>
    %c1_58 = arith.constant 1 : index
    %c17_59 = arith.constant 17 : index
    %41 = memref.load %arg3[%c1_58, %c17_59] : memref<8x24xf32, #tpu.memory_space<smem>>
    %c1_60 = arith.constant 1 : index
    %c18_61 = arith.constant 18 : index
    %42 = memref.load %arg3[%c1_60, %c18_61] : memref<8x24xf32, #tpu.memory_space<smem>>
    %c1_62 = arith.constant 1 : index
    %c19_63 = arith.constant 19 : index
    %43 = memref.load %arg3[%c1_62, %c19_63] : memref<8x24xf32, #tpu.memory_space<smem>>
    %c1_64 = arith.constant 1 : index
    %c20_65 = arith.constant 20 : index
    %44 = memref.load %arg3[%c1_64, %c20_65] : memref<8x24xf32, #tpu.memory_space<smem>>
    %c1_66 = arith.constant 1 : index
    %c21_67 = arith.constant 21 : index
    %45 = memref.load %arg3[%c1_66, %c21_67] : memref<8x24xf32, #tpu.memory_space<smem>>
    %c1_68 = arith.constant 1 : index
    %c22_69 = arith.constant 22 : index
    %46 = memref.load %arg3[%c1_68, %c22_69] : memref<8x24xf32, #tpu.memory_space<smem>>
    %c1_70 = arith.constant 1 : index
    %c23_71 = arith.constant 23 : index
    %47 = memref.load %arg3[%c1_70, %c23_71] : memref<8x24xf32, #tpu.memory_space<smem>>
    %c2_72 = arith.constant 2 : index
    %c0_73 = arith.constant 0 : index
    %48 = memref.load %arg3[%c2_72, %c0_73] : memref<8x24xf32, #tpu.memory_space<smem>>
    %c2_74 = arith.constant 2 : index
    %c1_75 = arith.constant 1 : index
    %49 = memref.load %arg3[%c2_74, %c1_75] : memref<8x24xf32, #tpu.memory_space<smem>>
    %c2_76 = arith.constant 2 : index
    %c2_77 = arith.constant 2 : index
    %50 = memref.load %arg3[%c2_76, %c2_77] : memref<8x24xf32, #tpu.memory_space<smem>>
    %c2_78 = arith.constant 2 : index
    %c3_79 = arith.constant 3 : index
    %51 = memref.load %arg3[%c2_78, %c3_79] : memref<8x24xf32, #tpu.memory_space<smem>>
    %c2_80 = arith.constant 2 : index
    %c4_81 = arith.constant 4 : index
    %52 = memref.load %arg3[%c2_80, %c4_81] : memref<8x24xf32, #tpu.memory_space<smem>>
    %c2_82 = arith.constant 2 : index
    %c5_83 = arith.constant 5 : index
    %53 = memref.load %arg3[%c2_82, %c5_83] : memref<8x24xf32, #tpu.memory_space<smem>>
    %c2_84 = arith.constant 2 : index
    %c6_85 = arith.constant 6 : index
    %54 = memref.load %arg3[%c2_84, %c6_85] : memref<8x24xf32, #tpu.memory_space<smem>>
    %c2_86 = arith.constant 2 : index
    %c7_87 = arith.constant 7 : index
    %55 = memref.load %arg3[%c2_86, %c7_87] : memref<8x24xf32, #tpu.memory_space<smem>>
    %c2_88 = arith.constant 2 : index
    %c8_89 = arith.constant 8 : index
    %56 = memref.load %arg3[%c2_88, %c8_89] : memref<8x24xf32, #tpu.memory_space<smem>>
    %c2_90 = arith.constant 2 : index
    %c9_91 = arith.constant 9 : index
    %57 = memref.load %arg3[%c2_90, %c9_91] : memref<8x24xf32, #tpu.memory_space<smem>>
    %c2_92 = arith.constant 2 : index
    %c10_93 = arith.constant 10 : index
    %58 = memref.load %arg3[%c2_92, %c10_93] : memref<8x24xf32, #tpu.memory_space<smem>>
    %c2_94 = arith.constant 2 : index
    %c11_95 = arith.constant 11 : index
    %59 = memref.load %arg3[%c2_94, %c11_95] : memref<8x24xf32, #tpu.memory_space<smem>>
    %c2_96 = arith.constant 2 : index
    %c12_97 = arith.constant 12 : index
    %60 = memref.load %arg3[%c2_96, %c12_97] : memref<8x24xf32, #tpu.memory_space<smem>>
    %c2_98 = arith.constant 2 : index
    %c13_99 = arith.constant 13 : index
    %61 = memref.load %arg3[%c2_98, %c13_99] : memref<8x24xf32, #tpu.memory_space<smem>>
    %c2_100 = arith.constant 2 : index
    %c14_101 = arith.constant 14 : index
    %62 = memref.load %arg3[%c2_100, %c14_101] : memref<8x24xf32, #tpu.memory_space<smem>>
    %c2_102 = arith.constant 2 : index
    %c15_103 = arith.constant 15 : index
    %63 = memref.load %arg3[%c2_102, %c15_103] : memref<8x24xf32, #tpu.memory_space<smem>>
    %c2_104 = arith.constant 2 : index
    %c16_105 = arith.constant 16 : index
    %64 = memref.load %arg3[%c2_104, %c16_105] : memref<8x24xf32, #tpu.memory_space<smem>>
    %c2_106 = arith.constant 2 : index
    %c17_107 = arith.constant 17 : index
    %65 = memref.load %arg3[%c2_106, %c17_107] : memref<8x24xf32, #tpu.memory_space<smem>>
    %c2_108 = arith.constant 2 : index
    %c18_109 = arith.constant 18 : index
    %66 = memref.load %arg3[%c2_108, %c18_109] : memref<8x24xf32, #tpu.memory_space<smem>>
    %c2_110 = arith.constant 2 : index
    %c19_111 = arith.constant 19 : index
    %67 = memref.load %arg3[%c2_110, %c19_111] : memref<8x24xf32, #tpu.memory_space<smem>>
    %c2_112 = arith.constant 2 : index
    %c20_113 = arith.constant 20 : index
    %68 = memref.load %arg3[%c2_112, %c20_113] : memref<8x24xf32, #tpu.memory_space<smem>>
    %c2_114 = arith.constant 2 : index
    %c21_115 = arith.constant 21 : index
    %69 = memref.load %arg3[%c2_114, %c21_115] : memref<8x24xf32, #tpu.memory_space<smem>>
    %c2_116 = arith.constant 2 : index
    %c22_117 = arith.constant 22 : index
    %70 = memref.load %arg3[%c2_116, %c22_117] : memref<8x24xf32, #tpu.memory_space<smem>>
    %c2_118 = arith.constant 2 : index
    %c23_119 = arith.constant 23 : index
    %71 = memref.load %arg3[%c2_118, %c23_119] : memref<8x24xf32, #tpu.memory_space<smem>>
    %c3_120 = arith.constant 3 : index
    %c0_121 = arith.constant 0 : index
    %72 = memref.load %arg3[%c3_120, %c0_121] : memref<8x24xf32, #tpu.memory_space<smem>>
    %c3_122 = arith.constant 3 : index
    %c1_123 = arith.constant 1 : index
    %73 = memref.load %arg3[%c3_122, %c1_123] : memref<8x24xf32, #tpu.memory_space<smem>>
    %c3_124 = arith.constant 3 : index
    %c2_125 = arith.constant 2 : index
    %74 = memref.load %arg3[%c3_124, %c2_125] : memref<8x24xf32, #tpu.memory_space<smem>>
    %c3_126 = arith.constant 3 : index
    %c3_127 = arith.constant 3 : index
    %75 = memref.load %arg3[%c3_126, %c3_127] : memref<8x24xf32, #tpu.memory_space<smem>>
    %c3_128 = arith.constant 3 : index
    %c4_129 = arith.constant 4 : index
    %76 = memref.load %arg3[%c3_128, %c4_129] : memref<8x24xf32, #tpu.memory_space<smem>>
    %c3_130 = arith.constant 3 : index
    %c5_131 = arith.constant 5 : index
    %77 = memref.load %arg3[%c3_130, %c5_131] : memref<8x24xf32, #tpu.memory_space<smem>>
    %c3_132 = arith.constant 3 : index
    %c6_133 = arith.constant 6 : index
    %78 = memref.load %arg3[%c3_132, %c6_133] : memref<8x24xf32, #tpu.memory_space<smem>>
    %c3_134 = arith.constant 3 : index
    %c7_135 = arith.constant 7 : index
    %79 = memref.load %arg3[%c3_134, %c7_135] : memref<8x24xf32, #tpu.memory_space<smem>>
    %c3_136 = arith.constant 3 : index
    %c8_137 = arith.constant 8 : index
    %80 = memref.load %arg3[%c3_136, %c8_137] : memref<8x24xf32, #tpu.memory_space<smem>>
    %c3_138 = arith.constant 3 : index
    %c9_139 = arith.constant 9 : index
    %81 = memref.load %arg3[%c3_138, %c9_139] : memref<8x24xf32, #tpu.memory_space<smem>>
    %c3_140 = arith.constant 3 : index
    %c10_141 = arith.constant 10 : index
    %82 = memref.load %arg3[%c3_140, %c10_141] : memref<8x24xf32, #tpu.memory_space<smem>>
    %c3_142 = arith.constant 3 : index
    %c11_143 = arith.constant 11 : index
    %83 = memref.load %arg3[%c3_142, %c11_143] : memref<8x24xf32, #tpu.memory_space<smem>>
    %c3_144 = arith.constant 3 : index
    %c12_145 = arith.constant 12 : index
    %84 = memref.load %arg3[%c3_144, %c12_145] : memref<8x24xf32, #tpu.memory_space<smem>>
    %c3_146 = arith.constant 3 : index
    %c13_147 = arith.constant 13 : index
    %85 = memref.load %arg3[%c3_146, %c13_147] : memref<8x24xf32, #tpu.memory_space<smem>>
    %c3_148 = arith.constant 3 : index
    %c14_149 = arith.constant 14 : index
    %86 = memref.load %arg3[%c3_148, %c14_149] : memref<8x24xf32, #tpu.memory_space<smem>>
    %c3_150 = arith.constant 3 : index
    %c15_151 = arith.constant 15 : index
    %87 = memref.load %arg3[%c3_150, %c15_151] : memref<8x24xf32, #tpu.memory_space<smem>>
    %c3_152 = arith.constant 3 : index
    %c16_153 = arith.constant 16 : index
    %88 = memref.load %arg3[%c3_152, %c16_153] : memref<8x24xf32, #tpu.memory_space<smem>>
    %c3_154 = arith.constant 3 : index
    %c17_155 = arith.constant 17 : index
    %89 = memref.load %arg3[%c3_154, %c17_155] : memref<8x24xf32, #tpu.memory_space<smem>>
    %c3_156 = arith.constant 3 : index
    %c18_157 = arith.constant 18 : index
    %90 = memref.load %arg3[%c3_156, %c18_157] : memref<8x24xf32, #tpu.memory_space<smem>>
    %c3_158 = arith.constant 3 : index
    %c19_159 = arith.constant 19 : index
    %91 = memref.load %arg3[%c3_158, %c19_159] : memref<8x24xf32, #tpu.memory_space<smem>>
    %c3_160 = arith.constant 3 : index
    %c20_161 = arith.constant 20 : index
    %92 = memref.load %arg3[%c3_160, %c20_161] : memref<8x24xf32, #tpu.memory_space<smem>>
    %c3_162 = arith.constant 3 : index
    %c21_163 = arith.constant 21 : index
    %93 = memref.load %arg3[%c3_162, %c21_163] : memref<8x24xf32, #tpu.memory_space<smem>>
    %c3_164 = arith.constant 3 : index
    %c22_165 = arith.constant 22 : index
    %94 = memref.load %arg3[%c3_164, %c22_165] : memref<8x24xf32, #tpu.memory_space<smem>>
    %c3_166 = arith.constant 3 : index
    %c23_167 = arith.constant 23 : index
    %95 = memref.load %arg3[%c3_166, %c23_167] : memref<8x24xf32, #tpu.memory_space<smem>>
    %c4_168 = arith.constant 4 : index
    %c0_169 = arith.constant 0 : index
    %96 = memref.load %arg3[%c4_168, %c0_169] : memref<8x24xf32, #tpu.memory_space<smem>>
    %c4_170 = arith.constant 4 : index
    %c1_171 = arith.constant 1 : index
    %97 = memref.load %arg3[%c4_170, %c1_171] : memref<8x24xf32, #tpu.memory_space<smem>>
    %c4_172 = arith.constant 4 : index
    %c2_173 = arith.constant 2 : index
    %98 = memref.load %arg3[%c4_172, %c2_173] : memref<8x24xf32, #tpu.memory_space<smem>>
    %c4_174 = arith.constant 4 : index
    %c3_175 = arith.constant 3 : index
    %99 = memref.load %arg3[%c4_174, %c3_175] : memref<8x24xf32, #tpu.memory_space<smem>>
    %c4_176 = arith.constant 4 : index
    %c4_177 = arith.constant 4 : index
    %100 = memref.load %arg3[%c4_176, %c4_177] : memref<8x24xf32, #tpu.memory_space<smem>>
    %c4_178 = arith.constant 4 : index
    %c5_179 = arith.constant 5 : index
    %101 = memref.load %arg3[%c4_178, %c5_179] : memref<8x24xf32, #tpu.memory_space<smem>>
    %c4_180 = arith.constant 4 : index
    %c6_181 = arith.constant 6 : index
    %102 = memref.load %arg3[%c4_180, %c6_181] : memref<8x24xf32, #tpu.memory_space<smem>>
    %c4_182 = arith.constant 4 : index
    %c7_183 = arith.constant 7 : index
    %103 = memref.load %arg3[%c4_182, %c7_183] : memref<8x24xf32, #tpu.memory_space<smem>>
    %c4_184 = arith.constant 4 : index
    %c8_185 = arith.constant 8 : index
    %104 = memref.load %arg3[%c4_184, %c8_185] : memref<8x24xf32, #tpu.memory_space<smem>>
    %c4_186 = arith.constant 4 : index
    %c9_187 = arith.constant 9 : index
    %105 = memref.load %arg3[%c4_186, %c9_187] : memref<8x24xf32, #tpu.memory_space<smem>>
    %c4_188 = arith.constant 4 : index
    %c10_189 = arith.constant 10 : index
    %106 = memref.load %arg3[%c4_188, %c10_189] : memref<8x24xf32, #tpu.memory_space<smem>>
    %c4_190 = arith.constant 4 : index
    %c11_191 = arith.constant 11 : index
    %107 = memref.load %arg3[%c4_190, %c11_191] : memref<8x24xf32, #tpu.memory_space<smem>>
    %c4_192 = arith.constant 4 : index
    %c12_193 = arith.constant 12 : index
    %108 = memref.load %arg3[%c4_192, %c12_193] : memref<8x24xf32, #tpu.memory_space<smem>>
    %c4_194 = arith.constant 4 : index
    %c13_195 = arith.constant 13 : index
    %109 = memref.load %arg3[%c4_194, %c13_195] : memref<8x24xf32, #tpu.memory_space<smem>>
    %c4_196 = arith.constant 4 : index
    %c14_197 = arith.constant 14 : index
    %110 = memref.load %arg3[%c4_196, %c14_197] : memref<8x24xf32, #tpu.memory_space<smem>>
    %c4_198 = arith.constant 4 : index
    %c15_199 = arith.constant 15 : index
    %111 = memref.load %arg3[%c4_198, %c15_199] : memref<8x24xf32, #tpu.memory_space<smem>>
    %c4_200 = arith.constant 4 : index
    %c16_201 = arith.constant 16 : index
    %112 = memref.load %arg3[%c4_200, %c16_201] : memref<8x24xf32, #tpu.memory_space<smem>>
    %c4_202 = arith.constant 4 : index
    %c17_203 = arith.constant 17 : index
    %113 = memref.load %arg3[%c4_202, %c17_203] : memref<8x24xf32, #tpu.memory_space<smem>>
    %c4_204 = arith.constant 4 : index
    %c18_205 = arith.constant 18 : index
    %114 = memref.load %arg3[%c4_204, %c18_205] : memref<8x24xf32, #tpu.memory_space<smem>>
    %c4_206 = arith.constant 4 : index
    %c19_207 = arith.constant 19 : index
    %115 = memref.load %arg3[%c4_206, %c19_207] : memref<8x24xf32, #tpu.memory_space<smem>>
    %c4_208 = arith.constant 4 : index
    %c20_209 = arith.constant 20 : index
    %116 = memref.load %arg3[%c4_208, %c20_209] : memref<8x24xf32, #tpu.memory_space<smem>>
    %c4_210 = arith.constant 4 : index
    %c21_211 = arith.constant 21 : index
    %117 = memref.load %arg3[%c4_210, %c21_211] : memref<8x24xf32, #tpu.memory_space<smem>>
    %c4_212 = arith.constant 4 : index
    %c22_213 = arith.constant 22 : index
    %118 = memref.load %arg3[%c4_212, %c22_213] : memref<8x24xf32, #tpu.memory_space<smem>>
    %c4_214 = arith.constant 4 : index
    %c23_215 = arith.constant 23 : index
    %119 = memref.load %arg3[%c4_214, %c23_215] : memref<8x24xf32, #tpu.memory_space<smem>>
    %c5_216 = arith.constant 5 : index
    %c0_217 = arith.constant 0 : index
    %120 = memref.load %arg3[%c5_216, %c0_217] : memref<8x24xf32, #tpu.memory_space<smem>>
    %c5_218 = arith.constant 5 : index
    %c1_219 = arith.constant 1 : index
    %121 = memref.load %arg3[%c5_218, %c1_219] : memref<8x24xf32, #tpu.memory_space<smem>>
    %c5_220 = arith.constant 5 : index
    %c2_221 = arith.constant 2 : index
    %122 = memref.load %arg3[%c5_220, %c2_221] : memref<8x24xf32, #tpu.memory_space<smem>>
    %c5_222 = arith.constant 5 : index
    %c3_223 = arith.constant 3 : index
    %123 = memref.load %arg3[%c5_222, %c3_223] : memref<8x24xf32, #tpu.memory_space<smem>>
    %c5_224 = arith.constant 5 : index
    %c4_225 = arith.constant 4 : index
    %124 = memref.load %arg3[%c5_224, %c4_225] : memref<8x24xf32, #tpu.memory_space<smem>>
    %c5_226 = arith.constant 5 : index
    %c5_227 = arith.constant 5 : index
    %125 = memref.load %arg3[%c5_226, %c5_227] : memref<8x24xf32, #tpu.memory_space<smem>>
    %c5_228 = arith.constant 5 : index
    %c6_229 = arith.constant 6 : index
    %126 = memref.load %arg3[%c5_228, %c6_229] : memref<8x24xf32, #tpu.memory_space<smem>>
    %c5_230 = arith.constant 5 : index
    %c7_231 = arith.constant 7 : index
    %127 = memref.load %arg3[%c5_230, %c7_231] : memref<8x24xf32, #tpu.memory_space<smem>>
    %c5_232 = arith.constant 5 : index
    %c8_233 = arith.constant 8 : index
    %128 = memref.load %arg3[%c5_232, %c8_233] : memref<8x24xf32, #tpu.memory_space<smem>>
    %c5_234 = arith.constant 5 : index
    %c9_235 = arith.constant 9 : index
    %129 = memref.load %arg3[%c5_234, %c9_235] : memref<8x24xf32, #tpu.memory_space<smem>>
    %c5_236 = arith.constant 5 : index
    %c10_237 = arith.constant 10 : index
    %130 = memref.load %arg3[%c5_236, %c10_237] : memref<8x24xf32, #tpu.memory_space<smem>>
    %c5_238 = arith.constant 5 : index
    %c11_239 = arith.constant 11 : index
    %131 = memref.load %arg3[%c5_238, %c11_239] : memref<8x24xf32, #tpu.memory_space<smem>>
    %c5_240 = arith.constant 5 : index
    %c12_241 = arith.constant 12 : index
    %132 = memref.load %arg3[%c5_240, %c12_241] : memref<8x24xf32, #tpu.memory_space<smem>>
    %c5_242 = arith.constant 5 : index
    %c13_243 = arith.constant 13 : index
    %133 = memref.load %arg3[%c5_242, %c13_243] : memref<8x24xf32, #tpu.memory_space<smem>>
    %c5_244 = arith.constant 5 : index
    %c14_245 = arith.constant 14 : index
    %134 = memref.load %arg3[%c5_244, %c14_245] : memref<8x24xf32, #tpu.memory_space<smem>>
    %c5_246 = arith.constant 5 : index
    %c15_247 = arith.constant 15 : index
    %135 = memref.load %arg3[%c5_246, %c15_247] : memref<8x24xf32, #tpu.memory_space<smem>>
    %c5_248 = arith.constant 5 : index
    %c16_249 = arith.constant 16 : index
    %136 = memref.load %arg3[%c5_248, %c16_249] : memref<8x24xf32, #tpu.memory_space<smem>>
    %c5_250 = arith.constant 5 : index
    %c17_251 = arith.constant 17 : index
    %137 = memref.load %arg3[%c5_250, %c17_251] : memref<8x24xf32, #tpu.memory_space<smem>>
    %c5_252 = arith.constant 5 : index
    %c18_253 = arith.constant 18 : index
    %138 = memref.load %arg3[%c5_252, %c18_253] : memref<8x24xf32, #tpu.memory_space<smem>>
    %c5_254 = arith.constant 5 : index
    %c19_255 = arith.constant 19 : index
    %139 = memref.load %arg3[%c5_254, %c19_255] : memref<8x24xf32, #tpu.memory_space<smem>>
    %c5_256 = arith.constant 5 : index
    %c20_257 = arith.constant 20 : index
    %140 = memref.load %arg3[%c5_256, %c20_257] : memref<8x24xf32, #tpu.memory_space<smem>>
    %c5_258 = arith.constant 5 : index
    %c21_259 = arith.constant 21 : index
    %141 = memref.load %arg3[%c5_258, %c21_259] : memref<8x24xf32, #tpu.memory_space<smem>>
    %c5_260 = arith.constant 5 : index
    %c22_261 = arith.constant 22 : index
    %142 = memref.load %arg3[%c5_260, %c22_261] : memref<8x24xf32, #tpu.memory_space<smem>>
    %c5_262 = arith.constant 5 : index
    %c23_263 = arith.constant 23 : index
    %143 = memref.load %arg3[%c5_262, %c23_263] : memref<8x24xf32, #tpu.memory_space<smem>>
    %c6_264 = arith.constant 6 : index
    %c0_265 = arith.constant 0 : index
    %144 = memref.load %arg3[%c6_264, %c0_265] : memref<8x24xf32, #tpu.memory_space<smem>>
    %c6_266 = arith.constant 6 : index
    %c1_267 = arith.constant 1 : index
    %145 = memref.load %arg3[%c6_266, %c1_267] : memref<8x24xf32, #tpu.memory_space<smem>>
    %c6_268 = arith.constant 6 : index
    %c2_269 = arith.constant 2 : index
    %146 = memref.load %arg3[%c6_268, %c2_269] : memref<8x24xf32, #tpu.memory_space<smem>>
    %c6_270 = arith.constant 6 : index
    %c3_271 = arith.constant 3 : index
    %147 = memref.load %arg3[%c6_270, %c3_271] : memref<8x24xf32, #tpu.memory_space<smem>>
    %c6_272 = arith.constant 6 : index
    %c4_273 = arith.constant 4 : index
    %148 = memref.load %arg3[%c6_272, %c4_273] : memref<8x24xf32, #tpu.memory_space<smem>>
    %c6_274 = arith.constant 6 : index
    %c5_275 = arith.constant 5 : index
    %149 = memref.load %arg3[%c6_274, %c5_275] : memref<8x24xf32, #tpu.memory_space<smem>>
    %c6_276 = arith.constant 6 : index
    %c6_277 = arith.constant 6 : index
    %150 = memref.load %arg3[%c6_276, %c6_277] : memref<8x24xf32, #tpu.memory_space<smem>>
    %c6_278 = arith.constant 6 : index
    %c7_279 = arith.constant 7 : index
    %151 = memref.load %arg3[%c6_278, %c7_279] : memref<8x24xf32, #tpu.memory_space<smem>>
    %c6_280 = arith.constant 6 : index
    %c8_281 = arith.constant 8 : index
    %152 = memref.load %arg3[%c6_280, %c8_281] : memref<8x24xf32, #tpu.memory_space<smem>>
    %c6_282 = arith.constant 6 : index
    %c9_283 = arith.constant 9 : index
    %153 = memref.load %arg3[%c6_282, %c9_283] : memref<8x24xf32, #tpu.memory_space<smem>>
    %c6_284 = arith.constant 6 : index
    %c10_285 = arith.constant 10 : index
    %154 = memref.load %arg3[%c6_284, %c10_285] : memref<8x24xf32, #tpu.memory_space<smem>>
    %c6_286 = arith.constant 6 : index
    %c11_287 = arith.constant 11 : index
    %155 = memref.load %arg3[%c6_286, %c11_287] : memref<8x24xf32, #tpu.memory_space<smem>>
    %c6_288 = arith.constant 6 : index
    %c12_289 = arith.constant 12 : index
    %156 = memref.load %arg3[%c6_288, %c12_289] : memref<8x24xf32, #tpu.memory_space<smem>>
    %c6_290 = arith.constant 6 : index
    %c13_291 = arith.constant 13 : index
    %157 = memref.load %arg3[%c6_290, %c13_291] : memref<8x24xf32, #tpu.memory_space<smem>>
    %c6_292 = arith.constant 6 : index
    %c14_293 = arith.constant 14 : index
    %158 = memref.load %arg3[%c6_292, %c14_293] : memref<8x24xf32, #tpu.memory_space<smem>>
    %c6_294 = arith.constant 6 : index
    %c15_295 = arith.constant 15 : index
    %159 = memref.load %arg3[%c6_294, %c15_295] : memref<8x24xf32, #tpu.memory_space<smem>>
    %c6_296 = arith.constant 6 : index
    %c16_297 = arith.constant 16 : index
    %160 = memref.load %arg3[%c6_296, %c16_297] : memref<8x24xf32, #tpu.memory_space<smem>>
    %c6_298 = arith.constant 6 : index
    %c17_299 = arith.constant 17 : index
    %161 = memref.load %arg3[%c6_298, %c17_299] : memref<8x24xf32, #tpu.memory_space<smem>>
    %c6_300 = arith.constant 6 : index
    %c18_301 = arith.constant 18 : index
    %162 = memref.load %arg3[%c6_300, %c18_301] : memref<8x24xf32, #tpu.memory_space<smem>>
    %c6_302 = arith.constant 6 : index
    %c19_303 = arith.constant 19 : index
    %163 = memref.load %arg3[%c6_302, %c19_303] : memref<8x24xf32, #tpu.memory_space<smem>>
    %c6_304 = arith.constant 6 : index
    %c20_305 = arith.constant 20 : index
    %164 = memref.load %arg3[%c6_304, %c20_305] : memref<8x24xf32, #tpu.memory_space<smem>>
    %c6_306 = arith.constant 6 : index
    %c21_307 = arith.constant 21 : index
    %165 = memref.load %arg3[%c6_306, %c21_307] : memref<8x24xf32, #tpu.memory_space<smem>>
    %c6_308 = arith.constant 6 : index
    %c22_309 = arith.constant 22 : index
    %166 = memref.load %arg3[%c6_308, %c22_309] : memref<8x24xf32, #tpu.memory_space<smem>>
    %c6_310 = arith.constant 6 : index
    %c23_311 = arith.constant 23 : index
    %167 = memref.load %arg3[%c6_310, %c23_311] : memref<8x24xf32, #tpu.memory_space<smem>>
    %c7_312 = arith.constant 7 : index
    %c0_313 = arith.constant 0 : index
    %168 = memref.load %arg3[%c7_312, %c0_313] : memref<8x24xf32, #tpu.memory_space<smem>>
    %c7_314 = arith.constant 7 : index
    %c1_315 = arith.constant 1 : index
    %169 = memref.load %arg3[%c7_314, %c1_315] : memref<8x24xf32, #tpu.memory_space<smem>>
    %c7_316 = arith.constant 7 : index
    %c2_317 = arith.constant 2 : index
    %170 = memref.load %arg3[%c7_316, %c2_317] : memref<8x24xf32, #tpu.memory_space<smem>>
    %c7_318 = arith.constant 7 : index
    %c3_319 = arith.constant 3 : index
    %171 = memref.load %arg3[%c7_318, %c3_319] : memref<8x24xf32, #tpu.memory_space<smem>>
    %c7_320 = arith.constant 7 : index
    %c4_321 = arith.constant 4 : index
    %172 = memref.load %arg3[%c7_320, %c4_321] : memref<8x24xf32, #tpu.memory_space<smem>>
    %c7_322 = arith.constant 7 : index
    %c5_323 = arith.constant 5 : index
    %173 = memref.load %arg3[%c7_322, %c5_323] : memref<8x24xf32, #tpu.memory_space<smem>>
    %c7_324 = arith.constant 7 : index
    %c6_325 = arith.constant 6 : index
    %174 = memref.load %arg3[%c7_324, %c6_325] : memref<8x24xf32, #tpu.memory_space<smem>>
    %c7_326 = arith.constant 7 : index
    %c7_327 = arith.constant 7 : index
    %175 = memref.load %arg3[%c7_326, %c7_327] : memref<8x24xf32, #tpu.memory_space<smem>>
    %c7_328 = arith.constant 7 : index
    %c8_329 = arith.constant 8 : index
    %176 = memref.load %arg3[%c7_328, %c8_329] : memref<8x24xf32, #tpu.memory_space<smem>>
    %c7_330 = arith.constant 7 : index
    %c9_331 = arith.constant 9 : index
    %177 = memref.load %arg3[%c7_330, %c9_331] : memref<8x24xf32, #tpu.memory_space<smem>>
    %c7_332 = arith.constant 7 : index
    %c10_333 = arith.constant 10 : index
    %178 = memref.load %arg3[%c7_332, %c10_333] : memref<8x24xf32, #tpu.memory_space<smem>>
    %c7_334 = arith.constant 7 : index
    %c11_335 = arith.constant 11 : index
    %179 = memref.load %arg3[%c7_334, %c11_335] : memref<8x24xf32, #tpu.memory_space<smem>>
    %c7_336 = arith.constant 7 : index
    %c12_337 = arith.constant 12 : index
    %180 = memref.load %arg3[%c7_336, %c12_337] : memref<8x24xf32, #tpu.memory_space<smem>>
    %c7_338 = arith.constant 7 : index
    %c13_339 = arith.constant 13 : index
    %181 = memref.load %arg3[%c7_338, %c13_339] : memref<8x24xf32, #tpu.memory_space<smem>>
    %c7_340 = arith.constant 7 : index
    %c14_341 = arith.constant 14 : index
    %182 = memref.load %arg3[%c7_340, %c14_341] : memref<8x24xf32, #tpu.memory_space<smem>>
    %c7_342 = arith.constant 7 : index
    %c15_343 = arith.constant 15 : index
    %183 = memref.load %arg3[%c7_342, %c15_343] : memref<8x24xf32, #tpu.memory_space<smem>>
    %c7_344 = arith.constant 7 : index
    %c16_345 = arith.constant 16 : index
    %184 = memref.load %arg3[%c7_344, %c16_345] : memref<8x24xf32, #tpu.memory_space<smem>>
    %c7_346 = arith.constant 7 : index
    %c17_347 = arith.constant 17 : index
    %185 = memref.load %arg3[%c7_346, %c17_347] : memref<8x24xf32, #tpu.memory_space<smem>>
    %c7_348 = arith.constant 7 : index
    %c18_349 = arith.constant 18 : index
    %186 = memref.load %arg3[%c7_348, %c18_349] : memref<8x24xf32, #tpu.memory_space<smem>>
    %c7_350 = arith.constant 7 : index
    %c19_351 = arith.constant 19 : index
    %187 = memref.load %arg3[%c7_350, %c19_351] : memref<8x24xf32, #tpu.memory_space<smem>>
    %c7_352 = arith.constant 7 : index
    %c20_353 = arith.constant 20 : index
    %188 = memref.load %arg3[%c7_352, %c20_353] : memref<8x24xf32, #tpu.memory_space<smem>>
    %c7_354 = arith.constant 7 : index
    %c21_355 = arith.constant 21 : index
    %189 = memref.load %arg3[%c7_354, %c21_355] : memref<8x24xf32, #tpu.memory_space<smem>>
    %c7_356 = arith.constant 7 : index
    %c22_357 = arith.constant 22 : index
    %190 = memref.load %arg3[%c7_356, %c22_357] : memref<8x24xf32, #tpu.memory_space<smem>>
    %c7_358 = arith.constant 7 : index
    %c23_359 = arith.constant 23 : index
    %191 = memref.load %arg3[%c7_358, %c23_359] : memref<8x24xf32, #tpu.memory_space<smem>>
    %c0_360 = arith.constant 0 : index
    %192 = memref.load %arg4[%c0_360] : memref<8xf32, #tpu.memory_space<smem>>
    %c1_361 = arith.constant 1 : index
    %193 = memref.load %arg4[%c1_361] : memref<8xf32, #tpu.memory_space<smem>>
    %c2_362 = arith.constant 2 : index
    %194 = memref.load %arg4[%c2_362] : memref<8xf32, #tpu.memory_space<smem>>
    %c3_363 = arith.constant 3 : index
    %195 = memref.load %arg4[%c3_363] : memref<8xf32, #tpu.memory_space<smem>>
    %c4_364 = arith.constant 4 : index
    %196 = memref.load %arg4[%c4_364] : memref<8xf32, #tpu.memory_space<smem>>
    %c5_365 = arith.constant 5 : index
    %197 = memref.load %arg4[%c5_365] : memref<8xf32, #tpu.memory_space<smem>>
    %c6_366 = arith.constant 6 : index
    %198 = memref.load %arg4[%c6_366] : memref<8xf32, #tpu.memory_space<smem>>
    %c7_367 = arith.constant 7 : index
    %199 = memref.load %arg4[%c7_367] : memref<8xf32, #tpu.memory_space<smem>>
    %c128_i32 = arith.constant 128 : i32
    %200 = arith.muli %arg1, %c128_i32 : i32
    %201 = tpu.assume_multiple %200, 128 : i32
    %c0_i32 = arith.constant 0 : i32
    %202 = arith.addi %201, %c0_i32 : i32
    %203 = tpu.assume_multiple %202, 128 : i32
    %c0_368 = arith.constant 0 : index
    %204 = arith.index_cast %203 : i32 to index
    %205 = vector.load %arg2[%c0_368, %204] : memref<8x256xf32, #tpu.memory_space<vmem>>, vector<8x256xf32>
    %206 = vector.broadcast %192 : f32 to vector<8x128xf32>
    %207 = vector.broadcast %193 : f32 to vector<8x128xf32>
    %208 = vector.broadcast %194 : f32 to vector<8x128xf32>
    %209 = vector.broadcast %195 : f32 to vector<8x128xf32>
    %210 = vector.broadcast %196 : f32 to vector<8x128xf32>
    %211 = vector.broadcast %197 : f32 to vector<8x128xf32>
    %212 = vector.broadcast %198 : f32 to vector<8x128xf32>
    %213 = vector.broadcast %199 : f32 to vector<8x128xf32>
    %214 = vector.extract_strided_slice %205 {offsets = [0, 0], sizes = [8, 128], strides = [1, 1]} : vector<8x256xf32> to vector<8x128xf32>
    %215 = vector.broadcast %0 : f32 to vector<8x128xf32>
    %216 = arith.mulf %215, %214 : vector<8x128xf32>
    %217 = arith.addf %206, %216 : vector<8x128xf32>
    %218 = vector.broadcast %24 : f32 to vector<8x128xf32>
    %219 = arith.mulf %218, %214 : vector<8x128xf32>
    %220 = arith.addf %207, %219 : vector<8x128xf32>
    %221 = vector.broadcast %48 : f32 to vector<8x128xf32>
    %222 = arith.mulf %221, %214 : vector<8x128xf32>
    %223 = arith.addf %208, %222 : vector<8x128xf32>
    %224 = vector.broadcast %72 : f32 to vector<8x128xf32>
    %225 = arith.mulf %224, %214 : vector<8x128xf32>
    %226 = arith.addf %209, %225 : vector<8x128xf32>
    %227 = vector.broadcast %96 : f32 to vector<8x128xf32>
    %228 = arith.mulf %227, %214 : vector<8x128xf32>
    %229 = arith.addf %210, %228 : vector<8x128xf32>
    %230 = vector.broadcast %120 : f32 to vector<8x128xf32>
    %231 = arith.mulf %230, %214 : vector<8x128xf32>
    %232 = arith.addf %211, %231 : vector<8x128xf32>
    %233 = vector.broadcast %144 : f32 to vector<8x128xf32>
    %234 = arith.mulf %233, %214 : vector<8x128xf32>
    %235 = arith.addf %212, %234 : vector<8x128xf32>
    %236 = vector.broadcast %168 : f32 to vector<8x128xf32>
    %237 = arith.mulf %236, %214 : vector<8x128xf32>
    %238 = arith.addf %213, %237 : vector<8x128xf32>
    %239 = vector.extract_strided_slice %205 {offsets = [0, 1], sizes = [8, 128], strides = [1, 1]} : vector<8x256xf32> to vector<8x128xf32>
    %240 = vector.broadcast %1 : f32 to vector<8x128xf32>
    %241 = arith.mulf %240, %239 : vector<8x128xf32>
    %242 = arith.addf %217, %241 : vector<8x128xf32>
    %243 = vector.broadcast %25 : f32 to vector<8x128xf32>
    %244 = arith.mulf %243, %239 : vector<8x128xf32>
    %245 = arith.addf %220, %244 : vector<8x128xf32>
    %246 = vector.broadcast %49 : f32 to vector<8x128xf32>
    %247 = arith.mulf %246, %239 : vector<8x128xf32>
    %248 = arith.addf %223, %247 : vector<8x128xf32>
    %249 = vector.broadcast %73 : f32 to vector<8x128xf32>
    %250 = arith.mulf %249, %239 : vector<8x128xf32>
    %251 = arith.addf %226, %250 : vector<8x128xf32>
    %252 = vector.broadcast %97 : f32 to vector<8x128xf32>
    %253 = arith.mulf %252, %239 : vector<8x128xf32>
    %254 = arith.addf %229, %253 : vector<8x128xf32>
    %255 = vector.broadcast %121 : f32 to vector<8x128xf32>
    %256 = arith.mulf %255, %239 : vector<8x128xf32>
    %257 = arith.addf %232, %256 : vector<8x128xf32>
    %258 = vector.broadcast %145 : f32 to vector<8x128xf32>
    %259 = arith.mulf %258, %239 : vector<8x128xf32>
    %260 = arith.addf %235, %259 : vector<8x128xf32>
    %261 = vector.broadcast %169 : f32 to vector<8x128xf32>
    %262 = arith.mulf %261, %239 : vector<8x128xf32>
    %263 = arith.addf %238, %262 : vector<8x128xf32>
    %264 = vector.extract_strided_slice %205 {offsets = [0, 2], sizes = [8, 128], strides = [1, 1]} : vector<8x256xf32> to vector<8x128xf32>
    %265 = vector.broadcast %2 : f32 to vector<8x128xf32>
    %266 = arith.mulf %265, %264 : vector<8x128xf32>
    %267 = arith.addf %242, %266 : vector<8x128xf32>
    %268 = vector.broadcast %26 : f32 to vector<8x128xf32>
    %269 = arith.mulf %268, %264 : vector<8x128xf32>
    %270 = arith.addf %245, %269 : vector<8x128xf32>
    %271 = vector.broadcast %50 : f32 to vector<8x128xf32>
    %272 = arith.mulf %271, %264 : vector<8x128xf32>
    %273 = arith.addf %248, %272 : vector<8x128xf32>
    %274 = vector.broadcast %74 : f32 to vector<8x128xf32>
    %275 = arith.mulf %274, %264 : vector<8x128xf32>
    %276 = arith.addf %251, %275 : vector<8x128xf32>
    %277 = vector.broadcast %98 : f32 to vector<8x128xf32>
    %278 = arith.mulf %277, %264 : vector<8x128xf32>
    %279 = arith.addf %254, %278 : vector<8x128xf32>
    %280 = vector.broadcast %122 : f32 to vector<8x128xf32>
    %281 = arith.mulf %280, %264 : vector<8x128xf32>
    %282 = arith.addf %257, %281 : vector<8x128xf32>
    %283 = vector.broadcast %146 : f32 to vector<8x128xf32>
    %284 = arith.mulf %283, %264 : vector<8x128xf32>
    %285 = arith.addf %260, %284 : vector<8x128xf32>
    %286 = vector.broadcast %170 : f32 to vector<8x128xf32>
    %287 = arith.mulf %286, %264 : vector<8x128xf32>
    %288 = arith.addf %263, %287 : vector<8x128xf32>
    %289 = vector.extract_strided_slice %205 {offsets = [0, 3], sizes = [8, 128], strides = [1, 1]} : vector<8x256xf32> to vector<8x128xf32>
    %290 = vector.broadcast %3 : f32 to vector<8x128xf32>
    %291 = arith.mulf %290, %289 : vector<8x128xf32>
    %292 = arith.addf %267, %291 : vector<8x128xf32>
    %293 = vector.broadcast %27 : f32 to vector<8x128xf32>
    %294 = arith.mulf %293, %289 : vector<8x128xf32>
    %295 = arith.addf %270, %294 : vector<8x128xf32>
    %296 = vector.broadcast %51 : f32 to vector<8x128xf32>
    %297 = arith.mulf %296, %289 : vector<8x128xf32>
    %298 = arith.addf %273, %297 : vector<8x128xf32>
    %299 = vector.broadcast %75 : f32 to vector<8x128xf32>
    %300 = arith.mulf %299, %289 : vector<8x128xf32>
    %301 = arith.addf %276, %300 : vector<8x128xf32>
    %302 = vector.broadcast %99 : f32 to vector<8x128xf32>
    %303 = arith.mulf %302, %289 : vector<8x128xf32>
    %304 = arith.addf %279, %303 : vector<8x128xf32>
    %305 = vector.broadcast %123 : f32 to vector<8x128xf32>
    %306 = arith.mulf %305, %289 : vector<8x128xf32>
    %307 = arith.addf %282, %306 : vector<8x128xf32>
    %308 = vector.broadcast %147 : f32 to vector<8x128xf32>
    %309 = arith.mulf %308, %289 : vector<8x128xf32>
    %310 = arith.addf %285, %309 : vector<8x128xf32>
    %311 = vector.broadcast %171 : f32 to vector<8x128xf32>
    %312 = arith.mulf %311, %289 : vector<8x128xf32>
    %313 = arith.addf %288, %312 : vector<8x128xf32>
    %314 = vector.extract_strided_slice %205 {offsets = [0, 4], sizes = [8, 128], strides = [1, 1]} : vector<8x256xf32> to vector<8x128xf32>
    %315 = vector.broadcast %4 : f32 to vector<8x128xf32>
    %316 = arith.mulf %315, %314 : vector<8x128xf32>
    %317 = arith.addf %292, %316 : vector<8x128xf32>
    %318 = vector.broadcast %28 : f32 to vector<8x128xf32>
    %319 = arith.mulf %318, %314 : vector<8x128xf32>
    %320 = arith.addf %295, %319 : vector<8x128xf32>
    %321 = vector.broadcast %52 : f32 to vector<8x128xf32>
    %322 = arith.mulf %321, %314 : vector<8x128xf32>
    %323 = arith.addf %298, %322 : vector<8x128xf32>
    %324 = vector.broadcast %76 : f32 to vector<8x128xf32>
    %325 = arith.mulf %324, %314 : vector<8x128xf32>
    %326 = arith.addf %301, %325 : vector<8x128xf32>
    %327 = vector.broadcast %100 : f32 to vector<8x128xf32>
    %328 = arith.mulf %327, %314 : vector<8x128xf32>
    %329 = arith.addf %304, %328 : vector<8x128xf32>
    %330 = vector.broadcast %124 : f32 to vector<8x128xf32>
    %331 = arith.mulf %330, %314 : vector<8x128xf32>
    %332 = arith.addf %307, %331 : vector<8x128xf32>
    %333 = vector.broadcast %148 : f32 to vector<8x128xf32>
    %334 = arith.mulf %333, %314 : vector<8x128xf32>
    %335 = arith.addf %310, %334 : vector<8x128xf32>
    %336 = vector.broadcast %172 : f32 to vector<8x128xf32>
    %337 = arith.mulf %336, %314 : vector<8x128xf32>
    %338 = arith.addf %313, %337 : vector<8x128xf32>
    %339 = vector.extract_strided_slice %205 {offsets = [0, 5], sizes = [8, 128], strides = [1, 1]} : vector<8x256xf32> to vector<8x128xf32>
    %340 = vector.broadcast %5 : f32 to vector<8x128xf32>
    %341 = arith.mulf %340, %339 : vector<8x128xf32>
    %342 = arith.addf %317, %341 : vector<8x128xf32>
    %343 = vector.broadcast %29 : f32 to vector<8x128xf32>
    %344 = arith.mulf %343, %339 : vector<8x128xf32>
    %345 = arith.addf %320, %344 : vector<8x128xf32>
    %346 = vector.broadcast %53 : f32 to vector<8x128xf32>
    %347 = arith.mulf %346, %339 : vector<8x128xf32>
    %348 = arith.addf %323, %347 : vector<8x128xf32>
    %349 = vector.broadcast %77 : f32 to vector<8x128xf32>
    %350 = arith.mulf %349, %339 : vector<8x128xf32>
    %351 = arith.addf %326, %350 : vector<8x128xf32>
    %352 = vector.broadcast %101 : f32 to vector<8x128xf32>
    %353 = arith.mulf %352, %339 : vector<8x128xf32>
    %354 = arith.addf %329, %353 : vector<8x128xf32>
    %355 = vector.broadcast %125 : f32 to vector<8x128xf32>
    %356 = arith.mulf %355, %339 : vector<8x128xf32>
    %357 = arith.addf %332, %356 : vector<8x128xf32>
    %358 = vector.broadcast %149 : f32 to vector<8x128xf32>
    %359 = arith.mulf %358, %339 : vector<8x128xf32>
    %360 = arith.addf %335, %359 : vector<8x128xf32>
    %361 = vector.broadcast %173 : f32 to vector<8x128xf32>
    %362 = arith.mulf %361, %339 : vector<8x128xf32>
    %363 = arith.addf %338, %362 : vector<8x128xf32>
    %364 = vector.extract_strided_slice %205 {offsets = [0, 6], sizes = [8, 128], strides = [1, 1]} : vector<8x256xf32> to vector<8x128xf32>
    %365 = vector.broadcast %6 : f32 to vector<8x128xf32>
    %366 = arith.mulf %365, %364 : vector<8x128xf32>
    %367 = arith.addf %342, %366 : vector<8x128xf32>
    %368 = vector.broadcast %30 : f32 to vector<8x128xf32>
    %369 = arith.mulf %368, %364 : vector<8x128xf32>
    %370 = arith.addf %345, %369 : vector<8x128xf32>
    %371 = vector.broadcast %54 : f32 to vector<8x128xf32>
    %372 = arith.mulf %371, %364 : vector<8x128xf32>
    %373 = arith.addf %348, %372 : vector<8x128xf32>
    %374 = vector.broadcast %78 : f32 to vector<8x128xf32>
    %375 = arith.mulf %374, %364 : vector<8x128xf32>
    %376 = arith.addf %351, %375 : vector<8x128xf32>
    %377 = vector.broadcast %102 : f32 to vector<8x128xf32>
    %378 = arith.mulf %377, %364 : vector<8x128xf32>
    %379 = arith.addf %354, %378 : vector<8x128xf32>
    %380 = vector.broadcast %126 : f32 to vector<8x128xf32>
    %381 = arith.mulf %380, %364 : vector<8x128xf32>
    %382 = arith.addf %357, %381 : vector<8x128xf32>
    %383 = vector.broadcast %150 : f32 to vector<8x128xf32>
    %384 = arith.mulf %383, %364 : vector<8x128xf32>
    %385 = arith.addf %360, %384 : vector<8x128xf32>
    %386 = vector.broadcast %174 : f32 to vector<8x128xf32>
    %387 = arith.mulf %386, %364 : vector<8x128xf32>
    %388 = arith.addf %363, %387 : vector<8x128xf32>
    %389 = vector.extract_strided_slice %205 {offsets = [0, 7], sizes = [8, 128], strides = [1, 1]} : vector<8x256xf32> to vector<8x128xf32>
    %390 = vector.broadcast %7 : f32 to vector<8x128xf32>
    %391 = arith.mulf %390, %389 : vector<8x128xf32>
    %392 = arith.addf %367, %391 : vector<8x128xf32>
    %393 = vector.broadcast %31 : f32 to vector<8x128xf32>
    %394 = arith.mulf %393, %389 : vector<8x128xf32>
    %395 = arith.addf %370, %394 : vector<8x128xf32>
    %396 = vector.broadcast %55 : f32 to vector<8x128xf32>
    %397 = arith.mulf %396, %389 : vector<8x128xf32>
    %398 = arith.addf %373, %397 : vector<8x128xf32>
    %399 = vector.broadcast %79 : f32 to vector<8x128xf32>
    %400 = arith.mulf %399, %389 : vector<8x128xf32>
    %401 = arith.addf %376, %400 : vector<8x128xf32>
    %402 = vector.broadcast %103 : f32 to vector<8x128xf32>
    %403 = arith.mulf %402, %389 : vector<8x128xf32>
    %404 = arith.addf %379, %403 : vector<8x128xf32>
    %405 = vector.broadcast %127 : f32 to vector<8x128xf32>
    %406 = arith.mulf %405, %389 : vector<8x128xf32>
    %407 = arith.addf %382, %406 : vector<8x128xf32>
    %408 = vector.broadcast %151 : f32 to vector<8x128xf32>
    %409 = arith.mulf %408, %389 : vector<8x128xf32>
    %410 = arith.addf %385, %409 : vector<8x128xf32>
    %411 = vector.broadcast %175 : f32 to vector<8x128xf32>
    %412 = arith.mulf %411, %389 : vector<8x128xf32>
    %413 = arith.addf %388, %412 : vector<8x128xf32>
    %414 = vector.extract_strided_slice %205 {offsets = [0, 8], sizes = [8, 128], strides = [1, 1]} : vector<8x256xf32> to vector<8x128xf32>
    %415 = vector.broadcast %8 : f32 to vector<8x128xf32>
    %416 = arith.mulf %415, %414 : vector<8x128xf32>
    %417 = arith.addf %392, %416 : vector<8x128xf32>
    %418 = vector.broadcast %32 : f32 to vector<8x128xf32>
    %419 = arith.mulf %418, %414 : vector<8x128xf32>
    %420 = arith.addf %395, %419 : vector<8x128xf32>
    %421 = vector.broadcast %56 : f32 to vector<8x128xf32>
    %422 = arith.mulf %421, %414 : vector<8x128xf32>
    %423 = arith.addf %398, %422 : vector<8x128xf32>
    %424 = vector.broadcast %80 : f32 to vector<8x128xf32>
    %425 = arith.mulf %424, %414 : vector<8x128xf32>
    %426 = arith.addf %401, %425 : vector<8x128xf32>
    %427 = vector.broadcast %104 : f32 to vector<8x128xf32>
    %428 = arith.mulf %427, %414 : vector<8x128xf32>
    %429 = arith.addf %404, %428 : vector<8x128xf32>
    %430 = vector.broadcast %128 : f32 to vector<8x128xf32>
    %431 = arith.mulf %430, %414 : vector<8x128xf32>
    %432 = arith.addf %407, %431 : vector<8x128xf32>
    %433 = vector.broadcast %152 : f32 to vector<8x128xf32>
    %434 = arith.mulf %433, %414 : vector<8x128xf32>
    %435 = arith.addf %410, %434 : vector<8x128xf32>
    %436 = vector.broadcast %176 : f32 to vector<8x128xf32>
    %437 = arith.mulf %436, %414 : vector<8x128xf32>
    %438 = arith.addf %413, %437 : vector<8x128xf32>
    %439 = vector.extract_strided_slice %205 {offsets = [0, 9], sizes = [8, 128], strides = [1, 1]} : vector<8x256xf32> to vector<8x128xf32>
    %440 = vector.broadcast %9 : f32 to vector<8x128xf32>
    %441 = arith.mulf %440, %439 : vector<8x128xf32>
    %442 = arith.addf %417, %441 : vector<8x128xf32>
    %443 = vector.broadcast %33 : f32 to vector<8x128xf32>
    %444 = arith.mulf %443, %439 : vector<8x128xf32>
    %445 = arith.addf %420, %444 : vector<8x128xf32>
    %446 = vector.broadcast %57 : f32 to vector<8x128xf32>
    %447 = arith.mulf %446, %439 : vector<8x128xf32>
    %448 = arith.addf %423, %447 : vector<8x128xf32>
    %449 = vector.broadcast %81 : f32 to vector<8x128xf32>
    %450 = arith.mulf %449, %439 : vector<8x128xf32>
    %451 = arith.addf %426, %450 : vector<8x128xf32>
    %452 = vector.broadcast %105 : f32 to vector<8x128xf32>
    %453 = arith.mulf %452, %439 : vector<8x128xf32>
    %454 = arith.addf %429, %453 : vector<8x128xf32>
    %455 = vector.broadcast %129 : f32 to vector<8x128xf32>
    %456 = arith.mulf %455, %439 : vector<8x128xf32>
    %457 = arith.addf %432, %456 : vector<8x128xf32>
    %458 = vector.broadcast %153 : f32 to vector<8x128xf32>
    %459 = arith.mulf %458, %439 : vector<8x128xf32>
    %460 = arith.addf %435, %459 : vector<8x128xf32>
    %461 = vector.broadcast %177 : f32 to vector<8x128xf32>
    %462 = arith.mulf %461, %439 : vector<8x128xf32>
    %463 = arith.addf %438, %462 : vector<8x128xf32>
    %464 = vector.extract_strided_slice %205 {offsets = [0, 10], sizes = [8, 128], strides = [1, 1]} : vector<8x256xf32> to vector<8x128xf32>
    %465 = vector.broadcast %10 : f32 to vector<8x128xf32>
    %466 = arith.mulf %465, %464 : vector<8x128xf32>
    %467 = arith.addf %442, %466 : vector<8x128xf32>
    %468 = vector.broadcast %34 : f32 to vector<8x128xf32>
    %469 = arith.mulf %468, %464 : vector<8x128xf32>
    %470 = arith.addf %445, %469 : vector<8x128xf32>
    %471 = vector.broadcast %58 : f32 to vector<8x128xf32>
    %472 = arith.mulf %471, %464 : vector<8x128xf32>
    %473 = arith.addf %448, %472 : vector<8x128xf32>
    %474 = vector.broadcast %82 : f32 to vector<8x128xf32>
    %475 = arith.mulf %474, %464 : vector<8x128xf32>
    %476 = arith.addf %451, %475 : vector<8x128xf32>
    %477 = vector.broadcast %106 : f32 to vector<8x128xf32>
    %478 = arith.mulf %477, %464 : vector<8x128xf32>
    %479 = arith.addf %454, %478 : vector<8x128xf32>
    %480 = vector.broadcast %130 : f32 to vector<8x128xf32>
    %481 = arith.mulf %480, %464 : vector<8x128xf32>
    %482 = arith.addf %457, %481 : vector<8x128xf32>
    %483 = vector.broadcast %154 : f32 to vector<8x128xf32>
    %484 = arith.mulf %483, %464 : vector<8x128xf32>
    %485 = arith.addf %460, %484 : vector<8x128xf32>
    %486 = vector.broadcast %178 : f32 to vector<8x128xf32>
    %487 = arith.mulf %486, %464 : vector<8x128xf32>
    %488 = arith.addf %463, %487 : vector<8x128xf32>
    %489 = vector.extract_strided_slice %205 {offsets = [0, 11], sizes = [8, 128], strides = [1, 1]} : vector<8x256xf32> to vector<8x128xf32>
    %490 = vector.broadcast %11 : f32 to vector<8x128xf32>
    %491 = arith.mulf %490, %489 : vector<8x128xf32>
    %492 = arith.addf %467, %491 : vector<8x128xf32>
    %493 = vector.broadcast %35 : f32 to vector<8x128xf32>
    %494 = arith.mulf %493, %489 : vector<8x128xf32>
    %495 = arith.addf %470, %494 : vector<8x128xf32>
    %496 = vector.broadcast %59 : f32 to vector<8x128xf32>
    %497 = arith.mulf %496, %489 : vector<8x128xf32>
    %498 = arith.addf %473, %497 : vector<8x128xf32>
    %499 = vector.broadcast %83 : f32 to vector<8x128xf32>
    %500 = arith.mulf %499, %489 : vector<8x128xf32>
    %501 = arith.addf %476, %500 : vector<8x128xf32>
    %502 = vector.broadcast %107 : f32 to vector<8x128xf32>
    %503 = arith.mulf %502, %489 : vector<8x128xf32>
    %504 = arith.addf %479, %503 : vector<8x128xf32>
    %505 = vector.broadcast %131 : f32 to vector<8x128xf32>
    %506 = arith.mulf %505, %489 : vector<8x128xf32>
    %507 = arith.addf %482, %506 : vector<8x128xf32>
    %508 = vector.broadcast %155 : f32 to vector<8x128xf32>
    %509 = arith.mulf %508, %489 : vector<8x128xf32>
    %510 = arith.addf %485, %509 : vector<8x128xf32>
    %511 = vector.broadcast %179 : f32 to vector<8x128xf32>
    %512 = arith.mulf %511, %489 : vector<8x128xf32>
    %513 = arith.addf %488, %512 : vector<8x128xf32>
    %514 = vector.extract_strided_slice %205 {offsets = [0, 12], sizes = [8, 128], strides = [1, 1]} : vector<8x256xf32> to vector<8x128xf32>
    %515 = vector.broadcast %12 : f32 to vector<8x128xf32>
    %516 = arith.mulf %515, %514 : vector<8x128xf32>
    %517 = arith.addf %492, %516 : vector<8x128xf32>
    %518 = vector.broadcast %36 : f32 to vector<8x128xf32>
    %519 = arith.mulf %518, %514 : vector<8x128xf32>
    %520 = arith.addf %495, %519 : vector<8x128xf32>
    %521 = vector.broadcast %60 : f32 to vector<8x128xf32>
    %522 = arith.mulf %521, %514 : vector<8x128xf32>
    %523 = arith.addf %498, %522 : vector<8x128xf32>
    %524 = vector.broadcast %84 : f32 to vector<8x128xf32>
    %525 = arith.mulf %524, %514 : vector<8x128xf32>
    %526 = arith.addf %501, %525 : vector<8x128xf32>
    %527 = vector.broadcast %108 : f32 to vector<8x128xf32>
    %528 = arith.mulf %527, %514 : vector<8x128xf32>
    %529 = arith.addf %504, %528 : vector<8x128xf32>
    %530 = vector.broadcast %132 : f32 to vector<8x128xf32>
    %531 = arith.mulf %530, %514 : vector<8x128xf32>
    %532 = arith.addf %507, %531 : vector<8x128xf32>
    %533 = vector.broadcast %156 : f32 to vector<8x128xf32>
    %534 = arith.mulf %533, %514 : vector<8x128xf32>
    %535 = arith.addf %510, %534 : vector<8x128xf32>
    %536 = vector.broadcast %180 : f32 to vector<8x128xf32>
    %537 = arith.mulf %536, %514 : vector<8x128xf32>
    %538 = arith.addf %513, %537 : vector<8x128xf32>
    %539 = vector.extract_strided_slice %205 {offsets = [0, 13], sizes = [8, 128], strides = [1, 1]} : vector<8x256xf32> to vector<8x128xf32>
    %540 = vector.broadcast %13 : f32 to vector<8x128xf32>
    %541 = arith.mulf %540, %539 : vector<8x128xf32>
    %542 = arith.addf %517, %541 : vector<8x128xf32>
    %543 = vector.broadcast %37 : f32 to vector<8x128xf32>
    %544 = arith.mulf %543, %539 : vector<8x128xf32>
    %545 = arith.addf %520, %544 : vector<8x128xf32>
    %546 = vector.broadcast %61 : f32 to vector<8x128xf32>
    %547 = arith.mulf %546, %539 : vector<8x128xf32>
    %548 = arith.addf %523, %547 : vector<8x128xf32>
    %549 = vector.broadcast %85 : f32 to vector<8x128xf32>
    %550 = arith.mulf %549, %539 : vector<8x128xf32>
    %551 = arith.addf %526, %550 : vector<8x128xf32>
    %552 = vector.broadcast %109 : f32 to vector<8x128xf32>
    %553 = arith.mulf %552, %539 : vector<8x128xf32>
    %554 = arith.addf %529, %553 : vector<8x128xf32>
    %555 = vector.broadcast %133 : f32 to vector<8x128xf32>
    %556 = arith.mulf %555, %539 : vector<8x128xf32>
    %557 = arith.addf %532, %556 : vector<8x128xf32>
    %558 = vector.broadcast %157 : f32 to vector<8x128xf32>
    %559 = arith.mulf %558, %539 : vector<8x128xf32>
    %560 = arith.addf %535, %559 : vector<8x128xf32>
    %561 = vector.broadcast %181 : f32 to vector<8x128xf32>
    %562 = arith.mulf %561, %539 : vector<8x128xf32>
    %563 = arith.addf %538, %562 : vector<8x128xf32>
    %564 = vector.extract_strided_slice %205 {offsets = [0, 14], sizes = [8, 128], strides = [1, 1]} : vector<8x256xf32> to vector<8x128xf32>
    %565 = vector.broadcast %14 : f32 to vector<8x128xf32>
    %566 = arith.mulf %565, %564 : vector<8x128xf32>
    %567 = arith.addf %542, %566 : vector<8x128xf32>
    %568 = vector.broadcast %38 : f32 to vector<8x128xf32>
    %569 = arith.mulf %568, %564 : vector<8x128xf32>
    %570 = arith.addf %545, %569 : vector<8x128xf32>
    %571 = vector.broadcast %62 : f32 to vector<8x128xf32>
    %572 = arith.mulf %571, %564 : vector<8x128xf32>
    %573 = arith.addf %548, %572 : vector<8x128xf32>
    %574 = vector.broadcast %86 : f32 to vector<8x128xf32>
    %575 = arith.mulf %574, %564 : vector<8x128xf32>
    %576 = arith.addf %551, %575 : vector<8x128xf32>
    %577 = vector.broadcast %110 : f32 to vector<8x128xf32>
    %578 = arith.mulf %577, %564 : vector<8x128xf32>
    %579 = arith.addf %554, %578 : vector<8x128xf32>
    %580 = vector.broadcast %134 : f32 to vector<8x128xf32>
    %581 = arith.mulf %580, %564 : vector<8x128xf32>
    %582 = arith.addf %557, %581 : vector<8x128xf32>
    %583 = vector.broadcast %158 : f32 to vector<8x128xf32>
    %584 = arith.mulf %583, %564 : vector<8x128xf32>
    %585 = arith.addf %560, %584 : vector<8x128xf32>
    %586 = vector.broadcast %182 : f32 to vector<8x128xf32>
    %587 = arith.mulf %586, %564 : vector<8x128xf32>
    %588 = arith.addf %563, %587 : vector<8x128xf32>
    %589 = vector.extract_strided_slice %205 {offsets = [0, 15], sizes = [8, 128], strides = [1, 1]} : vector<8x256xf32> to vector<8x128xf32>
    %590 = vector.broadcast %15 : f32 to vector<8x128xf32>
    %591 = arith.mulf %590, %589 : vector<8x128xf32>
    %592 = arith.addf %567, %591 : vector<8x128xf32>
    %593 = vector.broadcast %39 : f32 to vector<8x128xf32>
    %594 = arith.mulf %593, %589 : vector<8x128xf32>
    %595 = arith.addf %570, %594 : vector<8x128xf32>
    %596 = vector.broadcast %63 : f32 to vector<8x128xf32>
    %597 = arith.mulf %596, %589 : vector<8x128xf32>
    %598 = arith.addf %573, %597 : vector<8x128xf32>
    %599 = vector.broadcast %87 : f32 to vector<8x128xf32>
    %600 = arith.mulf %599, %589 : vector<8x128xf32>
    %601 = arith.addf %576, %600 : vector<8x128xf32>
    %602 = vector.broadcast %111 : f32 to vector<8x128xf32>
    %603 = arith.mulf %602, %589 : vector<8x128xf32>
    %604 = arith.addf %579, %603 : vector<8x128xf32>
    %605 = vector.broadcast %135 : f32 to vector<8x128xf32>
    %606 = arith.mulf %605, %589 : vector<8x128xf32>
    %607 = arith.addf %582, %606 : vector<8x128xf32>
    %608 = vector.broadcast %159 : f32 to vector<8x128xf32>
    %609 = arith.mulf %608, %589 : vector<8x128xf32>
    %610 = arith.addf %585, %609 : vector<8x128xf32>
    %611 = vector.broadcast %183 : f32 to vector<8x128xf32>
    %612 = arith.mulf %611, %589 : vector<8x128xf32>
    %613 = arith.addf %588, %612 : vector<8x128xf32>
    %614 = vector.extract_strided_slice %205 {offsets = [0, 16], sizes = [8, 128], strides = [1, 1]} : vector<8x256xf32> to vector<8x128xf32>
    %615 = vector.broadcast %16 : f32 to vector<8x128xf32>
    %616 = arith.mulf %615, %614 : vector<8x128xf32>
    %617 = arith.addf %592, %616 : vector<8x128xf32>
    %618 = vector.broadcast %40 : f32 to vector<8x128xf32>
    %619 = arith.mulf %618, %614 : vector<8x128xf32>
    %620 = arith.addf %595, %619 : vector<8x128xf32>
    %621 = vector.broadcast %64 : f32 to vector<8x128xf32>
    %622 = arith.mulf %621, %614 : vector<8x128xf32>
    %623 = arith.addf %598, %622 : vector<8x128xf32>
    %624 = vector.broadcast %88 : f32 to vector<8x128xf32>
    %625 = arith.mulf %624, %614 : vector<8x128xf32>
    %626 = arith.addf %601, %625 : vector<8x128xf32>
    %627 = vector.broadcast %112 : f32 to vector<8x128xf32>
    %628 = arith.mulf %627, %614 : vector<8x128xf32>
    %629 = arith.addf %604, %628 : vector<8x128xf32>
    %630 = vector.broadcast %136 : f32 to vector<8x128xf32>
    %631 = arith.mulf %630, %614 : vector<8x128xf32>
    %632 = arith.addf %607, %631 : vector<8x128xf32>
    %633 = vector.broadcast %160 : f32 to vector<8x128xf32>
    %634 = arith.mulf %633, %614 : vector<8x128xf32>
    %635 = arith.addf %610, %634 : vector<8x128xf32>
    %636 = vector.broadcast %184 : f32 to vector<8x128xf32>
    %637 = arith.mulf %636, %614 : vector<8x128xf32>
    %638 = arith.addf %613, %637 : vector<8x128xf32>
    %639 = vector.extract_strided_slice %205 {offsets = [0, 17], sizes = [8, 128], strides = [1, 1]} : vector<8x256xf32> to vector<8x128xf32>
    %640 = vector.broadcast %17 : f32 to vector<8x128xf32>
    %641 = arith.mulf %640, %639 : vector<8x128xf32>
    %642 = arith.addf %617, %641 : vector<8x128xf32>
    %643 = vector.broadcast %41 : f32 to vector<8x128xf32>
    %644 = arith.mulf %643, %639 : vector<8x128xf32>
    %645 = arith.addf %620, %644 : vector<8x128xf32>
    %646 = vector.broadcast %65 : f32 to vector<8x128xf32>
    %647 = arith.mulf %646, %639 : vector<8x128xf32>
    %648 = arith.addf %623, %647 : vector<8x128xf32>
    %649 = vector.broadcast %89 : f32 to vector<8x128xf32>
    %650 = arith.mulf %649, %639 : vector<8x128xf32>
    %651 = arith.addf %626, %650 : vector<8x128xf32>
    %652 = vector.broadcast %113 : f32 to vector<8x128xf32>
    %653 = arith.mulf %652, %639 : vector<8x128xf32>
    %654 = arith.addf %629, %653 : vector<8x128xf32>
    %655 = vector.broadcast %137 : f32 to vector<8x128xf32>
    %656 = arith.mulf %655, %639 : vector<8x128xf32>
    %657 = arith.addf %632, %656 : vector<8x128xf32>
    %658 = vector.broadcast %161 : f32 to vector<8x128xf32>
    %659 = arith.mulf %658, %639 : vector<8x128xf32>
    %660 = arith.addf %635, %659 : vector<8x128xf32>
    %661 = vector.broadcast %185 : f32 to vector<8x128xf32>
    %662 = arith.mulf %661, %639 : vector<8x128xf32>
    %663 = arith.addf %638, %662 : vector<8x128xf32>
    %664 = vector.extract_strided_slice %205 {offsets = [0, 18], sizes = [8, 128], strides = [1, 1]} : vector<8x256xf32> to vector<8x128xf32>
    %665 = vector.broadcast %18 : f32 to vector<8x128xf32>
    %666 = arith.mulf %665, %664 : vector<8x128xf32>
    %667 = arith.addf %642, %666 : vector<8x128xf32>
    %668 = vector.broadcast %42 : f32 to vector<8x128xf32>
    %669 = arith.mulf %668, %664 : vector<8x128xf32>
    %670 = arith.addf %645, %669 : vector<8x128xf32>
    %671 = vector.broadcast %66 : f32 to vector<8x128xf32>
    %672 = arith.mulf %671, %664 : vector<8x128xf32>
    %673 = arith.addf %648, %672 : vector<8x128xf32>
    %674 = vector.broadcast %90 : f32 to vector<8x128xf32>
    %675 = arith.mulf %674, %664 : vector<8x128xf32>
    %676 = arith.addf %651, %675 : vector<8x128xf32>
    %677 = vector.broadcast %114 : f32 to vector<8x128xf32>
    %678 = arith.mulf %677, %664 : vector<8x128xf32>
    %679 = arith.addf %654, %678 : vector<8x128xf32>
    %680 = vector.broadcast %138 : f32 to vector<8x128xf32>
    %681 = arith.mulf %680, %664 : vector<8x128xf32>
    %682 = arith.addf %657, %681 : vector<8x128xf32>
    %683 = vector.broadcast %162 : f32 to vector<8x128xf32>
    %684 = arith.mulf %683, %664 : vector<8x128xf32>
    %685 = arith.addf %660, %684 : vector<8x128xf32>
    %686 = vector.broadcast %186 : f32 to vector<8x128xf32>
    %687 = arith.mulf %686, %664 : vector<8x128xf32>
    %688 = arith.addf %663, %687 : vector<8x128xf32>
    %689 = vector.extract_strided_slice %205 {offsets = [0, 19], sizes = [8, 128], strides = [1, 1]} : vector<8x256xf32> to vector<8x128xf32>
    %690 = vector.broadcast %19 : f32 to vector<8x128xf32>
    %691 = arith.mulf %690, %689 : vector<8x128xf32>
    %692 = arith.addf %667, %691 : vector<8x128xf32>
    %693 = vector.broadcast %43 : f32 to vector<8x128xf32>
    %694 = arith.mulf %693, %689 : vector<8x128xf32>
    %695 = arith.addf %670, %694 : vector<8x128xf32>
    %696 = vector.broadcast %67 : f32 to vector<8x128xf32>
    %697 = arith.mulf %696, %689 : vector<8x128xf32>
    %698 = arith.addf %673, %697 : vector<8x128xf32>
    %699 = vector.broadcast %91 : f32 to vector<8x128xf32>
    %700 = arith.mulf %699, %689 : vector<8x128xf32>
    %701 = arith.addf %676, %700 : vector<8x128xf32>
    %702 = vector.broadcast %115 : f32 to vector<8x128xf32>
    %703 = arith.mulf %702, %689 : vector<8x128xf32>
    %704 = arith.addf %679, %703 : vector<8x128xf32>
    %705 = vector.broadcast %139 : f32 to vector<8x128xf32>
    %706 = arith.mulf %705, %689 : vector<8x128xf32>
    %707 = arith.addf %682, %706 : vector<8x128xf32>
    %708 = vector.broadcast %163 : f32 to vector<8x128xf32>
    %709 = arith.mulf %708, %689 : vector<8x128xf32>
    %710 = arith.addf %685, %709 : vector<8x128xf32>
    %711 = vector.broadcast %187 : f32 to vector<8x128xf32>
    %712 = arith.mulf %711, %689 : vector<8x128xf32>
    %713 = arith.addf %688, %712 : vector<8x128xf32>
    %714 = vector.extract_strided_slice %205 {offsets = [0, 20], sizes = [8, 128], strides = [1, 1]} : vector<8x256xf32> to vector<8x128xf32>
    %715 = vector.broadcast %20 : f32 to vector<8x128xf32>
    %716 = arith.mulf %715, %714 : vector<8x128xf32>
    %717 = arith.addf %692, %716 : vector<8x128xf32>
    %718 = vector.broadcast %44 : f32 to vector<8x128xf32>
    %719 = arith.mulf %718, %714 : vector<8x128xf32>
    %720 = arith.addf %695, %719 : vector<8x128xf32>
    %721 = vector.broadcast %68 : f32 to vector<8x128xf32>
    %722 = arith.mulf %721, %714 : vector<8x128xf32>
    %723 = arith.addf %698, %722 : vector<8x128xf32>
    %724 = vector.broadcast %92 : f32 to vector<8x128xf32>
    %725 = arith.mulf %724, %714 : vector<8x128xf32>
    %726 = arith.addf %701, %725 : vector<8x128xf32>
    %727 = vector.broadcast %116 : f32 to vector<8x128xf32>
    %728 = arith.mulf %727, %714 : vector<8x128xf32>
    %729 = arith.addf %704, %728 : vector<8x128xf32>
    %730 = vector.broadcast %140 : f32 to vector<8x128xf32>
    %731 = arith.mulf %730, %714 : vector<8x128xf32>
    %732 = arith.addf %707, %731 : vector<8x128xf32>
    %733 = vector.broadcast %164 : f32 to vector<8x128xf32>
    %734 = arith.mulf %733, %714 : vector<8x128xf32>
    %735 = arith.addf %710, %734 : vector<8x128xf32>
    %736 = vector.broadcast %188 : f32 to vector<8x128xf32>
    %737 = arith.mulf %736, %714 : vector<8x128xf32>
    %738 = arith.addf %713, %737 : vector<8x128xf32>
    %739 = vector.extract_strided_slice %205 {offsets = [0, 21], sizes = [8, 128], strides = [1, 1]} : vector<8x256xf32> to vector<8x128xf32>
    %740 = vector.broadcast %21 : f32 to vector<8x128xf32>
    %741 = arith.mulf %740, %739 : vector<8x128xf32>
    %742 = arith.addf %717, %741 : vector<8x128xf32>
    %743 = vector.broadcast %45 : f32 to vector<8x128xf32>
    %744 = arith.mulf %743, %739 : vector<8x128xf32>
    %745 = arith.addf %720, %744 : vector<8x128xf32>
    %746 = vector.broadcast %69 : f32 to vector<8x128xf32>
    %747 = arith.mulf %746, %739 : vector<8x128xf32>
    %748 = arith.addf %723, %747 : vector<8x128xf32>
    %749 = vector.broadcast %93 : f32 to vector<8x128xf32>
    %750 = arith.mulf %749, %739 : vector<8x128xf32>
    %751 = arith.addf %726, %750 : vector<8x128xf32>
    %752 = vector.broadcast %117 : f32 to vector<8x128xf32>
    %753 = arith.mulf %752, %739 : vector<8x128xf32>
    %754 = arith.addf %729, %753 : vector<8x128xf32>
    %755 = vector.broadcast %141 : f32 to vector<8x128xf32>
    %756 = arith.mulf %755, %739 : vector<8x128xf32>
    %757 = arith.addf %732, %756 : vector<8x128xf32>
    %758 = vector.broadcast %165 : f32 to vector<8x128xf32>
    %759 = arith.mulf %758, %739 : vector<8x128xf32>
    %760 = arith.addf %735, %759 : vector<8x128xf32>
    %761 = vector.broadcast %189 : f32 to vector<8x128xf32>
    %762 = arith.mulf %761, %739 : vector<8x128xf32>
    %763 = arith.addf %738, %762 : vector<8x128xf32>
    %764 = vector.extract_strided_slice %205 {offsets = [0, 22], sizes = [8, 128], strides = [1, 1]} : vector<8x256xf32> to vector<8x128xf32>
    %765 = vector.broadcast %22 : f32 to vector<8x128xf32>
    %766 = arith.mulf %765, %764 : vector<8x128xf32>
    %767 = arith.addf %742, %766 : vector<8x128xf32>
    %768 = vector.broadcast %46 : f32 to vector<8x128xf32>
    %769 = arith.mulf %768, %764 : vector<8x128xf32>
    %770 = arith.addf %745, %769 : vector<8x128xf32>
    %771 = vector.broadcast %70 : f32 to vector<8x128xf32>
    %772 = arith.mulf %771, %764 : vector<8x128xf32>
    %773 = arith.addf %748, %772 : vector<8x128xf32>
    %774 = vector.broadcast %94 : f32 to vector<8x128xf32>
    %775 = arith.mulf %774, %764 : vector<8x128xf32>
    %776 = arith.addf %751, %775 : vector<8x128xf32>
    %777 = vector.broadcast %118 : f32 to vector<8x128xf32>
    %778 = arith.mulf %777, %764 : vector<8x128xf32>
    %779 = arith.addf %754, %778 : vector<8x128xf32>
    %780 = vector.broadcast %142 : f32 to vector<8x128xf32>
    %781 = arith.mulf %780, %764 : vector<8x128xf32>
    %782 = arith.addf %757, %781 : vector<8x128xf32>
    %783 = vector.broadcast %166 : f32 to vector<8x128xf32>
    %784 = arith.mulf %783, %764 : vector<8x128xf32>
    %785 = arith.addf %760, %784 : vector<8x128xf32>
    %786 = vector.broadcast %190 : f32 to vector<8x128xf32>
    %787 = arith.mulf %786, %764 : vector<8x128xf32>
    %788 = arith.addf %763, %787 : vector<8x128xf32>
    %789 = vector.extract_strided_slice %205 {offsets = [0, 23], sizes = [8, 128], strides = [1, 1]} : vector<8x256xf32> to vector<8x128xf32>
    %790 = vector.broadcast %23 : f32 to vector<8x128xf32>
    %791 = arith.mulf %790, %789 : vector<8x128xf32>
    %792 = arith.addf %767, %791 : vector<8x128xf32>
    %793 = vector.broadcast %47 : f32 to vector<8x128xf32>
    %794 = arith.mulf %793, %789 : vector<8x128xf32>
    %795 = arith.addf %770, %794 : vector<8x128xf32>
    %796 = vector.broadcast %71 : f32 to vector<8x128xf32>
    %797 = arith.mulf %796, %789 : vector<8x128xf32>
    %798 = arith.addf %773, %797 : vector<8x128xf32>
    %799 = vector.broadcast %95 : f32 to vector<8x128xf32>
    %800 = arith.mulf %799, %789 : vector<8x128xf32>
    %801 = arith.addf %776, %800 : vector<8x128xf32>
    %802 = vector.broadcast %119 : f32 to vector<8x128xf32>
    %803 = arith.mulf %802, %789 : vector<8x128xf32>
    %804 = arith.addf %779, %803 : vector<8x128xf32>
    %805 = vector.broadcast %143 : f32 to vector<8x128xf32>
    %806 = arith.mulf %805, %789 : vector<8x128xf32>
    %807 = arith.addf %782, %806 : vector<8x128xf32>
    %808 = vector.broadcast %167 : f32 to vector<8x128xf32>
    %809 = arith.mulf %808, %789 : vector<8x128xf32>
    %810 = arith.addf %785, %809 : vector<8x128xf32>
    %811 = vector.broadcast %191 : f32 to vector<8x128xf32>
    %812 = arith.mulf %811, %789 : vector<8x128xf32>
    %813 = arith.addf %788, %812 : vector<8x128xf32>
    %cst = arith.constant 0.000000e+00 : f32
    %814 = vector.broadcast %cst : f32 to vector<8x128xf32>
    %815 = arith.maximumf %792, %814 : vector<8x128xf32>
    %c0_369 = arith.constant 0 : index
    %c0_370 = arith.constant 0 : index
    %c0_371 = arith.constant 0 : index
    %816 = vector.load %arg5[%c0_369, %c0_370, %c0_371] : memref<8x8x128xf32, #tpu.memory_space<vmem>>, vector<1x8x128xf32>
    %817 = vector.shape_cast %816 : vector<1x8x128xf32> to vector<8x128xf32>
    %818 = vector.shape_cast %815 : vector<8x128xf32> to vector<1x8x128xf32>
    tpu.vector_store %arg5[%c0_369, %c0_370, %c0_371], %818 {strides = array<i32>} : memref<8x8x128xf32, #tpu.memory_space<vmem>>, vector<1x8x128xf32>,
    %cst_372 = arith.constant 0.000000e+00 : f32
    %819 = vector.broadcast %cst_372 : f32 to vector<8x128xf32>
    %820 = arith.maximumf %795, %819 : vector<8x128xf32>
    %c1_373 = arith.constant 1 : index
    %c0_374 = arith.constant 0 : index
    %c0_375 = arith.constant 0 : index
    %821 = vector.load %arg5[%c1_373, %c0_374, %c0_375] : memref<8x8x128xf32, #tpu.memory_space<vmem>>, vector<1x8x128xf32>
    %822 = vector.shape_cast %821 : vector<1x8x128xf32> to vector<8x128xf32>
    %823 = vector.shape_cast %820 : vector<8x128xf32> to vector<1x8x128xf32>
    tpu.vector_store %arg5[%c1_373, %c0_374, %c0_375], %823 {strides = array<i32>} : memref<8x8x128xf32, #tpu.memory_space<vmem>>, vector<1x8x128xf32>,
    %cst_376 = arith.constant 0.000000e+00 : f32
    %824 = vector.broadcast %cst_376 : f32 to vector<8x128xf32>
    %825 = arith.maximumf %798, %824 : vector<8x128xf32>
    %c2_377 = arith.constant 2 : index
    %c0_378 = arith.constant 0 : index
    %c0_379 = arith.constant 0 : index
    %826 = vector.load %arg5[%c2_377, %c0_378, %c0_379] : memref<8x8x128xf32, #tpu.memory_space<vmem>>, vector<1x8x128xf32>
    %827 = vector.shape_cast %826 : vector<1x8x128xf32> to vector<8x128xf32>
    %828 = vector.shape_cast %825 : vector<8x128xf32> to vector<1x8x128xf32>
    tpu.vector_store %arg5[%c2_377, %c0_378, %c0_379], %828 {strides = array<i32>} : memref<8x8x128xf32, #tpu.memory_space<vmem>>, vector<1x8x128xf32>,
    %cst_380 = arith.constant 0.000000e+00 : f32
    %829 = vector.broadcast %cst_380 : f32 to vector<8x128xf32>
    %830 = arith.maximumf %801, %829 : vector<8x128xf32>
    %c3_381 = arith.constant 3 : index
    %c0_382 = arith.constant 0 : index
    %c0_383 = arith.constant 0 : index
    %831 = vector.load %arg5[%c3_381, %c0_382, %c0_383] : memref<8x8x128xf32, #tpu.memory_space<vmem>>, vector<1x8x128xf32>
    %832 = vector.shape_cast %831 : vector<1x8x128xf32> to vector<8x128xf32>
    %833 = vector.shape_cast %830 : vector<8x128xf32> to vector<1x8x128xf32>
    tpu.vector_store %arg5[%c3_381, %c0_382, %c0_383], %833 {strides = array<i32>} : memref<8x8x128xf32, #tpu.memory_space<vmem>>, vector<1x8x128xf32>,
    %cst_384 = arith.constant 0.000000e+00 : f32
    %834 = vector.broadcast %cst_384 : f32 to vector<8x128xf32>
    %835 = arith.maximumf %804, %834 : vector<8x128xf32>
    %c4_385 = arith.constant 4 : index
    %c0_386 = arith.constant 0 : index
    %c0_387 = arith.constant 0 : index
    %836 = vector.load %arg5[%c4_385, %c0_386, %c0_387] : memref<8x8x128xf32, #tpu.memory_space<vmem>>, vector<1x8x128xf32>
    %837 = vector.shape_cast %836 : vector<1x8x128xf32> to vector<8x128xf32>
    %838 = vector.shape_cast %835 : vector<8x128xf32> to vector<1x8x128xf32>
    tpu.vector_store %arg5[%c4_385, %c0_386, %c0_387], %838 {strides = array<i32>} : memref<8x8x128xf32, #tpu.memory_space<vmem>>, vector<1x8x128xf32>,
    %cst_388 = arith.constant 0.000000e+00 : f32
    %839 = vector.broadcast %cst_388 : f32 to vector<8x128xf32>
    %840 = arith.maximumf %807, %839 : vector<8x128xf32>
    %c5_389 = arith.constant 5 : index
    %c0_390 = arith.constant 0 : index
    %c0_391 = arith.constant 0 : index
    %841 = vector.load %arg5[%c5_389, %c0_390, %c0_391] : memref<8x8x128xf32, #tpu.memory_space<vmem>>, vector<1x8x128xf32>
    %842 = vector.shape_cast %841 : vector<1x8x128xf32> to vector<8x128xf32>
    %843 = vector.shape_cast %840 : vector<8x128xf32> to vector<1x8x128xf32>
    tpu.vector_store %arg5[%c5_389, %c0_390, %c0_391], %843 {strides = array<i32>} : memref<8x8x128xf32, #tpu.memory_space<vmem>>, vector<1x8x128xf32>,
    %cst_392 = arith.constant 0.000000e+00 : f32
    %844 = vector.broadcast %cst_392 : f32 to vector<8x128xf32>
    %845 = arith.maximumf %810, %844 : vector<8x128xf32>
    %c6_393 = arith.constant 6 : index
    %c0_394 = arith.constant 0 : index
    %c0_395 = arith.constant 0 : index
    %846 = vector.load %arg5[%c6_393, %c0_394, %c0_395] : memref<8x8x128xf32, #tpu.memory_space<vmem>>, vector<1x8x128xf32>
    %847 = vector.shape_cast %846 : vector<1x8x128xf32> to vector<8x128xf32>
    %848 = vector.shape_cast %845 : vector<8x128xf32> to vector<1x8x128xf32>
    tpu.vector_store %arg5[%c6_393, %c0_394, %c0_395], %848 {strides = array<i32>} : memref<8x8x128xf32, #tpu.memory_space<vmem>>, vector<1x8x128xf32>,
    %cst_396 = arith.constant 0.000000e+00 : f32
    %849 = vector.broadcast %cst_396 : f32 to vector<8x128xf32>
    %850 = arith.maximumf %813, %849 : vector<8x128xf32>
    %c7_397 = arith.constant 7 : index
    %c0_398 = arith.constant 0 : index
    %c0_399 = arith.constant 0 : index
    %851 = vector.load %arg5[%c7_397, %c0_398, %c0_399] : memref<8x8x128xf32, #tpu.memory_space<vmem>>, vector<1x8x128xf32>
    %852 = vector.shape_cast %851 : vector<1x8x128xf32> to vector<8x128xf32>
    %853 = vector.shape_cast %850 : vector<8x128xf32> to vector<1x8x128xf32>
    tpu.vector_store %arg5[%c7_397, %c0_398, %c0_399], %853 {strides = array<i32>} : memref<8x8x128xf32, #tpu.memory_space<vmem>>, vector<1x8x128xf32>,
    return
  }
  func.func @transform_0(%arg0: i32, %arg1: i32) -> (i32, i32) {
    %c0_i32 = arith.constant 0 : i32
    %c0_i32_0 = arith.constant 0 : i32
    return %arg0, %c0_i32 : i32, i32
  }
  func.func @transform_1(%arg0: i32, %arg1: i32) -> (i32, i32) {
    %c0_i32 = arith.constant 0 : i32
    %c0_i32_0 = arith.constant 0 : i32
    %c0_i32_1 = arith.constant 0 : i32
    return %c0_i32, %c0_i32_0 : i32, i32
  }
  func.func @transform_2(%arg0: i32, %arg1: i32) -> i32 {
    %c0_i32 = arith.constant 0 : i32
    %c0_i32_0 = arith.constant 0 : i32
    return %c0_i32 : i32
  }
  func.func @transform_3(%arg0: i32, %arg1: i32) -> (i32, i32, i32) {
    %c0_i32 = arith.constant 0 : i32
    %c0_i32_0 = arith.constant 0 : i32
    return %c0_i32, %arg0, %arg1 : i32, i32, i32
  }
}

</mosaic_0001>

<bundles_post_ra>
// kernel: cnn_forward.1
= control target key start
LH: loop header
LB: loop body
LE: loop exit
PB: predicated region body
PF: predicated region fallthrough
CT: control target
= control target key end

     0   :  { %8 = vsyncpa [#allocation3], 0  ;;  %s4906_s0 = inlined_call_operand.vmem [shape: f32[8,256], index: 0, kind: input, shape index: {}]   ;;  %s4907_s1 = inlined_call_operand.vmem [shape: f32[8,24], index: 1, kind: input, shape index: {}]   ;;  %s4908_s2 = inlined_call_operand.vmem [shape: f32[8], index: 2, kind: input, shape index: {}]   ;;  %s4909_s3 = inlined_call_operand.vmem [shape: f32[8,8,128], index: 3, kind: output, shape index: {}]  }
   0x1   :  { %s18_s14 = sshll.u32 %s4907_s1, 4  ;;  %s19_s14 = int_to_ptr.vmem [resolvable:$true] %s18_s14 }
   0x2   :  { %9 = vsyncpa [#allocation5], 0  ;;  %s28_s17 = sshll.u32 %s4908_s2, 4  ;;  %s2776_s18 = scalar_lea.vmem %s19_s14, 128  ;;  %s29_s17 = int_to_ptr.vmem [resolvable:$true] %s28_s17 }
   0x3   :  { %p2777_p0 = scmp.ne.s32.totalorder %s19_s14, %s2776_s18  ;;  %p2781_p1 = scmp.lt.s32.totalorder %s19_s14, %s19_s14 }
   0x4   :  { %p2782_p2 = scmp.lt.s32.totalorder %s2776_s18, %s2776_s18 }
   0x6   :  { %p2783_p3 = por %p2782_p2, %p2781_p1 }
   0x8   :  { %p2784_p4 = pnand %p2783_p3, %p2777_p0 }
   0xa   :  { %2787 = shalt.err (!%p2784_p4)
}
   0xb   :  { %s2804_s19 = smov [#allocation2]   ;;  %s2788_s20 = scalar_lea.vmem %s29_s17, 16 }
   0xc   :  { %21 = dma.vmem_to_smem %s19_s14, 128, %s2804_s19, [#allocation3]  }
   0xd   :  { %p2789_p5 = scmp.ne.s32.totalorder %s29_s17, %s2788_s20  ;;  %p2793_p6 = scmp.lt.s32.totalorder %s29_s17, %s29_s17 }
   0xe   :  { %p2794_p7 = scmp.lt.s32.totalorder %s2788_s20, %s2788_s20 }
  0x10   :  { %p2795_p8 = por %p2794_p7, %p2793_p6 }
  0x12   :  { %p2796_p9 = pnand %p2795_p8, %p2789_p5 }
  0x14   :  { %2799 = shalt.err (!%p2796_p9)
}
  0x15   :  { %s2805_s1 = smov [#allocation4]  }
  0x16   :  { %31 = dma.vmem_to_smem %s29_s17, 16, %s2805_s1, [#allocation5]  }
  0x17   :  { %2800 = dma.done.wait [#allocation3], 128  }
  0x18   :  { %2801 = vsyncadd [#allocation3], 4294967168 }
  0x19   :  { %2802 = dma.done.wait [#allocation5], 16  }
  0x1a   :  { %2803 = vsyncadd [#allocation5], 4294967280 }
  0x1b   :  { %38 = sfence }
  0x1c   :  { %s2564_s2 = sld [smem:[#allocation2 + $0x81]]  ;;  %v2858_v0 = vld [vmem:[%s4906_s0] sm:$0xff]  ;;  %v2863_v1 = vld [vmem:[%s4906_s0 + $0x8] sm:$0xff]  ;;  %s2806_s28 = smov 127   ;;  %vm287_vm0 = vcmask 1039360   ;;  %vm384_vm1 = vcmask 1031168  }
  0x1d   :  { %s2540_s21 = sld [smem:[#allocation2 + $0x1]]  ;;  %s2807_s10 = smov 126   ;;  %vm481_vm2 = vcmask 1022976   ;;  %vm578_vm3 = vcmask 1014784   ;;  %vm675_vm4 = vcmask 1006592   ;;  %vm772_vm5 = vcmask 998400  }
  0x1e   :  { %s2588_s22 = sld [smem:[#allocation2 + $0x101]]  ;;  %s2808_s19 = smov 125   ;;  %vm869_vm6 = vcmask 990208   ;;  %vm966_vm7 = vcmask 982016   ;;  %vm1063_vm8 = vcmask 973824   ;;  %vm1160_vm9 = vcmask 965632  }
  0x1f   :  { %s2612_s27 = sld [smem:[#allocation2 + $0x181]]  ;;  %s2809_s26 = smov 124   ;;  %vm1839_vm10 = vcmask 908288   ;;  %vm1257_vm11 = vcmask 957440   ;;  %vm1936_vm12 = vcmask 900096   ;;  %vm1354_vm13 = vcmask 949248  }
  0x20   :  { %s2636_s29 = sld [smem:[#allocation2 + $0x201]]  ;;  %vm1451_vm14 = vcmask 941056   ;;  %vm1548_vm15 = vcmask 932864  }
  0x21   :  { %s2660_s30 = sld [smem:[#allocation2 + $0x281]] }
  0x22   :  { %v291_v2 = vstv %s2564_s2  ;;  %s2684_s4 = sld [smem:[#allocation2 + $0x301]] }
  0x23   :  { %v292_v3 = vmul.f32 %v291_v2, %v2858_v0  ;;  %v278_v4 = vstv %s2540_s21  ;;  %v293_v6 = vmul.f32 %v291_v2, %v2863_v1  ;;  %s2708_s5 = sld [smem:[#allocation2 + $0x381]] }
  0x24   :  { %v279_v5 = vmul.f32 %v278_v4, %v2858_v0  ;;  %v280_v7 = vmul.f32 %v278_v4, %v2863_v1  ;;  %v303_v8 = vstv %s2588_s22  ;;  %s2541_s6 = sld [smem:[#allocation2 + $0x2]] }
  0x25   :  { %296 = vrot.lane.b32.xlu1 %v292_v3, %s2806_s28  ;;  %v305_v9 = vmul.f32 %v303_v8, %v2863_v1  ;;  %v304_v10 = vmul.f32 %v303_v8, %v2858_v0  ;;  %v315_v11 = vstv %s2612_s27  ;;  %s2565_s7 = sld [smem:[#allocation2 + $0x82]] }
  0x26   :  { %283 = vrot.lane.b32.xlu0 %v279_v5, %s2806_s28  ;;  %v317_v12 = vmul.f32 %v315_v11, %v2863_v1  ;;  %v316_v13 = vmul.f32 %v315_v11, %v2858_v0  ;;  %v327_v14 = vstv %s2636_s29  ;;  %s2589_s8 = sld [smem:[#allocation2 + $0x102]] }
  0x27   :  { %v329_v15 = vmul.f32 %v327_v14, %v2863_v1  ;;  %v328_v16 = vmul.f32 %v327_v14, %v2858_v0  ;;  %v339_v17 = vstv %s2660_s30  ;;  %s2613_s9 = sld [smem:[#allocation2 + $0x182]] }
  0x28   :  { %v341_v18 = vmul.f32 %v339_v17, %v2863_v1  ;;  %v340_v19 = vmul.f32 %v339_v17, %v2858_v0  ;;  %v351_v20 = vstv %s2684_s4  ;;  %s2637_s11 = sld [smem:[#allocation2 + $0x202]] }
  0x29   :  { %298 = vrot.lane.b32.xlu1 %v293_v6, %s2806_s28  ;;  %v353_v21 = vmul.f32 %v351_v20, %v2863_v1  ;;  %v352_v22 = vmul.f32 %v351_v20, %v2858_v0  ;;  %v363_v23 = vstv %s2708_s5  ;;  %s2661_s12 = sld [smem:[#allocation2 + $0x282]] }
  0x2a   :  { %285 = vrot.lane.b32.xlu0 %v280_v7, %s2806_s28  ;;  %v365_v24 = vmul.f32 %v363_v23, %v2863_v1  ;;  %v364_v25 = vmul.f32 %v363_v23, %v2858_v0  ;;  %v375_v26 = vstv %s2541_s6  ;;  %s2685_s13 = sld [smem:[#allocation2 + $0x302]] }
  0x2b   :  { %v377_v27 = vmul.f32 %v375_v26, %v2863_v1  ;;  %v376_v28 = vmul.f32 %v375_v26, %v2858_v0  ;;  %v388_v29 = vstv %s2565_s7  ;;  %s2709_s14 = sld [smem:[#allocation2 + $0x382]] }
  0x2c   :  { %v390_v30 = vmul.f32 %v388_v29, %v2863_v1  ;;  %v389_v31 = vmul.f32 %v388_v29, %v2858_v0  ;;  %v400_v32 = vstv %s2589_s8  ;;  %s2542_s15 = sld [smem:[#allocation2 + $0x3]]  ;;  %s2810_s8 = smov 123  }
  0x2d   :  { %310 = vrot.lane.b32.xlu1 %v305_v9, %s2806_s28  ;;  %v402_v33 = vmul.f32 %v400_v32, %v2863_v1  ;;  %v401_v34 = vmul.f32 %v400_v32, %v2858_v0  ;;  %v412_v35 = vstv %s2613_s9  ;;  %s2566_s16 = sld [smem:[#allocation2 + $0x83]] }
  0x2e   :  { %308 = vrot.lane.b32.xlu0 %v304_v10, %s2806_s28  ;;  %v414_v36 = vmul.f32 %v412_v35, %v2863_v1  ;;  %v413_v37 = vmul.f32 %v412_v35, %v2858_v0  ;;  %v424_v38 = vstv %s2637_s11  ;;  %s2590_s17 = sld [smem:[#allocation2 + $0x103]] }
  0x2f   :  { %v426_v39 = vmul.f32 %v424_v38, %v2863_v1  ;;  %v425_v40 = vmul.f32 %v424_v38, %v2858_v0  ;;  %v436_v41 = vstv %s2661_s12  ;;  %s2614_s18 = sld [smem:[#allocation2 + $0x183]] }
  0x30   :  { %v438_v42 = vmul.f32 %v436_v41, %v2863_v1  ;;  %v437_v43 = vmul.f32 %v436_v41, %v2858_v0  ;;  %v448_v44 = vstv %s2685_s13  ;;  %s2638_s20 = sld [smem:[#allocation2 + $0x203]] }
  0x31   :  { %322 = vrot.lane.b32.xlu1 %v317_v12, %s2806_s28  ;;  %v450_v45 = vmul.f32 %v448_v44, %v2863_v1  ;;  %v449_v46 = vmul.f32 %v448_v44, %v2858_v0  ;;  %v460_v47 = vstv %s2709_s14  ;;  %s2662_s1 = sld [smem:[#allocation2 + $0x283]] }
  0x32   :  { %320 = vrot.lane.b32.xlu0 %v316_v13, %s2806_s28  ;;  %v462_v48 = vmul.f32 %v460_v47, %v2863_v1  ;;  %v461_v49 = vmul.f32 %v460_v47, %v2858_v0  ;;  %v472_v50 = vstv %s2542_s15  ;;  %s2686_s2 = sld [smem:[#allocation2 + $0x303]] }
  0x33   :  { %v474_v51 = vmul.f32 %v472_v50, %v2863_v1  ;;  %v473_v52 = vmul.f32 %v472_v50, %v2858_v0  ;;  %v485_v53 = vstv %s2566_s16  ;;  %s2710_s21 = sld [smem:[#allocation2 + $0x383]] }
  0x34   :  { %v487_v54 = vmul.f32 %v485_v53, %v2863_v1  ;;  %v486_v55 = vmul.f32 %v485_v53, %v2858_v0  ;;  %v497_v56 = vstv %s2590_s17  ;;  %s2543_s22 = sld [smem:[#allocation2 + $0x4]]  ;;  %s2811_s17 = smov 122  }
  0x35   :  { %334 = vrot.lane.b32.xlu1 %v329_v15, %s2806_s28  ;;  %v499_v57 = vmul.f32 %v497_v56, %v2863_v1  ;;  %v498_v58 = vmul.f32 %v497_v56, %v2858_v0  ;;  %v509_v59 = vstv %s2614_s18  ;;  %s2567_s23 = sld [smem:[#allocation2 + $0x84]] }
  0x36   :  { %332 = vrot.lane.b32.xlu0 %v328_v16, %s2806_s28  ;;  %v511_v60 = vmul.f32 %v509_v59, %v2863_v1  ;;  %v510_v61 = vmul.f32 %v509_v59, %v2858_v0  ;;  %v521_v62 = vstv %s2638_s20  ;;  %s2591_s24 = sld [smem:[#allocation2 + $0x104]] }
  0x37   :  { %v523_v63 = vmul.f32 %v521_v62, %v2863_v1  ;;  %v522_v2 = vmul.f32 %v521_v62, %v2858_v0  ;;  %v533_v3 = vstv %s2662_s1  ;;  %s2615_s25 = sld [smem:[#allocation2 + $0x184]] }
  0x38   :  { %v535_v4 = vmul.f32 %v533_v3, %v2863_v1  ;;  %v534_v5 = vmul.f32 %v533_v3, %v2858_v0  ;;  %v545_v6 = vstv %s2686_s2  ;;  %s2639_s27 = sld [smem:[#allocation2 + $0x204]] }
  0x39   :  { %346 = vrot.lane.b32.xlu1 %v341_v18, %s2806_s28  ;;  %v547_v7 = vmul.f32 %v545_v6, %v2863_v1  ;;  %v546_v8 = vmul.f32 %v545_v6, %v2858_v0  ;;  %v557_v9 = vstv %s2710_s21  ;;  %s2687_s29 = sld [smem:[#allocation2 + $0x304]] }
  0x3a   :  { %344 = vrot.lane.b32.xlu0 %v340_v19, %s2806_s28  ;;  %v559_v10 = vmul.f32 %v557_v9, %v2863_v1  ;;  %v558_v11 = vmul.f32 %v557_v9, %v2858_v0  ;;  %v569_v12 = vstv %s2543_s22  ;;  %s2711_s30 = sld [smem:[#allocation2 + $0x384]] }
  0x3b   :  { %v571_v13 = vmul.f32 %v569_v12, %v2863_v1  ;;  %v570_v14 = vmul.f32 %v569_v12, %v2858_v0  ;;  %v582_v15 = vstv %s2567_s23  ;;  %s2544_s4 = sld [smem:[#allocation2 + $0x5]] }
  0x3c   :  { %v584_v16 = vmul.f32 %v582_v15, %v2863_v1  ;;  %v583_v17 = vmul.f32 %v582_v15, %v2858_v0  ;;  %v594_v18 = vstv %s2591_s24  ;;  %s2568_s5 = sld [smem:[#allocation2 + $0x85]]  ;;  %s2812_s24 = smov 121  }
  0x3d   :  { %358 = vrot.lane.b32.xlu1 %v353_v21, %s2806_s28  ;;  %v596_v19 = vmul.f32 %v594_v18, %v2863_v1  ;;  %v595_v20 = vmul.f32 %v594_v18, %v2858_v0  ;;  %v606_v21 = vstv %s2615_s25  ;;  %s2592_s6 = sld [smem:[#allocation2 + $0x105]] }
  0x3e   :  { %356 = vrot.lane.b32.xlu0 %v352_v22, %s2806_s28  ;;  %v608_v22 = vmul.f32 %v606_v21, %v2863_v1  ;;  %v607_v23 = vmul.f32 %v606_v21, %v2858_v0  ;;  %s2616_s7 = sld [smem:[#allocation2 + $0x185]] }
  0x3f   :  { %s2640_s9 = sld [smem:[#allocation2 + $0x205]] }
  0x40   :  { %v654_v35 = vstv %s2711_s30  ;;  %s2688_s11 = sld [smem:[#allocation2 + $0x305]] }
  0x41   :  { %370 = vrot.lane.b32.xlu1 %v365_v24, %s2806_s28  ;;  %v618_v24 = vstv %s2639_s27  ;;  %v656_v38 = vmul.f32 %v654_v35, %v2863_v1  ;;  %s2712_s12 = sld [smem:[#allocation2 + $0x385]] }
  0x42   :  { %368 = vrot.lane.b32.xlu0 %v364_v25, %s2806_s28  ;;  %s2663_s28 = sld [smem:[#allocation2 + $0x284]]  ;;  %v620_v25 = vmul.f32 %v618_v24, %v2863_v1  ;;  %v619_v26 = vmul.f32 %v618_v24, %v2858_v0 }
  0x43   :  { %v691_v50 = vstv %s2592_s6  ;;  %s2545_s13 = sld [smem:[#allocation2 + $0x6]]  ;;  %s2813_s6 = smov 120  }
  0x44   :  { %v693_v53 = vmul.f32 %v691_v50, %v2863_v1  ;;  %s2569_s14 = sld [smem:[#allocation2 + $0x86]] }
  0x45   :  { %382 = vrot.lane.b32.xlu1 %v377_v27, %s2807_s10  ;;  %s2593_s15 = sld [smem:[#allocation2 + $0x106]] }
  0x46   :  { %380 = vrot.lane.b32.xlu0 %v376_v28, %s2807_s10  ;;  %s2617_s16 = sld [smem:[#allocation2 + $0x186]] }
  0x47   :  { %s2641_s18 = sld [smem:[#allocation2 + $0x206]] }
  0x48   :  { %v630_v27 = vstv %s2663_s28  ;;  %s2689_s20 = sld [smem:[#allocation2 + $0x306]] }
  0x49   :  { %395 = vrot.lane.b32.xlu1 %v390_v30, %s2807_s10  ;;  %v632_v28 = vmul.f32 %v630_v27, %v2863_v1  ;;  %v631_v29 = vmul.f32 %v630_v27, %v2858_v0  ;;  %v642_v30 = vstv %s2687_s29  ;;  %v763_v18 = vstv %s2545_s13  ;;  %s2713_s1 = sld [smem:[#allocation2 + $0x386]] }
  0x4a   :  { %393 = vrot.lane.b32.xlu0 %v389_v31, %s2807_s10  ;;  %v765_v21 = vmul.f32 %v763_v18, %v2863_v1  ;;  %s2546_s2 = sld [smem:[#allocation2 + $0x7]] }
  0x4b   :  { %s2570_s21 = sld [smem:[#allocation2 + $0x87]] }
  0x4c   :  { %s2594_s22 = sld [smem:[#allocation2 + $0x107]] }
  0x4d   :  { %407 = vrot.lane.b32.xlu1 %v402_v33, %s2807_s10  ;;  %v644_v33 = vmul.f32 %v642_v30, %v2863_v1  ;;  %s2618_s23 = sld [smem:[#allocation2 + $0x187]] }
  0x4e   :  { %405 = vrot.lane.b32.xlu0 %v401_v34, %s2807_s10  ;;  %v643_v34 = vmul.f32 %v642_v30, %v2858_v0  ;;  %s2642_s25 = sld [smem:[#allocation2 + $0x207]] }
  0x4f   :  { %s2690_s27 = sld [smem:[#allocation2 + $0x307]] }
  0x50   :  { %s2714_s28 = sld [smem:[#allocation2 + $0x387]] }
  0x51   :  { %419 = vrot.lane.b32.xlu1 %v414_v36, %s2807_s10  ;;  %s2547_s29 = sld [smem:[#allocation2 + $0x8]] }
  0x52   :  { %417 = vrot.lane.b32.xlu0 %v413_v37, %s2807_s10  ;;  %s2571_s30 = sld [smem:[#allocation2 + $0x88]] }
  0x53   :  { %s2596_s13 = sld [smem:[#allocation2 + $0x109]] }
  0x55   :  { %431 = vrot.lane.b32.xlu1 %v426_v39, %s2807_s10  ;;  %v655_v39 = vmul.f32 %v654_v35, %v2858_v0  ;;  %v800_v35 = vstv %s2617_s16  ;;  %s2644_s16 = sld [smem:[#allocation2 + $0x209]] }
  0x56   :  { %429 = vrot.lane.b32.xlu0 %v425_v40, %s2807_s10  ;;  %v666_v40 = vstv %s2544_s4  ;;  %s2595_s4 = sld [smem:[#allocation2 + $0x108]] }
  0x57   :  { %v667_v44 = vmul.f32 %v666_v40, %v2858_v0 }
  0x59   :  { %443 = vrot.lane.b32.xlu1 %v438_v42, %s2807_s10 }
  0x5a   :  { %441 = vrot.lane.b32.xlu0 %v437_v43, %s2807_s10  ;;  %v668_v43 = vmul.f32 %v666_v40, %v2863_v1  ;;  %v802_v40 = vmul.f32 %v800_v35, %v2863_v1 }
  0x5d   :  { %455 = vrot.lane.b32.xlu1 %v450_v45, %s2807_s10  ;;  %v679_v45 = vstv %s2568_s5  ;;  %s2619_s5 = sld [smem:[#allocation2 + $0x188]] }
  0x5e   :  { %453 = vrot.lane.b32.xlu0 %v449_v46, %s2807_s10 }
  0x61   :  { %467 = vrot.lane.b32.xlu1 %v462_v48, %s2807_s10  ;;  %v681_v48 = vmul.f32 %v679_v45, %v2863_v1 }
  0x62   :  { %465 = vrot.lane.b32.xlu0 %v461_v49, %s2807_s10  ;;  %v680_v49 = vmul.f32 %v679_v45, %v2858_v0  ;;  %s2664_s10 = sld [smem:[#allocation2 + $0x285]] }
  0x65   :  { %479 = vrot.lane.b32.xlu1 %v474_v51, %s2808_s19 }
  0x66   :  { %477 = vrot.lane.b32.xlu0 %v473_v52, %s2808_s19 }
  0x68   :  { %v727_v3 = vstv %s2664_s10  ;;  %s2715_s10 = sld [smem:[#allocation2 + $0x388]] }
  0x69   :  { %492 = vrot.lane.b32.xlu1 %v487_v54, %s2808_s19  ;;  %v692_v54 = vmul.f32 %v691_v50, %v2858_v0  ;;  %v729_v6 = vmul.f32 %v727_v3, %v2863_v1 }
  0x6a   :  { %490 = vrot.lane.b32.xlu0 %v486_v55, %s2808_s19  ;;  %v703_v55 = vstv %s2616_s7  ;;  %s2643_s7 = sld [smem:[#allocation2 + $0x208]] }
  0x6b   :  { %v704_v59 = vmul.f32 %v703_v55, %v2858_v0 }
  0x6d   :  { %504 = vrot.lane.b32.xlu1 %v499_v57, %s2808_s19 }
  0x6e   :  { %502 = vrot.lane.b32.xlu0 %v498_v58, %s2808_s19  ;;  %v705_v58 = vmul.f32 %v703_v55, %v2863_v1 }
  0x71   :  { %516 = vrot.lane.b32.xlu1 %v511_v60, %s2808_s19  ;;  %v715_v60 = vstv %s2640_s9  ;;  %s2691_s9 = sld [smem:[#allocation2 + $0x308]] }
  0x72   :  { %514 = vrot.lane.b32.xlu0 %v510_v61, %s2808_s19 }
  0x75   :  { %528 = vrot.lane.b32.xlu1 %v523_v63, %s2808_s19  ;;  %v717_v63 = vmul.f32 %v715_v60, %v2863_v1 }
  0x76   :  { %526 = vrot.lane.b32.xlu0 %v522_v2, %s2808_s19  ;;  %v716_v2 = vmul.f32 %v715_v60, %v2858_v0  ;;  %v836_v60 = vstv %s2689_s20  ;;  %s2549_s20 = sld [smem:[#allocation2 + $0xa]] }
  0x79   :  { %540 = vrot.lane.b32.xlu1 %v535_v4, %s2808_s19 }
  0x7a   :  { %538 = vrot.lane.b32.xlu0 %v534_v5, %s2808_s19 }
  0x7d   :  { %552 = vrot.lane.b32.xlu1 %v547_v7, %s2808_s19  ;;  %v728_v7 = vmul.f32 %v727_v3, %v2858_v0  ;;  %v838_v3 = vmul.f32 %v836_v60, %v2863_v1 }
  0x7e   :  { %550 = vrot.lane.b32.xlu0 %v546_v8, %s2808_s19  ;;  %v739_v8 = vstv %s2688_s11  ;;  %s2548_s11 = sld [smem:[#allocation2 + $0x9]] }
  0x7f   :  { %v740_v12 = vmul.f32 %v739_v8, %v2858_v0 }
  0x81   :  { %564 = vrot.lane.b32.xlu1 %v559_v10, %s2808_s19 }
  0x82   :  { %562 = vrot.lane.b32.xlu0 %v558_v11, %s2808_s19  ;;  %v741_v11 = vmul.f32 %v739_v8, %v2863_v1  ;;  %s2665_s19 = sld [smem:[#allocation2 + $0x286]] }
  0x85   :  { %576 = vrot.lane.b32.xlu1 %v571_v13, %s2809_s26  ;;  %v751_v13 = vstv %s2712_s12  ;;  %s2572_s12 = sld [smem:[#allocation2 + $0x89]] }
  0x86   :  { %574 = vrot.lane.b32.xlu0 %v570_v14, %s2809_s26 }
  0x89   :  { %589 = vrot.lane.b32.xlu1 %v584_v16, %s2809_s26  ;;  %v753_v16 = vmul.f32 %v751_v13, %v2863_v1 }
  0x8a   :  { %587 = vrot.lane.b32.xlu0 %v583_v17, %s2809_s26  ;;  %v752_v17 = vmul.f32 %v751_v13, %v2858_v0 }
  0x8d   :  { %601 = vrot.lane.b32.xlu1 %v596_v19, %s2809_s26 }
  0x8e   :  { %599 = vrot.lane.b32.xlu0 %v595_v20, %s2809_s26 }
  0x91   :  { %613 = vrot.lane.b32.xlu1 %v608_v22, %s2809_s26  ;;  %v764_v22 = vmul.f32 %v763_v18, %v2858_v0 }
  0x92   :  { %611 = vrot.lane.b32.xlu0 %v607_v23, %s2809_s26  ;;  %v776_v23 = vstv %s2569_s14  ;;  %s2620_s14 = sld [smem:[#allocation2 + $0x189]] }
  0x93   :  { %v777_v27 = vmul.f32 %v776_v23, %v2858_v0 }
  0x95   :  { %625 = vrot.lane.b32.xlu1 %v620_v25, %s2809_s26 }
  0x96   :  { %623 = vrot.lane.b32.xlu0 %v619_v26, %s2809_s26  ;;  %v778_v26 = vmul.f32 %v776_v23, %v2863_v1  ;;  %v873_v23 = vstv %s2570_s21  ;;  %s2576_s21 = sld [smem:[#allocation2 + $0x8d]] }
  0x97   :  { %v2983_v31 = vpop.permute.xlu1 %296 }
  0x98   :  { %v2985_v32 = vpop.permute.xlu0 %283 }
  0x99   :  { %637 = vrot.lane.b32.xlu1 %v632_v28, %s2809_s26  ;;  %v788_v28 = vstv %s2593_s15  ;;  %s2814_s15 = smov 119  }
  0x9a   :  { %635 = vrot.lane.b32.xlu0 %v631_v29, %s2809_s26 }
  0x9b   :  { %v2991_v36 = vpop.permute.xlu1 %298 }
  0x9c   :  { %v2993_v37 = vpop.permute.xlu0 %285 }
  0x9d   :  { %649 = vrot.lane.b32.xlu1 %v644_v33, %s2809_s26  ;;  %v790_v33 = vmul.f32 %v788_v28, %v2863_v1 }
  0x9e   :  { %647 = vrot.lane.b32.xlu0 %v643_v34, %s2809_s26  ;;  %v789_v34 = vmul.f32 %v788_v28, %v2858_v0  ;;  %v875_v28 = vmul.f32 %v873_v23, %v2863_v1 }
  0x9f   :  { %v2999_v41 = vpop.permute.xlu1 %310 }
  0xa0   :  { %v3001_v42 = vpop.permute.xlu0 %308 }
  0xa1   :  { %661 = vrot.lane.b32.xlu1 %v656_v38, %s2809_s26 }
  0xa2   :  { %659 = vrot.lane.b32.xlu0 %v655_v39, %s2809_s26  ;;  %s2666_s26 = sld [smem:[#allocation2 + $0x287]] }
  0xa3   :  { %v3007_v46 = vpop.permute.xlu1 %322 }
  0xa4   :  { %v3009_v47 = vpop.permute.xlu0 %320 }
  0xa5   :  { %673 = vrot.lane.b32.xlu1 %v668_v43, %s2810_s8  ;;  %v801_v43 = vmul.f32 %v800_v35, %v2858_v0 }
  0xa6   :  { %671 = vrot.lane.b32.xlu0 %v667_v44, %s2810_s8  ;;  %v812_v44 = vstv %s2641_s18  ;;  %s2692_s18 = sld [smem:[#allocation2 + $0x309]] }
  0xa7   :  { %v3015_v51 = vpop.permute.xlu1 %334  ;;  %v813_v50 = vmul.f32 %v812_v44, %v2858_v0 }
  0xa8   :  { %v3017_v52 = vpop.permute.xlu0 %332 }
  0xa9   :  { %686 = vrot.lane.b32.xlu1 %v681_v48, %s2810_s8 }
  0xaa   :  { %684 = vrot.lane.b32.xlu0 %v680_v49, %s2810_s8  ;;  %v814_v49 = vmul.f32 %v812_v44, %v2863_v1 }
  0xab   :  { %v3023_v56 = vpop.permute.xlu1 %346 }
  0xac   :  { %v3025_v57 = vpop.permute.xlu0 %344 }
  0xad   :  { %698 = vrot.lane.b32.xlu1 %v693_v53, %s2810_s8  ;;  %v824_v53 = vstv %s2665_s19  ;;  %s2716_s19 = sld [smem:[#allocation2 + $0x389]] }
  0xae   :  { %696 = vrot.lane.b32.xlu0 %v692_v54, %s2810_s8 }
  0xaf   :  { %v3031_v61 = vpop.permute.xlu1 %358 }
  0xb0   :  { %v3033_v62 = vpop.permute.xlu0 %356 }
  0xb1   :  { %710 = vrot.lane.b32.xlu1 %v705_v58, %s2810_s8  ;;  %v826_v58 = vmul.f32 %v824_v53, %v2863_v1 }
  0xb2   :  { %708 = vrot.lane.b32.xlu0 %v704_v59, %s2810_s8  ;;  %v825_v59 = vmul.f32 %v824_v53, %v2858_v0 }
  0xb3   :  { %v3039_v4 = vpop.permute.xlu1 %370 }
  0xb4   :  { %v3041_v5 = vpop.permute.xlu0 %368 }
  0xb5   :  { %722 = vrot.lane.b32.xlu1 %v717_v63, %s2810_s8 }
  0xb6   :  { %720 = vrot.lane.b32.xlu0 %v716_v2, %s2810_s8 }
  0xb7   :  { %v3047_v9 = vpop.permute.xlu1 %382 }
  0xb8   :  { %v3049_v10 = vpop.permute.xlu0 %380 }
  0xb9   :  { %734 = vrot.lane.b32.xlu1 %v729_v6, %s2810_s8  ;;  %v837_v6 = vmul.f32 %v836_v60, %v2858_v0  ;;  %v909_v60 = vstv %s2642_s25  ;;  %s2621_s25 = sld [smem:[#allocation2 + $0x18a]] }
  0xba   :  { %732 = vrot.lane.b32.xlu0 %v728_v7, %s2810_s8  ;;  %v848_v7 = vstv %s2713_s1  ;;  %s2719_s1 = sld [smem:[#allocation2 + $0x38c]] }
  0xbb   :  { %v3055_v14 = vpop.permute.xlu1 %395  ;;  %v849_v13 = vmul.f32 %v848_v7, %v2858_v0 }
  0xbc   :  { %v3057_v15 = vpop.permute.xlu0 %393 }
  0xbd   :  { %746 = vrot.lane.b32.xlu1 %v741_v11, %s2810_s8 }
  0xbe   :  { %744 = vrot.lane.b32.xlu0 %v740_v12, %s2810_s8  ;;  %v850_v12 = vmul.f32 %v848_v7, %v2863_v1  ;;  %v911_v7 = vmul.f32 %v909_v60, %v2863_v1 }
  0xbf   :  { %v3063_v19 = vpop.permute.xlu1 %407 }
  0xc0   :  { %v3065_v20 = vpop.permute.xlu0 %405 }
  0xc1   :  { %758 = vrot.lane.b32.xlu1 %v753_v16, %s2810_s8  ;;  %v860_v16 = vstv %s2546_s2  ;;  %s2552_s2 = sld [smem:[#allocation2 + $0xd]] }
  0xc2   :  { %756 = vrot.lane.b32.xlu0 %v752_v17, %s2810_s8  ;;  %s2667_s8 = sld [smem:[#allocation2 + $0x288]] }
  0xc3   :  { %v3071_v24 = vpop.permute.xlu1 %419 }
  0xc4   :  { %v3073_v25 = vpop.permute.xlu0 %417 }
  0xc5   :  { %770 = vrot.lane.b32.xlu1 %v765_v21, %s2811_s17  ;;  %v862_v21 = vmul.f32 %v860_v16, %v2863_v1 }
  0xc6   :  { %768 = vrot.lane.b32.xlu0 %v764_v22, %s2811_s17  ;;  %v861_v22 = vmul.f32 %v860_v16, %v2858_v0 }
  0xc7   :  { %v3079_v29 = vpop.permute.xlu1 %431 }
  0xc8   :  { %v3081_v30 = vpop.permute.xlu0 %429 }
  0xc9   :  { %783 = vrot.lane.b32.xlu1 %v778_v26, %s2811_s17 }
  0xca   :  { %781 = vrot.lane.b32.xlu0 %v777_v27, %s2811_s17 }
  0xcb   :  { %v3087_v38 = vpop.permute.xlu1 %443 }
  0xcc   :  { %v3089_v39 = vpop.permute.xlu0 %441 }
  0xcd   :  { %795 = vrot.lane.b32.xlu1 %v790_v33, %s2811_s17  ;;  %v874_v33 = vmul.f32 %v873_v23, %v2858_v0 }
  0xce   :  { %793 = vrot.lane.b32.xlu0 %v789_v34, %s2811_s17  ;;  %v885_v34 = vstv %s2594_s22  ;;  %s2600_s22 = sld [smem:[#allocation2 + $0x10d]] }
  0xcf   :  { %v3095_v45 = vpop.permute.xlu1 %455  ;;  %v886_v44 = vmul.f32 %v885_v34, %v2858_v0 }
  0xd0   :  { %v3097_v48 = vpop.permute.xlu0 %453 }
  0xd1   :  { %807 = vrot.lane.b32.xlu1 %v802_v40, %s2811_s17 }
  0xd2   :  { %805 = vrot.lane.b32.xlu0 %v801_v43, %s2811_s17  ;;  %v887_v43 = vmul.f32 %v885_v34, %v2863_v1 }
  0xd3   :  { %v3103_v54 = vpop.permute.xlu1 %467 }
  0xd4   :  { %v3105_v55 = vpop.permute.xlu0 %465 }
  0xd5   :  { %819 = vrot.lane.b32.xlu1 %v814_v49, %s2811_s17  ;;  %v897_v49 = vstv %s2618_s23  ;;  %s2573_s23 = sld [smem:[#allocation2 + $0x8a]] }
  0xd6   :  { %817 = vrot.lane.b32.xlu0 %v813_v50, %s2811_s17 }
  0xd7   :  { %v3111_v63 = vpop.permute.xlu1 %479 }
  0xd8   :  { %v3113_v2 = vpop.permute.xlu0 %477 }
  0xd9   :  { %4910 = vst [vmem:[#allocation8_spill] sm:$0xff] %v3113_v2  ;;  %831 = vrot.lane.b32.xlu1 %v826_v58, %s2811_s17  ;;  %v899_v58 = vmul.f32 %v897_v49, %v2863_v1 }
  0xda   :  { %829 = vrot.lane.b32.xlu0 %v825_v59, %s2811_s17  ;;  %v898_v59 = vmul.f32 %v897_v49, %v2858_v0  ;;  %v945_v49 = vstv %s2714_s28  ;;  %s2669_s28 = sld [smem:[#allocation2 + $0x28a]] }
  0xdb   :  { %v3119_v8 = vpop.permute.xlu1 %492 }
  0xdc   :  { %4911 = vst [vmem:[#allocation9_spill] sm:$0xff] %v3119_v8  ;;  %v3121_v11 = vpop.permute.xlu0 %490 }
  0xdd   :  { %4912 = vst [vmem:[#allocation10_spill] sm:$0xff] %v3121_v11  ;;  %843 = vrot.lane.b32.xlu1 %v838_v3, %s2811_s17 }
  0xde   :  { %841 = vrot.lane.b32.xlu0 %v837_v6, %s2811_s17 }
  0xdf   :  { %v3127_v17 = vpop.permute.xlu1 %504 }
  0xe0   :  { %4913 = vst [vmem:[#allocation11_spill] sm:$0xff] %v3127_v17  ;;  %v3129_v18 = vpop.permute.xlu0 %502 }
  0xe1   :  { %4914 = vst [vmem:[#allocation12_spill] sm:$0xff] %v3129_v18  ;;  %855 = vrot.lane.b32.xlu1 %v850_v12, %s2811_s17  ;;  %v910_v12 = vmul.f32 %v909_v60, %v2858_v0  ;;  %v947_v60 = vmul.f32 %v945_v49, %v2863_v1 }
  0xe2   :  { %853 = vrot.lane.b32.xlu0 %v849_v13, %s2811_s17  ;;  %v921_v13 = vstv %s2666_s26  ;;  %s2668_s17 = sld [smem:[#allocation2 + $0x289]]  ;;  %s2815_s26 = smov 118  }
  0xe3   :  { %v3135_v26 = vpop.permute.xlu1 %516  ;;  %v922_v23 = vmul.f32 %v921_v13, %v2858_v0 }
  0xe4   :  { %4915 = vst [vmem:[#allocation13_spill] sm:$0xff] %v3135_v26  ;;  %v3137_v27 = vpop.permute.xlu0 %514 }
  0xe5   :  { %4916 = vst [vmem:[#allocation14_spill] sm:$0xff] %v3137_v27  ;;  %867 = vrot.lane.b32.xlu1 %v862_v21, %s2812_s24 }
  0xe6   :  { %865 = vrot.lane.b32.xlu0 %v861_v22, %s2812_s24  ;;  %v923_v22 = vmul.f32 %v921_v13, %v2863_v1 }
  0xe7   :  { %v3143_v35 = vpop.permute.xlu1 %528 }
  0xe8   :  { %4917 = vst [vmem:[#allocation15_spill] sm:$0xff] %v3143_v35  ;;  %v3145_v40 = vpop.permute.xlu0 %526 }
  0xe9   :  { %4918 = vst [vmem:[#allocation16_spill] sm:$0xff] %v3145_v40  ;;  %880 = vrot.lane.b32.xlu1 %v875_v28, %s2812_s24  ;;  %v933_v28 = vstv %s2690_s27  ;;  %s2645_s27 = sld [smem:[#allocation2 + $0x20a]] }
  0xea   :  { %878 = vrot.lane.b32.xlu0 %v874_v33, %s2812_s24 }
  0xeb   :  { %v3151_v50 = vpop.permute.xlu1 %540 }
  0xec   :  { %4919 = vst [vmem:[#allocation17_spill] sm:$0xff] %v3151_v50  ;;  %v3153_v53 = vpop.permute.xlu0 %538 }
  0xed   :  { %4920 = vst [vmem:[#allocation18_spill] sm:$0xff] %v3153_v53  ;;  %892 = vrot.lane.b32.xlu1 %v887_v43, %s2812_s24  ;;  %v935_v43 = vmul.f32 %v933_v28, %v2863_v1 }
  0xee   :  { %890 = vrot.lane.b32.xlu0 %v886_v44, %s2812_s24  ;;  %v934_v44 = vmul.f32 %v933_v28, %v2858_v0 }
  0xef   :  { %v3159_v3 = vpop.permute.xlu1 %552 }
  0xf0   :  { %4921 = vst [vmem:[#allocation19_spill] sm:$0xff] %v3159_v3  ;;  %v3161_v6 = vpop.permute.xlu0 %550 }
  0xf1   :  { %4922 = vst [vmem:[#allocation20_spill] sm:$0xff] %v3161_v6  ;;  %904 = vrot.lane.b32.xlu1 %v899_v58, %s2812_s24 }
  0xf2   :  { %902 = vrot.lane.b32.xlu0 %v898_v59, %s2812_s24 }
  0xf3   :  { %v3167_v16 = vpop.permute.xlu1 %564 }
  0xf4   :  { %4923 = vst [vmem:[#allocation21_spill] sm:$0xff] %v3167_v16  ;;  %v3169_v21 = vpop.permute.xlu0 %562 }
  0xf5   :  { %4924 = vst [vmem:[#allocation22_spill] sm:$0xff] %v3169_v21  ;;  %916 = vrot.lane.b32.xlu1 %v911_v7, %s2812_s24  ;;  %v946_v7 = vmul.f32 %v945_v49, %v2858_v0 }
  0xf6   :  { %914 = vrot.lane.b32.xlu0 %v910_v12, %s2812_s24  ;;  %v957_v12 = vstv %s2547_s29  ;;  %s2693_s29 = sld [smem:[#allocation2 + $0x30a]] }
  0xf7   :  { %v3175_v33 = vpop.permute.xlu1 %576  ;;  %v958_v28 = vmul.f32 %v957_v12, %v2858_v0 }
  0xf8   :  { %4925 = vst [vmem:[#allocation23_spill] sm:$0xff] %v3175_v33  ;;  %v3177_v34 = vpop.permute.xlu0 %574 }
  0xf9   :  { %4926 = vst [vmem:[#allocation24_spill] sm:$0xff] %v3177_v34  ;;  %928 = vrot.lane.b32.xlu1 %v923_v22, %s2812_s24 }
  0xfa   :  { %926 = vrot.lane.b32.xlu0 %v922_v23, %s2812_s24  ;;  %v959_v23 = vmul.f32 %v957_v12, %v2863_v1 }
  0xfb   :  { %v3183_v58 = vpop.permute.xlu1 %589 }
  0xfc   :  { %4927 = vst [vmem:[#allocation25_spill] sm:$0xff] %v3183_v58  ;;  %v3185_v59 = vpop.permute.xlu0 %587 }
  0xfd   :  { %4928 = vst [vmem:[#allocation26_spill] sm:$0xff] %v3185_v59  ;;  %940 = vrot.lane.b32.xlu1 %v935_v43, %s2812_s24  ;;  %v970_v43 = vstv %s2571_s30  ;;  %s2717_s30 = sld [smem:[#allocation2 + $0x38a]] }
  0xfe   :  { %938 = vrot.lane.b32.xlu0 %v934_v44, %s2812_s24  ;;  %v972_v49 = vmul.f32 %v970_v43, %v2863_v1 }
  0xff   :  { %v3191_v13 = vpop.permute.xlu1 %601 }
 0x100   :  { %4929 = vst [vmem:[#allocation27_spill] sm:$0xff] %v3191_v13  ;;  %v3193_v22 = vpop.permute.xlu0 %599 }
 0x101   :  { %4930 = vst [vmem:[#allocation28_spill] sm:$0xff] %v3193_v22  ;;  %952 = vrot.lane.b32.xlu1 %v947_v60, %s2812_s24  ;;  %v971_v60 = vmul.f32 %v970_v43, %v2858_v0  ;;  %v982_v22 = vstv %s2595_s4  ;;  %s2550_s4 = sld [smem:[#allocation2 + $0xb]] }
 0x102   :  { %950 = vrot.lane.b32.xlu0 %v946_v7, %s2812_s24  ;;  %s2597_s24 = sld [smem:[#allocation2 + $0x10a]] }
 0x103   :  { %v3199_v59 = vpop.permute.xlu1 %613 }
 0x104   :  { %4931 = vst [vmem:[#allocation29_spill] sm:$0xff] %v3199_v59  ;;  %v3201_v44 = vpop.permute.xlu0 %611  ;;  %v984_v59 = vmul.f32 %v982_v22, %v2863_v1 }
 0x105   :  { %4932 = vst [vmem:[#allocation30_spill] sm:$0xff] %v3201_v44  ;;  %964 = vrot.lane.b32.xlu1 %v959_v23, %s2813_s6  ;;  %v983_v23 = vmul.f32 %v982_v22, %v2858_v0  ;;  %v994_v44 = vstv %s2619_s5  ;;  %s2574_s5 = sld [smem:[#allocation2 + $0x8b]] }
 0x106   :  { %962 = vrot.lane.b32.xlu0 %v958_v28, %s2813_s6  ;;  %v996_v43 = vmul.f32 %v994_v44, %v2863_v1 }
 0x107   :  { %v3207_v7 = vpop.permute.xlu1 %625 }
 0x108   :  { %4933 = vst [vmem:[#allocation31_spill] sm:$0xff] %v3207_v7  ;;  %v3209_v12 = vpop.permute.xlu0 %623 }
 0x109   :  { %4934 = vst [vmem:[#allocation32_spill] sm:$0xff] %v3209_v12  ;;  %977 = vrot.lane.b32.xlu1 %v972_v49, %s2813_s6  ;;  %v995_v49 = vmul.f32 %v994_v44, %v2858_v0  ;;  %v1006_v12 = vstv %s2643_s7  ;;  %s2622_s7 = sld [smem:[#allocation2 + $0x18b]] }
 0x10a   :  { %975 = vrot.lane.b32.xlu0 %v971_v60, %s2813_s6  ;;  %v1008_v22 = vmul.f32 %v1006_v12, %v2863_v1 }
 0x10b   :  { %v3215_v13 = vpop.permute.xlu1 %637 }
 0x10c   :  { %4935 = vst [vmem:[#allocation33_spill] sm:$0xff] %v3215_v13  ;;  %v3217_v28 = vpop.permute.xlu0 %635 }
 0x10d   :  { %4936 = vst [vmem:[#allocation34_spill] sm:$0xff] %v3217_v28  ;;  %989 = vrot.lane.b32.xlu1 %v984_v59, %s2813_s6  ;;  %v1007_v59 = vmul.f32 %v1006_v12, %v2858_v0  ;;  %v1018_v28 = vstv %s2667_s8  ;;  %s2816_s8 = smov 117  }
 0x10e   :  { %987 = vrot.lane.b32.xlu0 %v983_v23, %s2813_s6  ;;  %v1020_v44 = vmul.f32 %v1018_v28, %v2863_v1 }
 0x10f   :  { %v3223_v7 = vpop.permute.xlu1 %649 }
 0x110   :  { %4937 = vst [vmem:[#allocation35_spill] sm:$0xff] %v3223_v7  ;;  %v3225_v60 = vpop.permute.xlu0 %647 }
 0x111   :  { %4938 = vst [vmem:[#allocation36_spill] sm:$0xff] %v3225_v60  ;;  %1001 = vrot.lane.b32.xlu1 %v996_v43, %s2813_s6  ;;  %v1019_v43 = vmul.f32 %v1018_v28, %v2858_v0  ;;  %v1030_v60 = vstv %s2691_s9  ;;  %s2646_s9 = sld [smem:[#allocation2 + $0x20b]] }
 0x112   :  { %999 = vrot.lane.b32.xlu0 %v995_v49, %s2813_s6  ;;  %v1032_v12 = vmul.f32 %v1030_v60, %v2863_v1 }
 0x113   :  { %v3231_v13 = vpop.permute.xlu1 %661 }
 0x114   :  { %4939 = vst [vmem:[#allocation37_spill] sm:$0xff] %v3231_v13  ;;  %v3233_v23 = vpop.permute.xlu0 %659 }
 0x115   :  { %4940 = vst [vmem:[#allocation38_spill] sm:$0xff] %v3233_v23  ;;  %1013 = vrot.lane.b32.xlu1 %v1008_v22, %s2813_s6  ;;  %v1031_v22 = vmul.f32 %v1030_v60, %v2858_v0  ;;  %v1042_v23 = vstv %s2715_s10  ;;  %s2670_s10 = sld [smem:[#allocation2 + $0x28b]] }
 0x116   :  { %1011 = vrot.lane.b32.xlu0 %v1007_v59, %s2813_s6  ;;  %v1044_v28 = vmul.f32 %v1042_v23, %v2863_v1 }
 0x117   :  { %v3239_v7 = vpop.permute.xlu1 %673 }
 0x118   :  { %4941 = vst [vmem:[#allocation39_spill] sm:$0xff] %v3239_v7  ;;  %v3241_v49 = vpop.permute.xlu0 %671 }
 0x119   :  { %4942 = vst [vmem:[#allocation40_spill] sm:$0xff] %v3241_v49  ;;  %1025 = vrot.lane.b32.xlu1 %v1020_v44, %s2813_s6  ;;  %v1043_v44 = vmul.f32 %v1042_v23, %v2858_v0  ;;  %v1054_v49 = vstv %s2548_s11  ;;  %s2694_s11 = sld [smem:[#allocation2 + $0x30b]] }
 0x11a   :  { %1023 = vrot.lane.b32.xlu0 %v1019_v43, %s2813_s6  ;;  %v1056_v60 = vmul.f32 %v1054_v49, %v2863_v1 }
 0x11b   :  { %v3247_v13 = vpop.permute.xlu1 %686 }
 0x11c   :  { %4943 = vst [vmem:[#allocation41_spill] sm:$0xff] %v3247_v13  ;;  %v3249_v59 = vpop.permute.xlu0 %684 }
 0x11d   :  { %4944 = vst [vmem:[#allocation42_spill] sm:$0xff] %v3249_v59  ;;  %1037 = vrot.lane.b32.xlu1 %v1032_v12, %s2813_s6  ;;  %v1055_v12 = vmul.f32 %v1054_v49, %v2858_v0  ;;  %v1067_v59 = vstv %s2572_s12  ;;  %s2718_s12 = sld [smem:[#allocation2 + $0x38b]] }
 0x11e   :  { %1035 = vrot.lane.b32.xlu0 %v1031_v22, %s2813_s6  ;;  %v1069_v23 = vmul.f32 %v1067_v59, %v2863_v1 }
 0x11f   :  { %v3255_v7 = vpop.permute.xlu1 %698 }
 0x120   :  { %4945 = vst [vmem:[#allocation43_spill] sm:$0xff] %v3255_v7  ;;  %v3257_v43 = vpop.permute.xlu0 %696 }
 0x121   :  { %4946 = vst [vmem:[#allocation44_spill] sm:$0xff] %v3257_v43  ;;  %1049 = vrot.lane.b32.xlu1 %v1044_v28, %s2813_s6  ;;  %v1068_v28 = vmul.f32 %v1067_v59, %v2858_v0  ;;  %v1079_v43 = vstv %s2596_s13  ;;  %s2551_s13 = sld [smem:[#allocation2 + $0xc]] }
 0x122   :  { %1047 = vrot.lane.b32.xlu0 %v1043_v44, %s2813_s6  ;;  %s2598_s6 = sld [smem:[#allocation2 + $0x10b]] }
 0x123   :  { %v3263_v13 = vpop.permute.xlu1 %710 }
 0x124   :  { %4947 = vst [vmem:[#allocation45_spill] sm:$0xff] %v3263_v13  ;;  %v3265_v22 = vpop.permute.xlu0 %708  ;;  %v1081_v13 = vmul.f32 %v1079_v43, %v2863_v1 }
 0x125   :  { %4948 = vst [vmem:[#allocation46_spill] sm:$0xff] %v3265_v22  ;;  %1061 = vrot.lane.b32.xlu1 %v1056_v60, %s2814_s15  ;;  %v1080_v60 = vmul.f32 %v1079_v43, %v2858_v0  ;;  %v1091_v22 = vstv %s2620_s14  ;;  %s2575_s14 = sld [smem:[#allocation2 + $0x8c]] }
 0x126   :  { %1059 = vrot.lane.b32.xlu0 %v1055_v12, %s2814_s15  ;;  %v1093_v59 = vmul.f32 %v1091_v22, %v2863_v1 }
 0x127   :  { %v3271_v44 = vpop.permute.xlu1 %722 }
 0x128   :  { %4949 = vst [vmem:[#allocation47_spill] sm:$0xff] %v3271_v44  ;;  %v3273_v49 = vpop.permute.xlu0 %720 }
 0x129   :  { %4950 = vst [vmem:[#allocation48_spill] sm:$0xff] %v3273_v49  ;;  %1074 = vrot.lane.b32.xlu1 %v1069_v23, %s2814_s15  ;;  %v1092_v23 = vmul.f32 %v1091_v22, %v2858_v0  ;;  %v1103_v49 = vstv %s2644_s16  ;;  %s2623_s16 = sld [smem:[#allocation2 + $0x18c]] }
 0x12a   :  { %1072 = vrot.lane.b32.xlu0 %v1068_v28, %s2814_s15  ;;  %v1105_v43 = vmul.f32 %v1103_v49, %v2863_v1 }
 0x12b   :  { %v3279_v7 = vpop.permute.xlu1 %734 }
 0x12c   :  { %4951 = vst [vmem:[#allocation49_spill] sm:$0xff] %v3279_v7  ;;  %v3281_v12 = vpop.permute.xlu0 %732 }
 0x12d   :  { %4952 = vst [vmem:[#allocation50_spill] sm:$0xff] %v3281_v12  ;;  %1086 = vrot.lane.b32.xlu1 %v1081_v13, %s2814_s15  ;;  %v1104_v13 = vmul.f32 %v1103_v49, %v2858_v0  ;;  %v1115_v12 = vstv %s2668_s17  ;;  %v3311_v49 = vld [vmem:[%s4906_s0 + $0x8] sm:$0xff]  ;;  %s2817_s17 = smov 116  }
 0x12e   :  { %1084 = vrot.lane.b32.xlu0 %v1080_v60, %s2814_s15  ;;  %v1117_v22 = vmul.f32 %v1115_v12, %v2863_v1 }
 0x12f   :  { %v3287_v44 = vpop.permute.xlu1 %746 }
 0x130   :  { %4953 = vst [vmem:[#allocation51_spill] sm:$0xff] %v3287_v44  ;;  %v3289_v28 = vpop.permute.xlu0 %744 }
 0x131   :  { %4954 = vst [vmem:[#allocation52_spill] sm:$0xff] %v3289_v28  ;;  %1098 = vrot.lane.b32.xlu1 %v1093_v59, %s2814_s15  ;;  %v1116_v59 = vmul.f32 %v1115_v12, %v2858_v0  ;;  %v1127_v28 = vstv %s2692_s18  ;;  %v3318_v0 = vld [vmem:[%s4906_s0] sm:$0xff]  ;;  %v1139_v12 = vstv %s2716_s19  ;;  %s2647_s18 = sld [smem:[#allocation2 + $0x20c]] }
 0x132   :  { %1096 = vrot.lane.b32.xlu0 %v1092_v23, %s2814_s15  ;;  %v1128_v1 = vmul.f32 %v3318_v0, %v1127_v28  ;;  %s2671_s19 = sld [smem:[#allocation2 + $0x28c]] }
 0x133   :  { %v3295_v7 = vpop.permute.xlu1 %758 }
 0x134   :  { %4955 = vst [vmem:[#allocation53_spill] sm:$0xff] %v3295_v7  ;;  %v3297_v60 = vpop.permute.xlu0 %756 }
 0x135   :  { %4956 = vst [vmem:[#allocation54_spill] sm:$0xff] %v3297_v60  ;;  %1110 = vrot.lane.b32.xlu1 %v1105_v43, %s2814_s15  ;;  %v1129_v43 = vmul.f32 %v3311_v49, %v1127_v28 }
 0x136   :  { %1108 = vrot.lane.b32.xlu0 %v1104_v13, %s2814_s15 }
 0x137   :  { %v3303_v44 = vpop.permute.xlu1 %770 }
 0x138   :  { %4957 = vst [vmem:[#allocation55_spill] sm:$0xff] %v3303_v44  ;;  %v3305_v23 = vpop.permute.xlu0 %768  ;;  %v1151_v44 = vstv %s2549_s20  ;;  %s2695_s20 = sld [smem:[#allocation2 + $0x30c]] }
 0x139   :  { %4958 = vst [vmem:[#allocation56_spill] sm:$0xff] %v3305_v23  ;;  %1122 = vrot.lane.b32.xlu1 %v1117_v22, %s2814_s15  ;;  %v1141_v23 = vmul.f32 %v3311_v49, %v1139_v12  ;;  %v1153_v28 = vmul.f32 %v3311_v49, %v1151_v44 }
 0x13a   :  { %1120 = vrot.lane.b32.xlu0 %v1116_v59, %s2814_s15  ;;  %v1140_v59 = vmul.f32 %v3318_v0, %v1139_v12 }
 0x13b   :  { %v3321_v13 = vpop.permute.xlu1 %783 }
 0x13c   :  { %4959 = vst [vmem:[#allocation57_spill] sm:$0xff] %v3321_v13  ;;  %v3323_v22 = vpop.permute.xlu0 %781 }
 0x13d   :  { %4960 = vst [vmem:[#allocation58_spill] sm:$0xff] %v3323_v22  ;;  %1134 = vrot.lane.b32.xlu1 %v1129_v43, %s2814_s15  ;;  %v1152_v43 = vmul.f32 %v3318_v0, %v1151_v44  ;;  %v1164_v22 = vstv %s2573_s23  ;;  %s2624_s23 = sld [smem:[#allocation2 + $0x18d]] }
 0x13e   :  { %1132 = vrot.lane.b32.xlu0 %v1128_v1, %s2814_s15  ;;  %v1166_v12 = vmul.f32 %v3311_v49, %v1164_v22 }
 0x13f   :  { %v3329_v60 = vpop.permute.xlu1 %795 }
 0x140   :  { %4961 = vst [vmem:[#allocation59_spill] sm:$0xff] %v3329_v60  ;;  %v3331_v7 = vpop.permute.xlu0 %793 }
 0x141   :  { %4962 = vst [vmem:[#allocation60_spill] sm:$0xff] %v3331_v7  ;;  %1146 = vrot.lane.b32.xlu1 %v1141_v23, %s2814_s15  ;;  %v1165_v23 = vmul.f32 %v3318_v0, %v1164_v22  ;;  %v1176_v7 = vstv %s2597_s24  ;;  %s2818_s24 = smov 115  }
 0x142   :  { %1144 = vrot.lane.b32.xlu0 %v1140_v59, %s2814_s15  ;;  %s2599_s15 = sld [smem:[#allocation2 + $0x10c]] }
 0x143   :  { %v3337_v13 = vpop.permute.xlu1 %807 }
 0x144   :  { %4963 = vst [vmem:[#allocation61_spill] sm:$0xff] %v3337_v13  ;;  %v3339_v1 = vpop.permute.xlu0 %805  ;;  %v1178_v13 = vmul.f32 %v3311_v49, %v1176_v7 }
 0x145   :  { %4964 = vst [vmem:[#allocation62_spill] sm:$0xff] %v3339_v1  ;;  %1158 = vrot.lane.b32.xlu1 %v1153_v28, %s2815_s26  ;;  %v1177_v28 = vmul.f32 %v3318_v0, %v1176_v7  ;;  %v1188_v1 = vstv %s2621_s25  ;;  %s2648_s25 = sld [smem:[#allocation2 + $0x20d]] }
 0x146   :  { %1156 = vrot.lane.b32.xlu0 %v1152_v43, %s2815_s26  ;;  %v1190_v22 = vmul.f32 %v3311_v49, %v1188_v1 }
 0x147   :  { %v3345_v59 = vpop.permute.xlu1 %819 }
 0x148   :  { %4965 = vst [vmem:[#allocation63_spill] sm:$0xff] %v3345_v59  ;;  %v3347_v44 = vpop.permute.xlu0 %817 }
 0x149   :  { %4966 = vst [vmem:[#allocation64_spill] sm:$0xff] %v3347_v44  ;;  %1171 = vrot.lane.b32.xlu1 %v1166_v12, %s2815_s26  ;;  %v1189_v12 = vmul.f32 %v3318_v0, %v1188_v1  ;;  %v1200_v44 = vstv %s2645_s27  ;;  %s2696_s27 = sld [smem:[#allocation2 + $0x30d]] }
 0x14a   :  { %1169 = vrot.lane.b32.xlu0 %v1165_v23, %s2815_s26  ;;  %v1202_v7 = vmul.f32 %v3311_v49, %v1200_v44 }
 0x14b   :  { %v3353_v60 = vpop.permute.xlu1 %831 }
 0x14c   :  { %4967 = vst [vmem:[#allocation65_spill] sm:$0xff] %v3353_v60  ;;  %v3355_v43 = vpop.permute.xlu0 %829 }
 0x14d   :  { %4968 = vst [vmem:[#allocation66_spill] sm:$0xff] %v3355_v43  ;;  %1183 = vrot.lane.b32.xlu1 %v1178_v13, %s2815_s26  ;;  %v1201_v13 = vmul.f32 %v3318_v0, %v1200_v44  ;;  %v1212_v43 = vstv %s2669_s28  ;;  %s2720_s28 = sld [smem:[#allocation2 + $0x38d]] }
 0x14e   :  { %1181 = vrot.lane.b32.xlu0 %v1177_v28, %s2815_s26  ;;  %v1214_v1 = vmul.f32 %v3311_v49, %v1212_v43 }
 0x14f   :  { %v3361_v59 = vpop.permute.xlu1 %843 }
 0x150   :  { %4969 = vst [vmem:[#allocation67_spill] sm:$0xff] %v3361_v59  ;;  %v3363_v23 = vpop.permute.xlu0 %841 }
 0x151   :  { %4970 = vst [vmem:[#allocation68_spill] sm:$0xff] %v3363_v23  ;;  %1195 = vrot.lane.b32.xlu1 %v1190_v22, %s2815_s26  ;;  %v1213_v22 = vmul.f32 %v3318_v0, %v1212_v43  ;;  %v1224_v23 = vstv %s2693_s29  ;;  %s2553_s29 = sld [smem:[#allocation2 + $0xe]] }
 0x152   :  { %1193 = vrot.lane.b32.xlu0 %v1189_v12, %s2815_s26  ;;  %v1226_v44 = vmul.f32 %v3311_v49, %v1224_v23 }
 0x153   :  { %v3369_v60 = vpop.permute.xlu1 %855 }
 0x154   :  { %4971 = vst [vmem:[#allocation69_spill] sm:$0xff] %v3369_v60  ;;  %v3371_v28 = vpop.permute.xlu0 %853 }
 0x155   :  { %4972 = vst [vmem:[#allocation70_spill] sm:$0xff] %v3371_v28  ;;  %1207 = vrot.lane.b32.xlu1 %v1202_v7, %s2815_s26  ;;  %v1225_v7 = vmul.f32 %v3318_v0, %v1224_v23  ;;  %v1236_v28 = vstv %s2717_s30  ;;  %s2577_s30 = sld [smem:[#allocation2 + $0x8e]] }
 0x156   :  { %1205 = vrot.lane.b32.xlu0 %v1201_v13, %s2815_s26  ;;  %v1238_v43 = vmul.f32 %v3311_v49, %v1236_v28 }
 0x157   :  { %v3377_v59 = vpop.permute.xlu1 %867 }
 0x158   :  { %4973 = vst [vmem:[#allocation71_spill] sm:$0xff] %v3377_v59  ;;  %v3379_v12 = vpop.permute.xlu0 %865 }
 0x159   :  { %4974 = vst [vmem:[#allocation72_spill] sm:$0xff] %v3379_v12  ;;  %1219 = vrot.lane.b32.xlu1 %v1214_v1, %s2815_s26  ;;  %v1237_v1 = vmul.f32 %v3318_v0, %v1236_v28  ;;  %v1248_v12 = vstv %s2550_s4  ;;  %s2601_s4 = sld [smem:[#allocation2 + $0x10e]] }
 0x15a   :  { %1217 = vrot.lane.b32.xlu0 %v1213_v22, %s2815_s26  ;;  %v1250_v23 = vmul.f32 %v3311_v49, %v1248_v12 }
 0x15b   :  { %v3385_v60 = vpop.permute.xlu1 %880 }
 0x15c   :  { %4975 = vst [vmem:[#allocation73_spill] sm:$0xff] %v3385_v60  ;;  %v3387_v13 = vpop.permute.xlu0 %878 }
 0x15d   :  { %4976 = vst [vmem:[#allocation74_spill] sm:$0xff] %v3387_v13  ;;  %1231 = vrot.lane.b32.xlu1 %v1226_v44, %s2815_s26  ;;  %v1249_v44 = vmul.f32 %v3318_v0, %v1248_v12  ;;  %v1261_v13 = vstv %s2574_s5  ;;  %s2625_s5 = sld [smem:[#allocation2 + $0x18e]] }
 0x15e   :  { %1229 = vrot.lane.b32.xlu0 %v1225_v7, %s2815_s26  ;;  %v1263_v28 = vmul.f32 %v3311_v49, %v1261_v13 }
 0x15f   :  { %v3393_v59 = vpop.permute.xlu1 %892 }
 0x160   :  { %4977 = vst [vmem:[#allocation75_spill] sm:$0xff] %v3393_v59  ;;  %v3395_v22 = vpop.permute.xlu0 %890 }
 0x161   :  { %4978 = vst [vmem:[#allocation76_spill] sm:$0xff] %v3395_v22  ;;  %1243 = vrot.lane.b32.xlu1 %v1238_v43, %s2815_s26  ;;  %v1262_v43 = vmul.f32 %v3318_v0, %v1261_v13  ;;  %v1273_v22 = vstv %s2598_s6  ;;  %s2819_s6 = smov 114  }
 0x162   :  { %1241 = vrot.lane.b32.xlu0 %v1237_v1, %s2815_s26  ;;  %s2672_s26 = sld [smem:[#allocation2 + $0x28d]] }
 0x163   :  { %v3401_v60 = vpop.permute.xlu1 %904 }
 0x164   :  { %4979 = vst [vmem:[#allocation77_spill] sm:$0xff] %v3401_v60  ;;  %v3403_v7 = vpop.permute.xlu0 %902  ;;  %v1275_v60 = vmul.f32 %v3311_v49, %v1273_v22 }
 0x165   :  { %4980 = vst [vmem:[#allocation78_spill] sm:$0xff] %v3403_v7  ;;  %1255 = vrot.lane.b32.xlu1 %v1250_v23, %s2816_s8  ;;  %v1274_v23 = vmul.f32 %v3318_v0, %v1273_v22  ;;  %v1285_v7 = vstv %s2622_s7  ;;  %s2649_s7 = sld [smem:[#allocation2 + $0x20e]] }
 0x166   :  { %1253 = vrot.lane.b32.xlu0 %v1249_v44, %s2816_s8  ;;  %v1287_v13 = vmul.f32 %v3311_v49, %v1285_v7 }
 0x167   :  { %v3409_v1 = vpop.permute.xlu1 %916 }
 0x168   :  { %4981 = vst [vmem:[#allocation79_spill] sm:$0xff] %v3409_v1  ;;  %v3411_v12 = vpop.permute.xlu0 %914 }
 0x169   :  { %4982 = vst [vmem:[#allocation80_spill] sm:$0xff] %v3411_v12  ;;  %1268 = vrot.lane.b32.xlu1 %v1263_v28, %s2816_s8  ;;  %v1286_v28 = vmul.f32 %v3318_v0, %v1285_v7  ;;  %v1297_v12 = vstv %s2646_s9  ;;  %s2697_s9 = sld [smem:[#allocation2 + $0x30e]] }
 0x16a   :  { %1266 = vrot.lane.b32.xlu0 %v1262_v43, %s2816_s8  ;;  %v1299_v22 = vmul.f32 %v3311_v49, %v1297_v12 }
 0x16b   :  { %v3417_v59 = vpop.permute.xlu1 %928 }
 0x16c   :  { %4983 = vst [vmem:[#allocation81_spill] sm:$0xff] %v3417_v59  ;;  %v3419_v44 = vpop.permute.xlu0 %926 }
 0x16d   :  { %4984 = vst [vmem:[#allocation82_spill] sm:$0xff] %v3419_v44  ;;  %1280 = vrot.lane.b32.xlu1 %v1275_v60, %s2816_s8  ;;  %v1298_v60 = vmul.f32 %v3318_v0, %v1297_v12  ;;  %v1309_v44 = vstv %s2670_s10  ;;  %s2721_s10 = sld [smem:[#allocation2 + $0x38e]] }
 0x16e   :  { %1278 = vrot.lane.b32.xlu0 %v1274_v23, %s2816_s8  ;;  %v1311_v7 = vmul.f32 %v3311_v49, %v1309_v44 }
 0x16f   :  { %v3425_v1 = vpop.permute.xlu1 %940 }
 0x170   :  { %4985 = vst [vmem:[#allocation83_spill] sm:$0xff] %v3425_v1  ;;  %v3427_v43 = vpop.permute.xlu0 %938 }
 0x171   :  { %4986 = vst [vmem:[#allocation84_spill] sm:$0xff] %v3427_v43  ;;  %1292 = vrot.lane.b32.xlu1 %v1287_v13, %s2816_s8  ;;  %v1310_v13 = vmul.f32 %v3318_v0, %v1309_v44  ;;  %v1321_v43 = vstv %s2694_s11  ;;  %s2554_s11 = sld [smem:[#allocation2 + $0xf]] }
 0x172   :  { %1290 = vrot.lane.b32.xlu0 %v1286_v28, %s2816_s8  ;;  %v1323_v12 = vmul.f32 %v3311_v49, %v1321_v43 }
 0x173   :  { %v3433_v59 = vpop.permute.xlu1 %952 }
 0x174   :  { %4987 = vst [vmem:[#allocation85_spill] sm:$0xff] %v3433_v59  ;;  %v3435_v23 = vpop.permute.xlu0 %950 }
 0x175   :  { %4988 = vst [vmem:[#allocation86_spill] sm:$0xff] %v3435_v23  ;;  %1304 = vrot.lane.b32.xlu1 %v1299_v22, %s2816_s8  ;;  %v1322_v22 = vmul.f32 %v3318_v0, %v1321_v43  ;;  %v1333_v23 = vstv %s2718_s12  ;;  %s2578_s12 = sld [smem:[#allocation2 + $0x8f]] }
 0x176   :  { %1302 = vrot.lane.b32.xlu0 %v1298_v60, %s2816_s8  ;;  %v1335_v44 = vmul.f32 %v3311_v49, %v1333_v23 }
 0x177   :  { %v3441_v1 = vpop.permute.xlu1 %964 }
 0x178   :  { %4989 = vst [vmem:[#allocation87_spill] sm:$0xff] %v3441_v1  ;;  %v3443_v28 = vpop.permute.xlu0 %962 }
 0x179   :  { %4990 = vst [vmem:[#allocation88_spill] sm:$0xff] %v3443_v28  ;;  %1316 = vrot.lane.b32.xlu1 %v1311_v7, %s2816_s8  ;;  %v1334_v7 = vmul.f32 %v3318_v0, %v1333_v23  ;;  %v1345_v28 = vstv %s2551_s13  ;;  %s2602_s13 = sld [smem:[#allocation2 + $0x10f]] }
 0x17a   :  { %1314 = vrot.lane.b32.xlu0 %v1310_v13, %s2816_s8  ;;  %v1347_v43 = vmul.f32 %v3311_v49, %v1345_v28 }
 0x17b   :  { %v3449_v59 = vpop.permute.xlu1 %977 }
 0x17c   :  { %4991 = vst [vmem:[#allocation89_spill] sm:$0xff] %v3449_v59  ;;  %v3451_v60 = vpop.permute.xlu0 %975 }
 0x17d   :  { %4992 = vst [vmem:[#allocation90_spill] sm:$0xff] %v3451_v60  ;;  %1328 = vrot.lane.b32.xlu1 %v1323_v12, %s2816_s8  ;;  %v1346_v12 = vmul.f32 %v3318_v0, %v1345_v28  ;;  %v1358_v60 = vstv %s2575_s14  ;;  %s2626_s14 = sld [smem:[#allocation2 + $0x18f]] }
 0x17e   :  { %1326 = vrot.lane.b32.xlu0 %v1322_v22, %s2816_s8  ;;  %v1360_v23 = vmul.f32 %v3311_v49, %v1358_v60 }
 0x17f   :  { %v3457_v1 = vpop.permute.xlu1 %989 }
 0x180   :  { %4993 = vst [vmem:[#allocation91_spill] sm:$0xff] %v3457_v1  ;;  %v3459_v13 = vpop.permute.xlu0 %987 }
 0x181   :  { %4994 = vst [vmem:[#allocation92_spill] sm:$0xff] %v3459_v13  ;;  %1340 = vrot.lane.b32.xlu1 %v1335_v44, %s2816_s8  ;;  %v1359_v44 = vmul.f32 %v3318_v0, %v1358_v60  ;;  %v1370_v13 = vstv %s2599_s15  ;;  %s2820_s15 = smov 113  }
 0x182   :  { %1338 = vrot.lane.b32.xlu0 %v1334_v7, %s2816_s8  ;;  %s2673_s8 = sld [smem:[#allocation2 + $0x28e]] }
 0x183   :  { %v3465_v59 = vpop.permute.xlu1 %1001 }
 0x184   :  { %4995 = vst [vmem:[#allocation93_spill] sm:$0xff] %v3465_v59  ;;  %v3467_v22 = vpop.permute.xlu0 %999  ;;  %v1372_v59 = vmul.f32 %v3311_v49, %v1370_v13 }
 0x185   :  { %4996 = vst [vmem:[#allocation94_spill] sm:$0xff] %v3467_v22  ;;  %1352 = vrot.lane.b32.xlu1 %v1347_v43, %s2817_s17  ;;  %v1371_v43 = vmul.f32 %v3318_v0, %v1370_v13  ;;  %v1382_v22 = vstv %s2623_s16  ;;  %s2650_s16 = sld [smem:[#allocation2 + $0x20f]] }
 0x186   :  { %1350 = vrot.lane.b32.xlu0 %v1346_v12, %s2817_s17  ;;  %v1384_v60 = vmul.f32 %v3311_v49, %v1382_v22 }
 0x187   :  { %v3473_v7 = vpop.permute.xlu1 %1013 }
 0x188   :  { %4997 = vst [vmem:[#allocation95_spill] sm:$0xff] %v3473_v7  ;;  %v3475_v28 = vpop.permute.xlu0 %1011 }
 0x189   :  { %4998 = vst [vmem:[#allocation96_spill] sm:$0xff] %v3475_v28  ;;  %1365 = vrot.lane.b32.xlu1 %v1360_v23, %s2817_s17  ;;  %v1383_v23 = vmul.f32 %v3318_v0, %v1382_v22  ;;  %v1394_v28 = vstv %s2647_s18  ;;  %s2698_s18 = sld [smem:[#allocation2 + $0x30f]] }
 0x18a   :  { %1363 = vrot.lane.b32.xlu0 %v1359_v44, %s2817_s17  ;;  %v1396_v13 = vmul.f32 %v3311_v49, %v1394_v28 }
 0x18b   :  { %v3481_v1 = vpop.permute.xlu1 %1025 }
 0x18c   :  { %4999 = vst [vmem:[#allocation97_spill] sm:$0xff] %v3481_v1  ;;  %v3483_v12 = vpop.permute.xlu0 %1023 }
 0x18d   :  { %5000 = vst [vmem:[#allocation98_spill] sm:$0xff] %v3483_v12  ;;  %1377 = vrot.lane.b32.xlu1 %v1372_v59, %s2817_s17  ;;  %v1395_v59 = vmul.f32 %v3318_v0, %v1394_v28  ;;  %v1406_v12 = vstv %s2671_s19  ;;  %s2722_s19 = sld [smem:[#allocation2 + $0x38f]] }
 0x18e   :  { %1375 = vrot.lane.b32.xlu0 %v1371_v43, %s2817_s17  ;;  %v1408_v22 = vmul.f32 %v3311_v49, %v1406_v12 }
 0x18f   :  { %v3489_v7 = vpop.permute.xlu1 %1037 }
 0x190   :  { %5001 = vst [vmem:[#allocation99_spill] sm:$0xff] %v3489_v7  ;;  %v3491_v44 = vpop.permute.xlu0 %1035 }
 0x191   :  { %5002 = vst [vmem:[#allocation100_spill] sm:$0xff] %v3491_v44  ;;  %1389 = vrot.lane.b32.xlu1 %v1384_v60, %s2817_s17  ;;  %v1407_v60 = vmul.f32 %v3318_v0, %v1406_v12  ;;  %v1418_v44 = vstv %s2695_s20  ;;  %s2555_s20 = sld [smem:[#allocation2 + $0x10]] }
 0x192   :  { %1387 = vrot.lane.b32.xlu0 %v1383_v23, %s2817_s17  ;;  %v1420_v28 = vmul.f32 %v3311_v49, %v1418_v44 }
 0x193   :  { %v3497_v1 = vpop.permute.xlu1 %1049 }
 0x194   :  { %5003 = vst [vmem:[#allocation101_spill] sm:$0xff] %v3497_v1  ;;  %v3499_v43 = vpop.permute.xlu0 %1047 }
 0x195   :  { %5004 = vst [vmem:[#allocation102_spill] sm:$0xff] %v3499_v43  ;;  %1401 = vrot.lane.b32.xlu1 %v1396_v13, %s2817_s17  ;;  %v1419_v13 = vmul.f32 %v3318_v0, %v1418_v44  ;;  %v1430_v43 = vstv %s2719_s1  ;;  %s2579_s1 = sld [smem:[#allocation2 + $0x90]] }
 0x196   :  { %1399 = vrot.lane.b32.xlu0 %v1395_v59, %s2817_s17  ;;  %v1432_v12 = vmul.f32 %v3311_v49, %v1430_v43 }
 0x197   :  { %v3505_v7 = vpop.permute.xlu1 %1061 }
 0x198   :  { %5005 = vst [vmem:[#allocation103_spill] sm:$0xff] %v3505_v7  ;;  %v3507_v23 = vpop.permute.xlu0 %1059 }
 0x199   :  { %5006 = vst [vmem:[#allocation104_spill] sm:$0xff] %v3507_v23  ;;  %1413 = vrot.lane.b32.xlu1 %v1408_v22, %s2817_s17  ;;  %v1431_v22 = vmul.f32 %v3318_v0, %v1430_v43  ;;  %v1442_v23 = vstv %s2552_s2  ;;  %s2603_s2 = sld [smem:[#allocation2 + $0x110]] }
 0x19a   :  { %1411 = vrot.lane.b32.xlu0 %v1407_v60, %s2817_s17  ;;  %v1444_v44 = vmul.f32 %v3311_v49, %v1442_v23 }
 0x19b   :  { %v3513_v1 = vpop.permute.xlu1 %1074 }
 0x19c   :  { %5007 = vst [vmem:[#allocation105_spill] sm:$0xff] %v3513_v1  ;;  %v3515_v59 = vpop.permute.xlu0 %1072 }
 0x19d   :  { %5008 = vst [vmem:[#allocation106_spill] sm:$0xff] %v3515_v59  ;;  %1425 = vrot.lane.b32.xlu1 %v1420_v28, %s2817_s17  ;;  %v1443_v28 = vmul.f32 %v3318_v0, %v1442_v23  ;;  %v1455_v59 = vstv %s2576_s21  ;;  %s2627_s21 = sld [smem:[#allocation2 + $0x190]] }
 0x19e   :  { %1423 = vrot.lane.b32.xlu0 %v1419_v13, %s2817_s17  ;;  %v1457_v43 = vmul.f32 %v3311_v49, %v1455_v59 }
 0x19f   :  { %v3521_v7 = vpop.permute.xlu1 %1086 }
 0x1a0   :  { %5009 = vst [vmem:[#allocation107_spill] sm:$0xff] %v3521_v7  ;;  %v3523_v60 = vpop.permute.xlu0 %1084 }
 0x1a1   :  { %5010 = vst [vmem:[#allocation108_spill] sm:$0xff] %v3523_v60  ;;  %1437 = vrot.lane.b32.xlu1 %v1432_v12, %s2817_s17  ;;  %v1456_v12 = vmul.f32 %v3318_v0, %v1455_v59  ;;  %v1467_v60 = vstv %s2600_s22  ;;  %s2821_s22 = smov 112  }
 0x1a2   :  { %1435 = vrot.lane.b32.xlu0 %v1431_v22, %s2817_s17  ;;  %s2674_s17 = sld [smem:[#allocation2 + $0x28f]] }
 0x1a3   :  { %v3529_v1 = vpop.permute.xlu1 %1098 }
 0x1a4   :  { %5011 = vst [vmem:[#allocation109_spill] sm:$0xff] %v3529_v1  ;;  %v3531_v13 = vpop.permute.xlu0 %1096  ;;  %v1469_v1 = vmul.f32 %v3311_v49, %v1467_v60 }
 0x1a5   :  { %5012 = vst [vmem:[#allocation110_spill] sm:$0xff] %v3531_v13  ;;  %1449 = vrot.lane.b32.xlu1 %v1444_v44, %s2818_s24  ;;  %v1468_v44 = vmul.f32 %v3318_v0, %v1467_v60  ;;  %v1479_v13 = vstv %s2624_s23  ;;  %s2651_s23 = sld [smem:[#allocation2 + $0x210]] }
 0x1a6   :  { %1447 = vrot.lane.b32.xlu0 %v1443_v28, %s2818_s24  ;;  %v1481_v59 = vmul.f32 %v3311_v49, %v1479_v13 }
 0x1a7   :  { %v3537_v22 = vpop.permute.xlu1 %1110 }
 0x1a8   :  { %5013 = vst [vmem:[#allocation111_spill] sm:$0xff] %v3537_v22  ;;  %v3539_v23 = vpop.permute.xlu0 %1108 }
 0x1a9   :  { %5014 = vst [vmem:[#allocation112_spill] sm:$0xff] %v3539_v23  ;;  %1462 = vrot.lane.b32.xlu1 %v1457_v43, %s2818_s24  ;;  %v1480_v43 = vmul.f32 %v3318_v0, %v1479_v13  ;;  %v1491_v23 = vstv %s2648_s25  ;;  %s2699_s25 = sld [smem:[#allocation2 + $0x310]] }
 0x1aa   :  { %1460 = vrot.lane.b32.xlu0 %v1456_v12, %s2818_s24  ;;  %v1493_v60 = vmul.f32 %v3311_v49, %v1491_v23 }
 0x1ab   :  { %v3545_v7 = vpop.permute.xlu1 %1122 }
 0x1ac   :  { %5015 = vst [vmem:[#allocation113_spill] sm:$0xff] %v3545_v7  ;;  %v3547_v28 = vpop.permute.xlu0 %1120 }
 0x1ad   :  { %5016 = vst [vmem:[#allocation114_spill] sm:$0xff] %v3547_v28  ;;  %1474 = vrot.lane.b32.xlu1 %v1469_v1, %s2818_s24  ;;  %v1492_v1 = vmul.f32 %v3318_v0, %v1491_v23  ;;  %v1503_v28 = vstv %s2672_s26  ;;  %s2723_s26 = sld [smem:[#allocation2 + $0x390]] }
 0x1ae   :  { %1472 = vrot.lane.b32.xlu0 %v1468_v44, %s2818_s24  ;;  %v1505_v13 = vmul.f32 %v3311_v49, %v1503_v28 }
 0x1af   :  { %v3553_v22 = vpop.permute.xlu1 %1134 }
 0x1b0   :  { %5017 = vst [vmem:[#allocation115_spill] sm:$0xff] %v3553_v22  ;;  %v3555_v12 = vpop.permute.xlu0 %1132 }
 0x1b1   :  { %5018 = vst [vmem:[#allocation116_spill] sm:$0xff] %v3555_v12  ;;  %1486 = vrot.lane.b32.xlu1 %v1481_v59, %s2818_s24  ;;  %v1504_v59 = vmul.f32 %v3318_v0, %v1503_v28  ;;  %v1515_v12 = vstv %s2696_s27  ;;  %s2556_s27 = sld [smem:[#allocation2 + $0x11]] }
 0x1b2   :  { %1484 = vrot.lane.b32.xlu0 %v1480_v43, %s2818_s24  ;;  %v1517_v23 = vmul.f32 %v3311_v49, %v1515_v12 }
 0x1b3   :  { %v3561_v7 = vpop.permute.xlu1 %1146 }
 0x1b4   :  { %5019 = vst [vmem:[#allocation117_spill] sm:$0xff] %v3561_v7  ;;  %v3563_v44 = vpop.permute.xlu0 %1144 }
 0x1b5   :  { %5020 = vst [vmem:[#allocation118_spill] sm:$0xff] %v3563_v44  ;;  %1498 = vrot.lane.b32.xlu1 %v1493_v60, %s2818_s24  ;;  %v1516_v60 = vmul.f32 %v3318_v0, %v1515_v12  ;;  %v1527_v44 = vstv %s2720_s28  ;;  %s2580_s28 = sld [smem:[#allocation2 + $0x91]] }
 0x1b6   :  { %1496 = vrot.lane.b32.xlu0 %v1492_v1, %s2818_s24  ;;  %v1529_v28 = vmul.f32 %v3311_v49, %v1527_v44 }
 0x1b7   :  { %v3569_v22 = vpop.permute.xlu1 %1158 }
 0x1b8   :  { %5021 = vst [vmem:[#allocation119_spill] sm:$0xff] %v3569_v22  ;;  %v3571_v43 = vpop.permute.xlu0 %1156 }
 0x1b9   :  { %5022 = vst [vmem:[#allocation120_spill] sm:$0xff] %v3571_v43  ;;  %1510 = vrot.lane.b32.xlu1 %v1505_v13, %s2818_s24  ;;  %v1528_v13 = vmul.f32 %v3318_v0, %v1527_v44  ;;  %v1539_v43 = vstv %s2553_s29  ;;  %s2604_s29 = sld [smem:[#allocation2 + $0x111]] }
 0x1ba   :  { %1508 = vrot.lane.b32.xlu0 %v1504_v59, %s2818_s24  ;;  %v1541_v12 = vmul.f32 %v3311_v49, %v1539_v43 }
 0x1bb   :  { %v3577_v7 = vpop.permute.xlu1 %1171 }
 0x1bc   :  { %5023 = vst [vmem:[#allocation121_spill] sm:$0xff] %v3577_v7  ;;  %v3579_v1 = vpop.permute.xlu0 %1169 }
 0x1bd   :  { %5024 = vst [vmem:[#allocation122_spill] sm:$0xff] %v3579_v1  ;;  %1522 = vrot.lane.b32.xlu1 %v1517_v23, %s2818_s24  ;;  %v1540_v23 = vmul.f32 %v3318_v0, %v1539_v43  ;;  %v1552_v1 = vstv %s2577_s30  ;;  %s2628_s30 = sld [smem:[#allocation2 + $0x191]] }
 0x1be   :  { %1520 = vrot.lane.b32.xlu0 %v1516_v60, %s2818_s24  ;;  %v1554_v44 = vmul.f32 %v3311_v49, %v1552_v1 }
 0x1bf   :  { %v3585_v22 = vpop.permute.xlu1 %1183 }
 0x1c0   :  { %5025 = vst [vmem:[#allocation123_spill] sm:$0xff] %v3585_v22  ;;  %v3587_v59 = vpop.permute.xlu0 %1181 }
 0x1c1   :  { %5026 = vst [vmem:[#allocation124_spill] sm:$0xff] %v3587_v59  ;;  %1534 = vrot.lane.b32.xlu1 %v1529_v28, %s2818_s24  ;;  %v1553_v28 = vmul.f32 %v3318_v0, %v1552_v1  ;;  %v1564_v59 = vstv %s2601_s4  ;;  %s2822_s4 = smov 111  }
 0x1c2   :  { %1532 = vrot.lane.b32.xlu0 %v1528_v13, %s2818_s24  ;;  %s2675_s24 = sld [smem:[#allocation2 + $0x290]] }
 0x1c3   :  { %v3593_v7 = vpop.permute.xlu1 %1195 }
 0x1c4   :  { %5027 = vst [vmem:[#allocation125_spill] sm:$0xff] %v3593_v7  ;;  %v3595_v60 = vpop.permute.xlu0 %1193  ;;  %v1566_v7 = vmul.f32 %v3311_v49, %v1564_v59 }
 0x1c5   :  { %5028 = vst [vmem:[#allocation126_spill] sm:$0xff] %v3595_v60  ;;  %1546 = vrot.lane.b32.xlu1 %v1541_v12, %s2819_s6  ;;  %v1565_v12 = vmul.f32 %v3318_v0, %v1564_v59  ;;  %v1576_v60 = vstv %s2625_s5  ;;  %s2652_s5 = sld [smem:[#allocation2 + $0x211]] }
 0x1c6   :  { %1544 = vrot.lane.b32.xlu0 %v1540_v23, %s2819_s6  ;;  %v1578_v1 = vmul.f32 %v3311_v49, %v1576_v60 }
 0x1c7   :  { %v3601_v13 = vpop.permute.xlu1 %1207 }
 0x1c8   :  { %5029 = vst [vmem:[#allocation127_spill] sm:$0xff] %v3601_v13  ;;  %v3603_v43 = vpop.permute.xlu0 %1205 }
 0x1c9   :  { %5030 = vst [vmem:[#allocation128_spill] sm:$0xff] %v3603_v43  ;;  %1559 = vrot.lane.b32.xlu1 %v1554_v44, %s2819_s6  ;;  %v1577_v44 = vmul.f32 %v3318_v0, %v1576_v60  ;;  %v1588_v43 = vstv %s2649_s7  ;;  %s2700_s7 = sld [smem:[#allocation2 + $0x311]] }
 0x1ca   :  { %1557 = vrot.lane.b32.xlu0 %v1553_v28, %s2819_s6  ;;  %v1590_v59 = vmul.f32 %v3311_v49, %v1588_v43 }
 0x1cb   :  { %v3609_v22 = vpop.permute.xlu1 %1219 }
 0x1cc   :  { %5031 = vst [vmem:[#allocation129_spill] sm:$0xff] %v3609_v22  ;;  %v3611_v23 = vpop.permute.xlu0 %1217 }
 0x1cd   :  { %5032 = vst [vmem:[#allocation130_spill] sm:$0xff] %v3611_v23  ;;  %1571 = vrot.lane.b32.xlu1 %v1566_v7, %s2819_s6  ;;  %v1589_v7 = vmul.f32 %v3318_v0, %v1588_v43  ;;  %v1600_v23 = vstv %s2673_s8  ;;  %s2724_s8 = sld [smem:[#allocation2 + $0x391]] }
 0x1ce   :  { %1569 = vrot.lane.b32.xlu0 %v1565_v12, %s2819_s6  ;;  %v1602_v60 = vmul.f32 %v3311_v49, %v1600_v23 }
 0x1cf   :  { %v3617_v13 = vpop.permute.xlu1 %1231 }
 0x1d0   :  { %5033 = vst [vmem:[#allocation131_spill] sm:$0xff] %v3617_v13  ;;  %v3619_v28 = vpop.permute.xlu0 %1229 }
 0x1d1   :  { %5034 = vst [vmem:[#allocation132_spill] sm:$0xff] %v3619_v28  ;;  %1583 = vrot.lane.b32.xlu1 %v1578_v1, %s2819_s6  ;;  %v1601_v1 = vmul.f32 %v3318_v0, %v1600_v23  ;;  %v1612_v28 = vstv %s2697_s9  ;;  %s3982_s9 = sld [smem:[#allocation2 + $0x180]] }
 0x1d2   :  { %1581 = vrot.lane.b32.xlu0 %v1577_v44, %s2819_s6  ;;  %v1614_v43 = vmul.f32 %v3311_v49, %v1612_v28 }
 0x1d3   :  { %v3625_v22 = vpop.permute.xlu1 %1243 }
 0x1d4   :  { %5035 = vst [vmem:[#allocation133_spill] sm:$0xff] %v3625_v22  ;;  %v3627_v12 = vpop.permute.xlu0 %1241 }
 0x1d5   :  { %5036 = vst [vmem:[#allocation134_spill] sm:$0xff] %v3627_v12  ;;  %1595 = vrot.lane.b32.xlu1 %v1590_v59, %s2819_s6  ;;  %v1613_v59 = vmul.f32 %v3318_v0, %v1612_v28  ;;  %v1624_v12 = vstv %s2721_s10  ;;  %s3986_s10 = sld [smem:[#allocation4 + $0x3]] }
 0x1d6   :  { %1593 = vrot.lane.b32.xlu0 %v1589_v7, %s2819_s6  ;;  %v1626_v23 = vmul.f32 %v3311_v49, %v1624_v12 }
 0x1d7   :  { %v3633_v13 = vpop.permute.xlu1 %1255 }
 0x1d8   :  { %5037 = vst [vmem:[#allocation135_spill] sm:$0xff] %v3633_v13  ;;  %v3635_v44 = vpop.permute.xlu0 %1253 }
 0x1d9   :  { %5038 = vst [vmem:[#allocation136_spill] sm:$0xff] %v3635_v44  ;;  %1607 = vrot.lane.b32.xlu1 %v1602_v60, %s2819_s6  ;;  %v1625_v60 = vmul.f32 %v3318_v0, %v1624_v12  ;;  %v1636_v44 = vstv %s2554_s11  ;;  %s3990_s11 = sld [smem:[#allocation2 + $0x200]] }
 0x1da   :  { %1605 = vrot.lane.b32.xlu0 %v1601_v1, %s2819_s6  ;;  %v1638_v28 = vmul.f32 %v3311_v49, %v1636_v44 }
 0x1db   :  { %v3641_v22 = vpop.permute.xlu1 %1268  ;;  %v249_v53 = vstv %s3986_s10 }
 0x1dc   :  { %5039 = vst [vmem:[#allocation137_spill] sm:$0xff] %v3641_v22  ;;  %v3643_v7 = vpop.permute.xlu0 %1266 }
 0x1dd   :  { %5040 = vst [vmem:[#allocation138_spill] sm:$0xff] %v3643_v7  ;;  %1619 = vrot.lane.b32.xlu1 %v1614_v43, %s2819_s6  ;;  %v1637_v43 = vmul.f32 %v3318_v0, %v1636_v44  ;;  %v1649_v7 = vstv %s2578_s12  ;;  %s3997_s12 = sld [smem:[#allocation2 + $0x94]] }
 0x1de   :  { %1617 = vrot.lane.b32.xlu0 %v1613_v59, %s2819_s6  ;;  %v1651_v12 = vmul.f32 %v3311_v49, %v1649_v7 }
 0x1df   :  { %v3649_v13 = vpop.permute.xlu1 %1280  ;;  %v266_v58 = vstv %s3990_s11 }
 0x1e0   :  { %5041 = vst [vmem:[#allocation139_spill] sm:$0xff] %v3649_v13  ;;  %v3651_v1 = vpop.permute.xlu0 %1278 }
 0x1e1   :  { %5042 = vst [vmem:[#allocation140_spill] sm:$0xff] %v3651_v1  ;;  %1631 = vrot.lane.b32.xlu1 %v1626_v23, %s2819_s6  ;;  %v1650_v23 = vmul.f32 %v3318_v0, %v1649_v7  ;;  %v1661_v1 = vstv %s2602_s13  ;;  %s2557_s13 = sld [smem:[#allocation2 + $0x12]] }
 0x1e2   :  { %1629 = vrot.lane.b32.xlu0 %v1625_v60, %s2819_s6  ;;  %s2676_s6 = sld [smem:[#allocation2 + $0x291]] }
 0x1e3   :  { %v3657_v22 = vpop.permute.xlu1 %1292 }
 0x1e4   :  { %5043 = vst [vmem:[#allocation141_spill] sm:$0xff] %v3657_v22  ;;  %v3659_v59 = vpop.permute.xlu0 %1290  ;;  %v1663_v22 = vmul.f32 %v3311_v49, %v1661_v1 }
 0x1e5   :  { %5044 = vst [vmem:[#allocation142_spill] sm:$0xff] %v3659_v59  ;;  %1643 = vrot.lane.b32.xlu1 %v1638_v28, %s2820_s15  ;;  %v1662_v28 = vmul.f32 %v3318_v0, %v1661_v1  ;;  %v1673_v59 = vstv %s2626_s14  ;;  %s2581_s14 = sld [smem:[#allocation2 + $0x92]] }
 0x1e6   :  { %1641 = vrot.lane.b32.xlu0 %v1637_v43, %s2820_s15  ;;  %v1675_v7 = vmul.f32 %v3311_v49, %v1673_v59 }
 0x1e7   :  { %v3665_v60 = vpop.permute.xlu1 %1304 }
 0x1e8   :  { %5045 = vst [vmem:[#allocation143_spill] sm:$0xff] %v3665_v60  ;;  %v3667_v44 = vpop.permute.xlu0 %1302 }
 0x1e9   :  { %5046 = vst [vmem:[#allocation144_spill] sm:$0xff] %v3667_v44  ;;  %1656 = vrot.lane.b32.xlu1 %v1651_v12, %s2820_s15  ;;  %v1674_v12 = vmul.f32 %v3318_v0, %v1673_v59  ;;  %v1685_v44 = vstv %s2650_s16  ;;  %s2629_s16 = sld [smem:[#allocation2 + $0x192]] }
 0x1ea   :  { %1654 = vrot.lane.b32.xlu0 %v1650_v23, %s2820_s15  ;;  %v1687_v1 = vmul.f32 %v3311_v49, %v1685_v44 }
 0x1eb   :  { %v3673_v13 = vpop.permute.xlu1 %1316 }
 0x1ec   :  { %5047 = vst [vmem:[#allocation145_spill] sm:$0xff] %v3673_v13  ;;  %v3675_v43 = vpop.permute.xlu0 %1314 }
 0x1ed   :  { %5048 = vst [vmem:[#allocation146_spill] sm:$0xff] %v3675_v43  ;;  %1668 = vrot.lane.b32.xlu1 %v1663_v22, %s2820_s15  ;;  %v1686_v22 = vmul.f32 %v3318_v0, %v1685_v44  ;;  %v1697_v43 = vstv %s2674_s17  ;;  %s2823_s17 = smov 110  }
 0x1ee   :  { %1666 = vrot.lane.b32.xlu0 %v1662_v28, %s2820_s15  ;;  %v1699_v59 = vmul.f32 %v3311_v49, %v1697_v43 }
 0x1ef   :  { %v3681_v60 = vpop.permute.xlu1 %1328 }
 0x1f0   :  { %5049 = vst [vmem:[#allocation147_spill] sm:$0xff] %v3681_v60  ;;  %v3683_v23 = vpop.permute.xlu0 %1326 }
 0x1f1   :  { %5050 = vst [vmem:[#allocation148_spill] sm:$0xff] %v3683_v23  ;;  %1680 = vrot.lane.b32.xlu1 %v1675_v7, %s2820_s15  ;;  %v1698_v7 = vmul.f32 %v3318_v0, %v1697_v43  ;;  %v1709_v23 = vstv %s2698_s18  ;;  %s2653_s18 = sld [smem:[#allocation2 + $0x212]] }
 0x1f2   :  { %1678 = vrot.lane.b32.xlu0 %v1674_v12, %s2820_s15  ;;  %v1711_v44 = vmul.f32 %v3311_v49, %v1709_v23 }
 0x1f3   :  { %v3689_v13 = vpop.permute.xlu1 %1340 }
 0x1f4   :  { %5051 = vst [vmem:[#allocation149_spill] sm:$0xff] %v3689_v13  ;;  %v3691_v28 = vpop.permute.xlu0 %1338 }
 0x1f5   :  { %5052 = vst [vmem:[#allocation150_spill] sm:$0xff] %v3691_v28  ;;  %1692 = vrot.lane.b32.xlu1 %v1687_v1, %s2820_s15  ;;  %v1710_v1 = vmul.f32 %v3318_v0, %v1709_v23  ;;  %v1721_v28 = vstv %s2722_s19  ;;  %s2677_s19 = sld [smem:[#allocation2 + $0x292]] }
 0x1f6   :  { %1690 = vrot.lane.b32.xlu0 %v1686_v22, %s2820_s15  ;;  %v1723_v43 = vmul.f32 %v3311_v49, %v1721_v28 }
 0x1f7   :  { %v3697_v60 = vpop.permute.xlu1 %1352 }
 0x1f8   :  { %5053 = vst [vmem:[#allocation151_spill] sm:$0xff] %v3697_v60  ;;  %v3699_v12 = vpop.permute.xlu0 %1350 }
 0x1f9   :  { %5054 = vst [vmem:[#allocation152_spill] sm:$0xff] %v3699_v12  ;;  %1704 = vrot.lane.b32.xlu1 %v1699_v59, %s2820_s15  ;;  %v1722_v59 = vmul.f32 %v3318_v0, %v1721_v28  ;;  %v1733_v12 = vstv %s2555_s20  ;;  %s2701_s20 = sld [smem:[#allocation2 + $0x312]] }
 0x1fa   :  { %1702 = vrot.lane.b32.xlu0 %v1698_v7, %s2820_s15  ;;  %v1735_v23 = vmul.f32 %v3311_v49, %v1733_v12 }
 0x1fb   :  { %v3705_v13 = vpop.permute.xlu1 %1365 }
 0x1fc   :  { %5055 = vst [vmem:[#allocation153_spill] sm:$0xff] %v3705_v13  ;;  %v3707_v22 = vpop.permute.xlu0 %1363 }
 0x1fd   :  { %5056 = vst [vmem:[#allocation154_spill] sm:$0xff] %v3707_v22  ;;  %1716 = vrot.lane.b32.xlu1 %v1711_v44, %s2820_s15  ;;  %v1734_v44 = vmul.f32 %v3318_v0, %v1733_v12  ;;  %v1746_v22 = vstv %s2579_s1  ;;  %s2725_s1 = sld [smem:[#allocation2 + $0x392]] }
 0x1fe   :  { %1714 = vrot.lane.b32.xlu0 %v1710_v1, %s2820_s15  ;;  %v1748_v28 = vmul.f32 %v3311_v49, %v1746_v22 }
 0x1ff   :  { %v3713_v60 = vpop.permute.xlu1 %1377 }
 0x200   :  { %5057 = vst [vmem:[#allocation155_spill] sm:$0xff] %v3713_v60  ;;  %v3715_v7 = vpop.permute.xlu0 %1375 }
 0x201   :  { %5058 = vst [vmem:[#allocation156_spill] sm:$0xff] %v3715_v7  ;;  %1728 = vrot.lane.b32.xlu1 %v1723_v43, %s2820_s15  ;;  %v1747_v43 = vmul.f32 %v3318_v0, %v1746_v22  ;;  %v1758_v7 = vstv %s2603_s2  ;;  %s2558_s2 = sld [smem:[#allocation2 + $0x13]] }
 0x202   :  { %1726 = vrot.lane.b32.xlu0 %v1722_v59, %s2820_s15  ;;  %s2605_s15 = sld [smem:[#allocation2 + $0x112]] }
 0x203   :  { %v3721_v13 = vpop.permute.xlu1 %1389 }
 0x204   :  { %5059 = vst [vmem:[#allocation157_spill] sm:$0xff] %v3721_v13  ;;  %v3723_v1 = vpop.permute.xlu0 %1387  ;;  %v1760_v13 = vmul.f32 %v3311_v49, %v1758_v7 }
 0x205   :  { %5060 = vst [vmem:[#allocation158_spill] sm:$0xff] %v3723_v1  ;;  %1740 = vrot.lane.b32.xlu1 %v1735_v23, %s2821_s22  ;;  %v1759_v23 = vmul.f32 %v3318_v0, %v1758_v7  ;;  %v1770_v1 = vstv %s2627_s21  ;;  %s2582_s21 = sld [smem:[#allocation2 + $0x93]] }
 0x206   :  { %1738 = vrot.lane.b32.xlu0 %v1734_v44, %s2821_s22  ;;  %v1772_v22 = vmul.f32 %v3311_v49, %v1770_v1 }
 0x207   :  { %v3729_v59 = vpop.permute.xlu1 %1401 }
 0x208   :  { %5061 = vst [vmem:[#allocation159_spill] sm:$0xff] %v3729_v59  ;;  %v3731_v12 = vpop.permute.xlu0 %1399 }
 0x209   :  { %5062 = vst [vmem:[#allocation160_spill] sm:$0xff] %v3731_v12  ;;  %1753 = vrot.lane.b32.xlu1 %v1748_v28, %s2821_s22  ;;  %v1771_v28 = vmul.f32 %v3318_v0, %v1770_v1  ;;  %v1782_v12 = vstv %s2651_s23  ;;  %s2630_s23 = sld [smem:[#allocation2 + $0x193]] }
 0x20a   :  { %1751 = vrot.lane.b32.xlu0 %v1747_v43, %s2821_s22  ;;  %v1784_v7 = vmul.f32 %v3311_v49, %v1782_v12 }
 0x20b   :  { %v3737_v60 = vpop.permute.xlu1 %1413 }
 0x20c   :  { %5063 = vst [vmem:[#allocation161_spill] sm:$0xff] %v3737_v60  ;;  %v3739_v44 = vpop.permute.xlu0 %1411 }
 0x20d   :  { %5064 = vst [vmem:[#allocation162_spill] sm:$0xff] %v3739_v44  ;;  %1765 = vrot.lane.b32.xlu1 %v1760_v13, %s2821_s22  ;;  %v1783_v13 = vmul.f32 %v3318_v0, %v1782_v12  ;;  %v1794_v44 = vstv %s2675_s24  ;;  %s2824_s24 = smov 109  }
 0x20e   :  { %1763 = vrot.lane.b32.xlu0 %v1759_v23, %s2821_s22  ;;  %v1796_v1 = vmul.f32 %v3311_v49, %v1794_v44 }
 0x20f   :  { %v3745_v59 = vpop.permute.xlu1 %1425 }
 0x210   :  { %5065 = vst [vmem:[#allocation163_spill] sm:$0xff] %v3745_v59  ;;  %v3747_v43 = vpop.permute.xlu0 %1423 }
 0x211   :  { %5066 = vst [vmem:[#allocation164_spill] sm:$0xff] %v3747_v43  ;;  %1777 = vrot.lane.b32.xlu1 %v1772_v22, %s2821_s22  ;;  %v1795_v22 = vmul.f32 %v3318_v0, %v1794_v44  ;;  %v1806_v43 = vstv %s2699_s25  ;;  %s2654_s25 = sld [smem:[#allocation2 + $0x213]] }
 0x212   :  { %1775 = vrot.lane.b32.xlu0 %v1771_v28, %s2821_s22  ;;  %v1808_v12 = vmul.f32 %v3311_v49, %v1806_v43 }
 0x213   :  { %v3753_v60 = vpop.permute.xlu1 %1437 }
 0x214   :  { %5067 = vst [vmem:[#allocation165_spill] sm:$0xff] %v3753_v60  ;;  %v3755_v23 = vpop.permute.xlu0 %1435 }
 0x215   :  { %5068 = vst [vmem:[#allocation166_spill] sm:$0xff] %v3755_v23  ;;  %1789 = vrot.lane.b32.xlu1 %v1784_v7, %s2821_s22  ;;  %v1807_v7 = vmul.f32 %v3318_v0, %v1806_v43  ;;  %v1818_v23 = vstv %s2723_s26  ;;  %s2678_s26 = sld [smem:[#allocation2 + $0x293]] }
 0x216   :  { %1787 = vrot.lane.b32.xlu0 %v1783_v13, %s2821_s22  ;;  %v1820_v44 = vmul.f32 %v3311_v49, %v1818_v23 }
 0x217   :  { %v3761_v59 = vpop.permute.xlu1 %1449 }
 0x218   :  { %5069 = vst [vmem:[#allocation167_spill] sm:$0xff] %v3761_v59  ;;  %v3763_v28 = vpop.permute.xlu0 %1447 }
 0x219   :  { %5070 = vst [vmem:[#allocation168_spill] sm:$0xff] %v3763_v28  ;;  %1801 = vrot.lane.b32.xlu1 %v1796_v1, %s2821_s22  ;;  %v1819_v1 = vmul.f32 %v3318_v0, %v1818_v23  ;;  %v1830_v28 = vstv %s2556_s27  ;;  %s3947_s27 = sld [smem:[#allocation2 + $0x313]] }
 0x21a   :  { %1799 = vrot.lane.b32.xlu0 %v1795_v22, %s2821_s22  ;;  %v1832_v43 = vmul.f32 %v3311_v49, %v1830_v28 }
 0x21b   :  { %v3769_v60 = vpop.permute.xlu1 %1462 }
 0x21c   :  { %5071 = vst [vmem:[#allocation169_spill] sm:$0xff] %v3769_v60  ;;  %v3771_v13 = vpop.permute.xlu0 %1460 }
 0x21d   :  { %5072 = vst [vmem:[#allocation170_spill] sm:$0xff] %v3771_v13  ;;  %1813 = vrot.lane.b32.xlu1 %v1808_v12, %s2821_s22  ;;  %v1831_v12 = vmul.f32 %v3318_v0, %v1830_v28  ;;  %v1843_v13 = vstv %s2580_s28  ;;  %s3949_s28 = sld [smem:[#allocation4 + $0x1]] }
 0x21e   :  { %1811 = vrot.lane.b32.xlu0 %v1807_v7, %s2821_s22  ;;  %v1845_v23 = vmul.f32 %v3311_v49, %v1843_v13 }
 0x21f   :  { %v3777_v59 = vpop.permute.xlu1 %1474 }
 0x220   :  { %5073 = vst [vmem:[#allocation171_spill] sm:$0xff] %v3777_v59  ;;  %v3779_v22 = vpop.permute.xlu0 %1472 }
 0x221   :  { %5074 = vst [vmem:[#allocation172_spill] sm:$0xff] %v3779_v22  ;;  %1825 = vrot.lane.b32.xlu1 %v1820_v44, %s2821_s22  ;;  %v1844_v44 = vmul.f32 %v3318_v0, %v1843_v13  ;;  %v1855_v22 = vstv %s2604_s29  ;;  %s3953_s29 = sld [smem:[#allocation2 + $0x80]] }
 0x222   :  { %1823 = vrot.lane.b32.xlu0 %v1819_v1, %s2821_s22  ;;  %s2606_s22 = sld [smem:[#allocation2 + $0x113]] }
 0x223   :  { %v3785_v60 = vpop.permute.xlu1 %1486 }
 0x224   :  { %5075 = vst [vmem:[#allocation173_spill] sm:$0xff] %v3785_v60  ;;  %v3787_v7 = vpop.permute.xlu0 %1484  ;;  %v1857_v60 = vmul.f32 %v3311_v49, %v1855_v22 }
 0x225   :  { %5076 = vst [vmem:[#allocation174_spill] sm:$0xff] %v3787_v7  ;;  %1837 = vrot.lane.b32.xlu1 %v1832_v43, %s2822_s4  ;;  %v1856_v43 = vmul.f32 %v3318_v0, %v1855_v22  ;;  %v1867_v7 = vstv %s2628_s30  ;;  %s3957_s30 = sld [smem:[#allocation4]] }
 0x226   :  { %1835 = vrot.lane.b32.xlu0 %v1831_v12, %s2822_s4  ;;  %v1869_v13 = vmul.f32 %v3311_v49, %v1867_v7 }
 0x227   :  { %v3793_v1 = vpop.permute.xlu1 %1498 }
 0x228   :  { %5077 = vst [vmem:[#allocation175_spill] sm:$0xff] %v3793_v1  ;;  %v3795_v28 = vpop.permute.xlu0 %1496 }
 0x229   :  { %5078 = vst [vmem:[#allocation176_spill] sm:$0xff] %v3795_v28  ;;  %1850 = vrot.lane.b32.xlu1 %v1845_v23, %s2822_s4  ;;  %v1868_v23 = vmul.f32 %v3318_v0, %v1867_v7  ;;  %v1879_v28 = vstv %s2652_s5  ;;  %v3825_v7 = vld [vmem:[%s4906_s0 + $0x8] sm:$0xff]  ;;  %s3965_s5 = sld [smem:[#allocation2]] }
 0x22a   :  { %1848 = vrot.lane.b32.xlu0 %v1844_v44, %s2822_s4  ;;  %v1881_v22 = vmul.f32 %v3311_v49, %v1879_v28  ;;  %v3832_v49 = vld [vmem:[%s4906_s0] sm:$0xff] }
 0x22b   :  { %v3801_v59 = vpop.permute.xlu1 %1510 }
 0x22c   :  { %5079 = vst [vmem:[#allocation177_spill] sm:$0xff] %v3801_v59  ;;  %v3803_v12 = vpop.permute.xlu0 %1508 }
 0x22d   :  { %5080 = vst [vmem:[#allocation178_spill] sm:$0xff] %v3803_v12  ;;  %1862 = vrot.lane.b32.xlu1 %v1857_v60, %s2822_s4  ;;  %v1880_v60 = vmul.f32 %v3318_v0, %v1879_v28  ;;  %v1891_v12 = vstv %s2676_s6  ;;  %v1903_v28 = vstv %s2700_s7  ;;  %s3969_s6 = sld [smem:[#allocation2 + $0x100]] }
 0x22e   :  { %1860 = vrot.lane.b32.xlu0 %v1856_v43, %s2822_s4  ;;  %v1892_v0 = vmul.f32 %v3832_v49, %v1891_v12  ;;  %s3973_s7 = sld [smem:[#allocation4 + $0x2]] }
 0x22f   :  { %v3809_v1 = vpop.permute.xlu1 %1522 }
 0x230   :  { %5081 = vst [vmem:[#allocation179_spill] sm:$0xff] %v3809_v1  ;;  %v3811_v44 = vpop.permute.xlu0 %1520  ;;  %v1915_v1 = vstv %s2724_s8  ;;  %s3980_s8 = sld [smem:[#allocation2 + $0x14]] }
 0x231   :  { %5082 = vst [vmem:[#allocation180_spill] sm:$0xff] %v3811_v44  ;;  %1874 = vrot.lane.b32.xlu1 %v1869_v13, %s2822_s4  ;;  %v1893_v13 = vmul.f32 %v3825_v7, %v1891_v12  ;;  %v1905_v44 = vmul.f32 %v3825_v7, %v1903_v28  ;;  %v1917_v12 = vmul.f32 %v3825_v7, %v1915_v1 }
 0x232   :  { %1872 = vrot.lane.b32.xlu0 %v1868_v23, %s2822_s4 }
 0x233   :  { %v3817_v59 = vpop.permute.xlu1 %1534 }
 0x234   :  { %5083 = vst [vmem:[#allocation181_spill] sm:$0xff] %v3817_v59  ;;  %v3819_v43 = vpop.permute.xlu0 %1532  ;;  %v248_v6 = vstv %s3973_s7  ;;  %s4400_s7 = sld [smem:[#allocation2 + $0x16]] }
 0x235   :  { %5084 = vst [vmem:[#allocation182_spill] sm:$0xff] %v3819_v43  ;;  %1886 = vrot.lane.b32.xlu1 %v1881_v22, %s2822_s4 }
 0x236   :  { %1884 = vrot.lane.b32.xlu0 %v1880_v60, %s2822_s4  ;;  %v1904_v60 = vmul.f32 %v3832_v49, %v1903_v28 }
 0x237   :  { %v3835_v23 = vpop.permute.xlu1 %1546 }
 0x238   :  { %5085 = vst [vmem:[#allocation183_spill] sm:$0xff] %v3835_v23  ;;  %v3837_v22 = vpop.permute.xlu0 %1544 }
 0x239   :  { %5086 = vst [vmem:[#allocation184_spill] sm:$0xff] %v3837_v22  ;;  %1898 = vrot.lane.b32.xlu1 %v1893_v13, %s2822_s4  ;;  %v1916_v13 = vmul.f32 %v3832_v49, %v1915_v1  ;;  %v1927_v22 = vstv %s2557_s13  ;;  %s3999_s13 = sld [smem:[#allocation4 + $0x4]] }
 0x23a   :  { %1896 = vrot.lane.b32.xlu0 %v1892_v0, %s2822_s4  ;;  %v1929_v28 = vmul.f32 %v3825_v7, %v1927_v22 }
 0x23b   :  { %v3843_v43 = vpop.permute.xlu1 %1559 }
 0x23c   :  { %5087 = vst [vmem:[#allocation185_spill] sm:$0xff] %v3843_v43  ;;  %v3845_v59 = vpop.permute.xlu0 %1557 }
 0x23d   :  { %5088 = vst [vmem:[#allocation186_spill] sm:$0xff] %v3845_v59  ;;  %1910 = vrot.lane.b32.xlu1 %v1905_v44, %s2822_s4  ;;  %v1928_v44 = vmul.f32 %v3832_v49, %v1927_v22  ;;  %v1940_v59 = vstv %s2581_s14  ;;  %s4003_s14 = sld [smem:[#allocation2 + $0x280]] }
 0x23e   :  { %1908 = vrot.lane.b32.xlu0 %v1904_v60, %s2822_s4  ;;  %v1942_v1 = vmul.f32 %v3825_v7, %v1940_v59 }
 0x23f   :  { %v3851_v23 = vpop.permute.xlu1 %1571  ;;  %v250_v35 = vstv %s3999_s13 }
 0x240   :  { %5089 = vst [vmem:[#allocation187_spill] sm:$0xff] %v3851_v23  ;;  %v3853_v0 = vpop.permute.xlu0 %1569 }
 0x241   :  { %5090 = vst [vmem:[#allocation188_spill] sm:$0xff] %v3853_v0  ;;  %1922 = vrot.lane.b32.xlu1 %v1917_v12, %s2822_s4  ;;  %v1941_v12 = vmul.f32 %v3832_v49, %v1940_v59  ;;  %v1952_v0 = vstv %s2605_s15  ;;  %s4007_s15 = sld [smem:[#allocation2 + $0x300]] }
 0x242   :  { %1920 = vrot.lane.b32.xlu0 %v1916_v13, %s2822_s4  ;;  %s3963_s4 = sld [smem:[#allocation2 + $0x393]] }
 0x243   :  { %v3859_v43 = vpop.permute.xlu1 %1583  ;;  %v269_v34 = vstv %s4003_s14  ;;  %s4494_s14 = sld [smem:[#allocation2 + $0x196]] }
 0x244   :  { %5091 = vst [vmem:[#allocation189_spill] sm:$0xff] %v3859_v43  ;;  %v3861_v60 = vpop.permute.xlu0 %1581  ;;  %v1954_v43 = vmul.f32 %v3825_v7, %v1952_v0  ;;  %v270_v27 = vmul.f32 %v3832_v49, %v269_v34 }
 0x245   :  { %5092 = vst [vmem:[#allocation190_spill] sm:$0xff] %v3861_v60  ;;  %1934 = vrot.lane.b32.xlu1 %v1929_v28, %s2823_s17  ;;  %v1953_v28 = vmul.f32 %v3832_v49, %v1952_v0  ;;  %v1964_v60 = vstv %s2629_s16  ;;  %s4014_s16 = sld [smem:[#allocation2 + $0x114]] }
 0x246   :  { %1932 = vrot.lane.b32.xlu0 %v1928_v44, %s2823_s17  ;;  %v1966_v59 = vmul.f32 %v3825_v7, %v1964_v60 }
 0x247   :  { %v3867_v13 = vpop.permute.xlu1 %1595  ;;  %v272_v33 = vstv %s4007_s15  ;;  %s4519_s15 = sld [smem:[#allocation2 + $0x216]] }
 0x248   :  { %5093 = vst [vmem:[#allocation191_spill] sm:$0xff] %v3867_v13  ;;  %v3869_v22 = vpop.permute.xlu0 %1593  ;;  %v273_v26 = vmul.f32 %v3832_v49, %v272_v33 }
 0x249   :  { %5094 = vst [vmem:[#allocation192_spill] sm:$0xff] %v3869_v22  ;;  %1947 = vrot.lane.b32.xlu1 %v1942_v1, %s2823_s17  ;;  %v1965_v1 = vmul.f32 %v3832_v49, %v1964_v60  ;;  %v1976_v22 = vstv %s2653_s18  ;;  %s4020_s18 = sld [smem:[#allocation2 + $0x380]] }
 0x24a   :  { %1945 = vrot.lane.b32.xlu0 %v1941_v12, %s2823_s17  ;;  %v1978_v0 = vmul.f32 %v3825_v7, %v1976_v22 }
 0x24b   :  { %v3875_v23 = vpop.permute.xlu1 %1607  ;;  %v2146_v21 = vstv %s4014_s16  ;;  %s4547_s16 = sld [smem:[#allocation2 + $0x296]] }
 0x24c   :  { %5095 = vst [vmem:[#allocation193_spill] sm:$0xff] %v3875_v23  ;;  %v3877_v44 = vpop.permute.xlu0 %1605 }
 0x24d   :  { %5096 = vst [vmem:[#allocation194_spill] sm:$0xff] %v3877_v44  ;;  %1959 = vrot.lane.b32.xlu1 %v1954_v43, %s2823_s17  ;;  %v1977_v43 = vmul.f32 %v3832_v49, %v1976_v22  ;;  %v1988_v44 = vstv %s2677_s19  ;;  %s4024_s19 = sld [smem:[#allocation4 + $0x6]] }
 0x24e   :  { %1957 = vrot.lane.b32.xlu0 %v1953_v28, %s2823_s17  ;;  %v1990_v60 = vmul.f32 %v3825_v7, %v1988_v44 }
 0x24f   :  { %v3883_v13 = vpop.permute.xlu1 %1619 }
 0x250   :  { %5097 = vst [vmem:[#allocation195_spill] sm:$0xff] %v3883_v13  ;;  %v3885_v12 = vpop.permute.xlu0 %1617 }
 0x251   :  { %5098 = vst [vmem:[#allocation196_spill] sm:$0xff] %v3885_v12  ;;  %1971 = vrot.lane.b32.xlu1 %v1966_v59, %s2823_s17  ;;  %v1989_v59 = vmul.f32 %v3832_v49, %v1988_v44  ;;  %v2000_v12 = vstv %s2701_s20  ;;  %s4032_s20 = sld [smem:[#allocation2 + $0x194]] }
 0x252   :  { %1969 = vrot.lane.b32.xlu0 %v1965_v1, %s2823_s17  ;;  %v2002_v22 = vmul.f32 %v3825_v7, %v2000_v12 }
 0x253   :  { %v3891_v23 = vpop.permute.xlu1 %1631 }
 0x254   :  { %5099 = vst [vmem:[#allocation197_spill] sm:$0xff] %v3891_v23  ;;  %v3893_v28 = vpop.permute.xlu0 %1629 }
 0x255   :  { %5100 = vst [vmem:[#allocation198_spill] sm:$0xff] %v3893_v28  ;;  %1983 = vrot.lane.b32.xlu1 %v1978_v0, %s2823_s17  ;;  %v2001_v0 = vmul.f32 %v3832_v49, %v2000_v12  ;;  %v2012_v28 = vstv %s2725_s1  ;;  %s4039_s1 = sld [smem:[#allocation4 + $0x7]] }
 0x256   :  { %1981 = vrot.lane.b32.xlu0 %v1977_v43, %s2823_s17  ;;  %v2014_v44 = vmul.f32 %v3825_v7, %v2012_v28 }
 0x257   :  { %v3899_v13 = vpop.permute.xlu1 %1643 }
 0x258   :  { %5101 = vst [vmem:[#allocation199_spill] sm:$0xff] %v3899_v13  ;;  %v3901_v1 = vpop.permute.xlu0 %1641 }
 0x259   :  { %5102 = vst [vmem:[#allocation200_spill] sm:$0xff] %v3901_v1  ;;  %1995 = vrot.lane.b32.xlu1 %v1990_v60, %s2823_s17  ;;  %v2013_v60 = vmul.f32 %v3832_v49, %v2012_v28  ;;  %v2024_v1 = vstv %s2558_s2  ;;  %s2825_s2 = smov 108  }
 0x25a   :  { %1993 = vrot.lane.b32.xlu0 %v1989_v59, %s2823_s17  ;;  %v2026_v12 = vmul.f32 %v3825_v7, %v2024_v1 }
 0x25b   :  { %v3907_v23 = vpop.permute.xlu1 %1656 }
 0x25c   :  { %5103 = vst [vmem:[#allocation201_spill] sm:$0xff] %v3907_v23  ;;  %v3909_v43 = vpop.permute.xlu0 %1654 }
 0x25d   :  { %5104 = vst [vmem:[#allocation202_spill] sm:$0xff] %v3909_v43  ;;  %2007 = vrot.lane.b32.xlu1 %v2002_v22, %s2823_s17  ;;  %v2025_v22 = vmul.f32 %v3832_v49, %v2024_v1  ;;  %v2037_v43 = vstv %s2582_s21  ;;  %s4053_s21 = sld [smem:[#allocation2 + $0x214]] }
 0x25e   :  { %2005 = vrot.lane.b32.xlu0 %v2001_v0, %s2823_s17  ;;  %v2039_v28 = vmul.f32 %v3825_v7, %v2037_v43 }
 0x25f   :  { %v3915_v13 = vpop.permute.xlu1 %1668 }
 0x260   :  { %5105 = vst [vmem:[#allocation203_spill] sm:$0xff] %v3915_v13  ;;  %v3917_v59 = vpop.permute.xlu0 %1666 }
 0x261   :  { %5106 = vst [vmem:[#allocation204_spill] sm:$0xff] %v3917_v59  ;;  %2019 = vrot.lane.b32.xlu1 %v2014_v44, %s2823_s17  ;;  %v2038_v44 = vmul.f32 %v3832_v49, %v2037_v43  ;;  %v2049_v59 = vstv %s2606_s22  ;;  %s4077_s22 = sld [smem:[#allocation2 + $0x294]] }
 0x262   :  { %2017 = vrot.lane.b32.xlu0 %v2013_v60, %s2823_s17  ;;  %s4016_s17 = sld [smem:[#allocation4 + $0x5]] }
 0x263   :  { %v3923_v23 = vpop.permute.xlu1 %1680 }
 0x264   :  { %5107 = vst [vmem:[#allocation205_spill] sm:$0xff] %v3923_v23  ;;  %v3925_v0 = vpop.permute.xlu0 %1678  ;;  %v2051_v23 = vmul.f32 %v3825_v7, %v2049_v59 }
 0x265   :  { %5108 = vst [vmem:[#allocation206_spill] sm:$0xff] %v3925_v0  ;;  %2031 = vrot.lane.b32.xlu1 %v2026_v12, %s2824_s24  ;;  %v2050_v12 = vmul.f32 %v3832_v49, %v2049_v59  ;;  %v2061_v0 = vstv %s2630_s23  ;;  %s4102_s23 = sld [smem:[#allocation2 + $0x314]] }
 0x266   :  { %2029 = vrot.lane.b32.xlu0 %v2025_v22, %s2824_s24  ;;  %v2063_v43 = vmul.f32 %v3825_v7, %v2061_v0 }
 0x267   :  { %v3931_v60 = vpop.permute.xlu1 %1692 }
 0x268   :  { %5109 = vst [vmem:[#allocation207_spill] sm:$0xff] %v3931_v60  ;;  %v3933_v1 = vpop.permute.xlu0 %1690 }
 0x269   :  { %5110 = vst [vmem:[#allocation208_spill] sm:$0xff] %v3933_v1  ;;  %2044 = vrot.lane.b32.xlu1 %v2039_v28, %s2824_s24  ;;  %v2062_v28 = vmul.f32 %v3832_v49, %v2061_v0  ;;  %v2073_v1 = vstv %s2654_s25  ;;  %s4166_s25 = sld [smem:[#allocation2 + $0x15]] }
 0x26a   :  { %2042 = vrot.lane.b32.xlu0 %v2038_v44, %s2824_s24  ;;  %v2074_v0 = vmul.f32 %v3832_v49, %v2073_v1 }
 0x26b   :  { %v3939_v13 = vpop.permute.xlu1 %1704 }
 0x26c   :  { %5111 = vst [vmem:[#allocation209_spill] sm:$0xff] %v3939_v13  ;;  %v3941_v22 = vpop.permute.xlu0 %1702 }
 0x26d   :  { %5112 = vst [vmem:[#allocation210_spill] sm:$0xff] %v3941_v22  ;;  %2056 = vrot.lane.b32.xlu1 %v2051_v23, %s2824_s24  ;;  %v2075_v23 = vmul.f32 %v3825_v7, %v2073_v1 }
 0x26e   :  { %2054 = vrot.lane.b32.xlu0 %v2050_v12, %s2824_s24  ;;  %v2085_v12 = vstv %s2678_s26  ;;  %s4192_s26 = sld [smem:[#allocation2 + $0x95]] }
 0x26f   :  { %v3951_v59 = vpop.permute.xlu1 %1716  ;;  %v2086_v1 = vmul.f32 %v3832_v49, %v2085_v12 }
 0x270   :  { %5113 = vst [vmem:[#allocation211_spill] sm:$0xff] %v3951_v59  ;;  %v3955_v44 = vpop.permute.xlu0 %1714 }
 0x271   :  { %5114 = vst [vmem:[#allocation212_spill] sm:$0xff] %v3955_v44  ;;  %2068 = vrot.lane.b32.xlu1 %v2063_v43, %s2824_s24  ;;  %v2087_v43 = vmul.f32 %v3825_v7, %v2085_v12  ;;  %v2109_v12 = vstv %s3963_s4  ;;  %s4317_s4 = sld [smem:[#allocation2 + $0x295]] }
 0x272   :  { %2066 = vrot.lane.b32.xlu0 %v2062_v28, %s2824_s24  ;;  %v2097_v28 = vstv %s3947_s27  ;;  %s4224_s27 = sld [smem:[#allocation2 + $0x115]] }
 0x273   :  { %v3967_v59 = vpop.permute.xlu1 %1728 }
 0x274   :  { %5115 = vst [vmem:[#allocation213_spill] sm:$0xff] %v3967_v59  ;;  %v3971_v44 = vpop.permute.xlu0 %1726 }
 0x275   :  { %5116 = vst [vmem:[#allocation214_spill] sm:$0xff] %v3971_v44  ;;  %2080 = vrot.lane.b32.xlu1 %v2075_v23, %s2824_s24  ;;  %v2099_v23 = vmul.f32 %v3825_v7, %v2097_v28  ;;  %v254_v44 = vstv %s3965_s5  ;;  %s4346_s5 = sld [smem:[#allocation2 + $0x315]] }
 0x276   :  { %2078 = vrot.lane.b32.xlu0 %v2074_v0, %s2824_s24  ;;  %v2098_v0 = vmul.f32 %v3832_v49, %v2097_v28  ;;  %v2121_v28 = vstv %s3980_s8  ;;  %v255_v16 = vmul.f32 %v3832_v49, %v254_v44  ;;  %v2148_v44 = vmul.f32 %v3825_v7, %v2146_v21  ;;  %s4428_s8 = sld [smem:[#allocation2 + $0x96]] }
 0x277   :  { %v3984_v22 = vpop.permute.xlu1 %1740 }
 0x278   :  { %5117 = vst [vmem:[#allocation215_spill] sm:$0xff] %v3984_v22  ;;  %v3988_v13 = vpop.permute.xlu0 %1738  ;;  %v2134_v22 = vstv %s3997_s12 }
 0x279   :  { %5118 = vst [vmem:[#allocation216_spill] sm:$0xff] %v3988_v13  ;;  %2092 = vrot.lane.b32.xlu1 %v2087_v43, %s2824_s24  ;;  %v2111_v43 = vmul.f32 %v3825_v7, %v2109_v12 }
 0x27a   :  { %2090 = vrot.lane.b32.xlu0 %v2086_v1, %s2824_s24  ;;  %v2110_v1 = vmul.f32 %v3832_v49, %v2109_v12  ;;  %v257_v12 = vstv %s3953_s29  ;;  %s2826_s29 = smov 107  }
 0x27b   :  { %v4001_v60 = vpop.permute.xlu1 %1753 }
 0x27c   :  { %5119 = vst [vmem:[#allocation217_spill] sm:$0xff] %v4001_v60  ;;  %v4005_v13 = vpop.permute.xlu0 %1751  ;;  %v2122_v60 = vmul.f32 %v3832_v49, %v2121_v28 }
 0x27d   :  { %5120 = vst [vmem:[#allocation218_spill] sm:$0xff] %v4005_v13  ;;  %2104 = vrot.lane.b32.xlu1 %v2099_v23, %s2824_s24 }
 0x27e   :  { %2102 = vrot.lane.b32.xlu0 %v2098_v0, %s2824_s24  ;;  %v2123_v0 = vmul.f32 %v3825_v7, %v2121_v28  ;;  %v263_v28 = vstv %s3982_s9  ;;  %s4453_s9 = sld [smem:[#allocation2 + $0x116]] }
 0x27f   :  { %v4018_v13 = vpop.permute.xlu1 %1765  ;;  %v264_v50 = vmul.f32 %v3832_v49, %v263_v28  ;;  %v2147_v28 = vmul.f32 %v3832_v49, %v2146_v21  ;;  %v288_v21 = vsel %vm287_vm0, %v2985_v32, %v2993_v37  ;;  %v336_v37 = vsel %vm287_vm0, %v3017_v52, %v3015_v51 }
 0x280   :  { %5121 = vst [vmem:[#allocation219_spill] sm:$0xff] %v4018_v13  ;;  %v4022_v23 = vpop.permute.xlu0 %1763 }
 0x281   :  { %5122 = vst [vmem:[#allocation220_spill] sm:$0xff] %v4022_v23  ;;  %2116 = vrot.lane.b32.xlu1 %v2111_v43, %s2824_s24  ;;  %v247_v23 = vstv %s3949_s28  ;;  %v260_v43 = vstv %s3969_s6  ;;  %v265_v11 = vadd.f32 %v264_v50, %v249_v53  ;;  %s4256_s28 = sld [smem:[#allocation2 + $0x195]] }
 0x282   :  { %2114 = vrot.lane.b32.xlu0 %v2110_v1, %s2824_s24  ;;  %v258_v1 = vmul.f32 %v3832_v49, %v257_v12  ;;  %v246_v12 = vstv %s3957_s30  ;;  %s4131_s24 = sld [smem:[#allocation2 + $0x394]] }
 0x283   :  { %v4034_v13 = vpop.permute.xlu1 %1777  ;;  %v256_v18 = vadd.f32 %v255_v16, %v246_v12  ;;  %v457_v12 = vsel %vm384_vm1, %v3097_v48, %v3095_v45  ;;  %v2194_v45 = vstv %s4102_s23  ;;  %s4282_s30 = sld [smem:[#allocation2 + $0x215]] }
 0x284   :  { %5123 = vst [vmem:[#allocation221_spill] sm:$0xff] %v4034_v13  ;;  %v4041_v59 = vpop.permute.xlu0 %1775  ;;  %v2136_v13 = vmul.f32 %v3825_v7, %v2134_v22  ;;  %s4372_s6 = sld [smem:[#allocation2 + $0x395]] }
 0x285   :  { %5124 = vst [vmem:[#allocation222_spill] sm:$0xff] %v4041_v59  ;;  %2128 = vrot.lane.b32.xlu1 %v2123_v0, %s2825_s2  ;;  %v2135_v59 = vmul.f32 %v3832_v49, %v2134_v22  ;;  %v261_v0 = vmul.f32 %v3832_v49, %v260_v43  ;;  %v275_v22 = vstv %s4020_s18  ;;  %v251_v43 = vstv %s4016_s17  ;;  %s4582_s17 = sld [smem:[#allocation2 + $0x316]] }
 0x286   :  { %2126 = vrot.lane.b32.xlu0 %v2122_v60, %s2825_s2  ;;  %v267_v60 = vmul.f32 %v3832_v49, %v266_v58  ;;  %v2158_v58 = vstv %s4032_s20  ;;  %v276_v34 = vmul.f32 %v3832_v49, %v275_v22  ;;  %v271_v16 = vadd.f32 %v270_v27, %v251_v43  ;;  %s4608_s18 = sld [smem:[#allocation2 + $0x396]] }
 0x287   :  { %v4059_v3 = vpop.permute.xlu1 %1789  ;;  %v262_v17 = vadd.f32 %v261_v0, %v248_v6  ;;  %v290_v52 = vadd.f32 %v288_v21, %v256_v18  ;;  %v445_v18 = vsel %vm384_vm1, %v3089_v39, %v3087_v38  ;;  %s4661_s20 = sld [smem:[#allocation2 + $0x97]] }
 0x288   :  { %5125 = vst [vmem:[#allocation223_spill] sm:$0xff] %v4059_v3  ;;  %v4065_v40 = vpop.permute.xlu0 %1787  ;;  %v252_v3 = vstv %s4024_s19  ;;  %v268_v8 = vadd.f32 %v267_v60, %v250_v35  ;;  %v2170_v35 = vstv %s4053_s21  ;;  %s4634_s19 = sld [smem:[#allocation2 + $0x17]]  ;;  %s2828_s21 = smov 105  }
 0x289   :  { %5126 = vst [vmem:[#allocation224_spill] sm:$0xff] %v4065_v40  ;;  %2141 = vrot.lane.b32.xlu1 %v2136_v13, %s2825_s2  ;;  %v259_v40 = vadd.f32 %v258_v1, %v247_v23  ;;  %v300_v13 = vsel %vm287_vm0, %v2983_v31, %v2991_v36  ;;  %v274_v6 = vadd.f32 %v273_v26, %v252_v3  ;;  %s4759_s23 = sld [smem:[#allocation2 + $0x297]] }
 0x28a   :  { %2139 = vrot.lane.b32.xlu0 %v2135_v59, %s2825_s2  ;;  %v253_v59 = vstv %s4039_s1  ;;  %v2160_v23 = vmul.f32 %v3825_v7, %v2158_v58  ;;  %v312_v1 = vsel %vm287_vm0, %v3001_v42, %v2999_v41  ;;  %v324_v31 = vsel %vm287_vm0, %v3009_v47, %v3007_v46  ;;  %s4688_s1 = sld [smem:[#allocation2 + $0x117]] }
 0x28b   :  { %v4080_v33 = vpop.permute.xlu1 %1801  ;;  %v2159_v36 = vmul.f32 %v3832_v49, %v2158_v58  ;;  %v302_v32 = vadd.f32 %v300_v13, %v259_v40  ;;  %v277_v26 = vadd.f32 %v276_v34, %v253_v59  ;;  %v348_v41 = vsel %vm287_vm0, %v3025_v57, %v3023_v56  ;;  %v5133_v58 = vld [vmem:[#allocation14_spill] sm:$0xff]  ;;  %v5134_v13 = vld [vmem:[#allocation15_spill] sm:$0xff]  ;;  %v5135_v59 = vld [vmem:[#allocation16_spill] sm:$0xff] }
 0x28c   :  { %v4086_v2 = vpop.permute.xlu0 %1799  ;;  %v360_v42 = vsel %vm287_vm0, %v3033_v62, %v3031_v61  ;;  %v372_v46 = vsel %vm287_vm0, %v3041_v5, %v3039_v4  ;;  %v385_v47 = vsel %vm384_vm1, %v3049_v10, %v3047_v9  ;;  %v314_v40 = vadd.f32 %v312_v1, %v262_v17 }
 0x28d   :  { %2153 = vrot.lane.b32.xlu1 %v2148_v44, %s2825_s2  ;;  %v326_v50 = vadd.f32 %v324_v31, %v265_v11  ;;  %v2172_v56 = vmul.f32 %v3825_v7, %v2170_v35  ;;  %v338_v57 = vadd.f32 %v336_v37, %v268_v8  ;;  %v397_v61 = vsel %vm384_vm1, %v3057_v15, %v3055_v14  ;;  %v5131_v44 = vld [vmem:[#allocation12_spill] sm:$0xff]  ;;  %v5138_v37 = vld [vmem:[#allocation19_spill] sm:$0xff] }
 0x28e   :  { %2151 = vrot.lane.b32.xlu0 %v2147_v28, %s2825_s2  ;;  %v2171_v62 = vmul.f32 %v3832_v49, %v2170_v35  ;;  %v2182_v4 = vstv %s4077_s22  ;;  %v350_v5 = vadd.f32 %v348_v41, %v271_v16  ;;  %v362_v9 = vadd.f32 %v360_v42, %v274_v6  ;;  %v5132_v28 = vld [vmem:[#allocation13_spill] sm:$0xff]  ;;  %v5137_v35 = vld [vmem:[#allocation18_spill] sm:$0xff]  ;;  %s4739_s22 = sld [smem:[#allocation2 + $0x217]] }
 0x28f   :  { %v4107_v27 = vpop.permute.xlu1 %1813  ;;  %v374_v10 = vadd.f32 %v372_v46, %v277_v26  ;;  %v387_v11 = vadd.f32 %v385_v47, %v290_v52  ;;  %v409_v8 = vsel %vm384_vm1, %v3065_v20, %v3063_v19  ;;  %v421_v14 = vsel %vm384_vm1, %v3073_v25, %v3071_v24  ;;  %v5127_v24 = vld [vmem:[#allocation8_spill] sm:$0xff] }
 0x290   :  { %v4121_v51 = vpop.permute.xlu0 %1811  ;;  %v433_v15 = vsel %vm384_vm1, %v3081_v30, %v3079_v29  ;;  %v399_v3 = vadd.f32 %v397_v61, %v302_v32  ;;  %v469_v19 = vsel %vm384_vm1, %v3105_v55, %v3103_v54  ;;  %v2184_v20 = vmul.f32 %v3825_v7, %v2182_v4  ;;  %v5128_v29 = vld [vmem:[#allocation9_spill] sm:$0xff]  ;;  %v5129_v30 = vld [vmem:[#allocation10_spill] sm:$0xff]  ;;  %v5139_v26 = vld [vmem:[#allocation20_spill] sm:$0xff] }
 0x291   :  { %2165 = vrot.lane.b32.xlu1 %v2160_v23, %s2825_s2  ;;  %v482_v25 = vsel %vm481_vm2, %v5127_v24, %v3111_v63  ;;  %v494_v38 = vsel %vm481_vm2, %v5129_v30, %v5128_v29  ;;  %v2183_v39 = vmul.f32 %v3832_v49, %v2182_v4  ;;  %v411_v48 = vadd.f32 %v409_v8, %v314_v40  ;;  %v5130_v63 = vld [vmem:[#allocation11_spill] sm:$0xff]  ;;  %v5143_v4 = vld [vmem:[#allocation24_spill] sm:$0xff] }
 0x292   :  { %2163 = vrot.lane.b32.xlu0 %v2159_v36, %s2825_s2  ;;  %v423_v54 = vadd.f32 %v421_v14, %v326_v50  ;;  %v435_v55 = vadd.f32 %v433_v15, %v338_v57  ;;  %v447_v0 = vadd.f32 %v445_v18, %v350_v5  ;;  %v459_v22 = vadd.f32 %v457_v12, %v362_v9  ;;  %v5136_v36 = vld [vmem:[#allocation17_spill] sm:$0xff]  ;;  %v5146_v8 = vld [vmem:[#allocation27_spill] sm:$0xff]  ;;  %v5147_v14 = vld [vmem:[#allocation28_spill] sm:$0xff] }
 0x293   :  { %v4133_v17 = vpop.permute.xlu1 %1825  ;;  %v506_v43 = vsel %vm481_vm2, %v5131_v44, %v5130_v63  ;;  %v518_v34 = vsel %vm481_vm2, %v5133_v58, %v5132_v28  ;;  %v530_v21 = vsel %vm481_vm2, %v5135_v59, %v5134_v13  ;;  %v471_v6 = vadd.f32 %v469_v19, %v374_v10  ;;  %v5140_v50 = vld [vmem:[#allocation21_spill] sm:$0xff]  ;;  %v5145_v10 = vld [vmem:[#allocation26_spill] sm:$0xff]  ;;  %v5151_v29 = vld [vmem:[#allocation32_spill] sm:$0xff] }
 0x294   :  { %v4147_v53 = vpop.permute.xlu0 %1823  ;;  %v484_v23 = vadd.f32 %v482_v25, %v387_v11  ;;  %v496_v1 = vadd.f32 %v494_v38, %v399_v3  ;;  %v2196_v31 = vmul.f32 %v3825_v7, %v2194_v45  ;;  %v542_v32 = vsel %vm481_vm2, %v5137_v35, %v5136_v36  ;;  %v5144_v9 = vld [vmem:[#allocation25_spill] sm:$0xff]  ;;  %v5149_v3 = vld [vmem:[#allocation30_spill] sm:$0xff]  ;;  %v5150_v25 = vld [vmem:[#allocation31_spill] sm:$0xff] }
 0x295   :  { %2177 = vrot.lane.b32.xlu1 %v2172_v56, %s2825_s2  ;;  %v554_v41 = vsel %vm481_vm2, %v5139_v26, %v5138_v37  ;;  %v2195_v42 = vmul.f32 %v3832_v49, %v2194_v45  ;;  %v2206_v46 = vstv %s4131_s24  ;;  %v508_v47 = vadd.f32 %v506_v43, %v411_v48  ;;  %v5141_v56 = vld [vmem:[#allocation22_spill] sm:$0xff]  ;;  %v5148_v18 = vld [vmem:[#allocation29_spill] sm:$0xff]  ;;  %v5155_v13 = vld [vmem:[#allocation36_spill] sm:$0xff]  ;;  %s2706_s24 = sld [smem:[#allocation2 + $0x317]] }
 0x296   :  { %2175 = vrot.lane.b32.xlu0 %v2171_v62, %s2825_s2  ;;  %v520_v52 = vadd.f32 %v518_v34, %v423_v54  ;;  %v532_v40 = vadd.f32 %v530_v21, %v435_v55  ;;  %v566_v57 = vsel %vm481_vm2, %v5141_v56, %v5140_v50  ;;  %v5142_v62 = vld [vmem:[#allocation23_spill] sm:$0xff]  ;;  %v591_v11 = vsel %vm578_vm3, %v5145_v10, %v5144_v9  ;;  %v5152_v45 = vld [vmem:[#allocation33_spill] sm:$0xff]  ;;  %v5153_v48 = vld [vmem:[#allocation34_spill] sm:$0xff] }
 0x297   :  { %v4168_v60 = vpop.permute.xlu1 %1837  ;;  %v579_v5 = vsel %vm578_vm3, %v5143_v4, %v5142_v62  ;;  %v603_v15 = vsel %vm578_vm3, %v5147_v14, %v5146_v8  ;;  %v615_v12 = vsel %vm578_vm3, %v5149_v3, %v5148_v18  ;;  %v556_v24 = vadd.f32 %v554_v41, %v459_v22  ;;  %v5154_v34 = vld [vmem:[#allocation35_spill] sm:$0xff]  ;;  %v5156_v21 = vld [vmem:[#allocation37_spill] sm:$0xff]  ;;  %v5159_v35 = vld [vmem:[#allocation40_spill] sm:$0xff] }
 0x298   :  { %v4179_v16 = vpop.permute.xlu0 %1835  ;;  %v627_v30 = vsel %vm578_vm3, %v5151_v29, %v5150_v25  ;;  %v2208_v38 = vmul.f32 %v3825_v7, %v2206_v46  ;;  %v639_v54 = vsel %vm578_vm3, %v5153_v48, %v5152_v45  ;;  %v2207_v55 = vmul.f32 %v3832_v49, %v2206_v46  ;;  %v5158_v36 = vld [vmem:[#allocation39_spill] sm:$0xff]  ;;  %v5160_v37 = vld [vmem:[#allocation41_spill] sm:$0xff]  ;;  %v5161_v26 = vld [vmem:[#allocation42_spill] sm:$0xff] }
 0x299   :  { %2189 = vrot.lane.b32.xlu1 %v2184_v20, %s2825_s2  ;;  %v544_v20 = vadd.f32 %v542_v32, %v447_v0  ;;  %v2218_v0 = vstv %s4166_s25  ;;  %v581_v22 = vadd.f32 %v579_v5, %v484_v23  ;;  %v593_v63 = vadd.f32 %v591_v11, %v496_v1  ;;  %v5163_v46 = vld [vmem:[#allocation44_spill] sm:$0xff]  ;;  %v5165_v50 = vld [vmem:[#allocation46_spill] sm:$0xff]  ;;  %v5168_v14 = vld [vmem:[#allocation49_spill] sm:$0xff]  ;;  %s2730_s25 = sld [smem:[#allocation2 + $0x397]] }
 0x29a   :  { %2187 = vrot.lane.b32.xlu0 %v2183_v39, %s2825_s2  ;;  %v568_v39 = vadd.f32 %v566_v57, %v471_v6  ;;  %v605_v44 = vadd.f32 %v603_v15, %v508_v47  ;;  %v617_v43 = vadd.f32 %v615_v12, %v520_v52  ;;  %v629_v58 = vadd.f32 %v627_v30, %v532_v40  ;;  %v5157_v6 = vld [vmem:[#allocation38_spill] sm:$0xff]  ;;  %v5164_v40 = vld [vmem:[#allocation45_spill] sm:$0xff]  ;;  %v5166_v57 = vld [vmem:[#allocation47_spill] sm:$0xff] }
 0x29b   :  { %v4197_v61 = vpop.permute.xlu1 %1850  ;;  %v651_v59 = vsel %vm578_vm3, %v5155_v13, %v5154_v34  ;;  %v676_v32 = vsel %vm675_vm4, %v5159_v35, %v5158_v36  ;;  %v641_v1 = vadd.f32 %v639_v54, %v544_v20  ;;  %v688_v41 = vsel %vm675_vm4, %v5161_v26, %v5160_v37  ;;  %v5167_v62 = vld [vmem:[#allocation48_spill] sm:$0xff]  ;;  %v5169_v15 = vld [vmem:[#allocation50_spill] sm:$0xff]  ;;  %v5170_v20 = vld [vmem:[#allocation51_spill] sm:$0xff] }
 0x29c   :  { %v4211_v19 = vpop.permute.xlu0 %1848  ;;  %v2220_v52 = vmul.f32 %v3825_v7, %v2218_v0  ;;  %v712_v56 = vsel %vm675_vm4, %v5165_v50, %v5164_v40  ;;  %v724_v4 = vsel %vm675_vm4, %v5167_v62, %v5166_v57  ;;  %v2219_v5 = vmul.f32 %v3832_v49, %v2218_v0  ;;  %v5171_v25 = vld [vmem:[#allocation52_spill] sm:$0xff]  ;;  %v5172_v30 = vld [vmem:[#allocation53_spill] sm:$0xff]  ;;  %v5174_v48 = vld [vmem:[#allocation55_spill] sm:$0xff] }
 0x29d   :  { %2201 = vrot.lane.b32.xlu1 %v2196_v31, %s2825_s2  ;;  %v663_v31 = vsel %vm578_vm3, %v5157_v6, %v5156_v21  ;;  %v2231_v9 = vstv %s4192_s26  ;;  %v653_v10 = vadd.f32 %v651_v59, %v556_v24  ;;  %v678_v8 = vadd.f32 %v676_v32, %v581_v22  ;;  %v5175_v24 = vld [vmem:[#allocation56_spill] sm:$0xff]  ;;  %v5176_v13 = vld [vmem:[#allocation57_spill] sm:$0xff]  ;;  %v5177_v59 = vld [vmem:[#allocation58_spill] sm:$0xff] }
 0x29e   :  { %2199 = vrot.lane.b32.xlu0 %v2195_v42, %s2825_s2  ;;  %v5162_v42 = vld [vmem:[#allocation43_spill] sm:$0xff]  ;;  %v665_v11 = vadd.f32 %v663_v31, %v568_v39  ;;  %v736_v18 = vsel %vm675_vm4, %v5169_v15, %v5168_v14  ;;  %v690_v12 = vadd.f32 %v688_v41, %v593_v63  ;;  %v748_v29 = vsel %vm675_vm4, %v5171_v25, %v5170_v20  ;;  %v5179_v35 = vld [vmem:[#allocation60_spill] sm:$0xff]  ;;  %v5181_v26 = vld [vmem:[#allocation62_spill] sm:$0xff] }
 0x29f   :  { %v4226_v28 = vpop.permute.xlu1 %1862  ;;  %v700_v47 = vsel %vm675_vm4, %v5163_v46, %v5162_v42  ;;  %v773_v39 = vsel %vm772_vm5, %v5175_v24, %v5174_v48  ;;  %v714_v0 = vadd.f32 %v712_v56, %v617_v43  ;;  %v726_v22 = vadd.f32 %v724_v4, %v629_v58  ;;  %v5178_v36 = vld [vmem:[#allocation59_spill] sm:$0xff]  ;;  %v5183_v46 = vld [vmem:[#allocation64_spill] sm:$0xff]  ;;  %v5185_v40 = vld [vmem:[#allocation66_spill] sm:$0xff] }
 0x2a0   :  { %v4237_v23 = vpop.permute.xlu0 %1860  ;;  %v2233_v63 = vmul.f32 %v3825_v7, %v2231_v9  ;;  %v738_v34 = vadd.f32 %v736_v18, %v641_v1  ;;  %v785_v21 = vsel %vm772_vm5, %v5177_v59, %v5176_v13  ;;  %v2232_v6 = vmul.f32 %v3832_v49, %v2231_v9  ;;  %v5180_v1 = vld [vmem:[#allocation61_spill] sm:$0xff]  ;;  %v5182_v42 = vld [vmem:[#allocation63_spill] sm:$0xff]  ;;  %v5187_v57 = vld [vmem:[#allocation68_spill] sm:$0xff] }
 0x2a1   :  { %2213 = vrot.lane.b32.xlu1 %v2208_v38, %s2825_s2  ;;  %v5173_v38 = vld [vmem:[#allocation54_spill] sm:$0xff]  ;;  %v2243_v31 = vstv %s4224_s27  ;;  %v775_v58 = vadd.f32 %v773_v39, %v678_v8  ;;  %v797_v32 = vsel %vm772_vm5, %v5179_v35, %v5178_v36  ;;  %v809_v41 = vsel %vm772_vm5, %v5181_v26, %v5180_v1  ;;  %v5186_v56 = vld [vmem:[#allocation67_spill] sm:$0xff]  ;;  %v5188_v9 = vld [vmem:[#allocation69_spill] sm:$0xff] }
 0x2a2   :  { %2211 = vrot.lane.b32.xlu0 %v2207_v55, %s2825_s2  ;;  %v760_v45 = vsel %vm675_vm4, %v5173_v38, %v5172_v30  ;;  %v702_v55 = vadd.f32 %v700_v47, %v605_v44  ;;  %v750_v44 = vadd.f32 %v748_v29, %v653_v10  ;;  %v821_v47 = vsel %vm772_vm5, %v5183_v46, %v5182_v42  ;;  %v5189_v10 = vld [vmem:[#allocation70_spill] sm:$0xff]  ;;  %v5190_v8 = vld [vmem:[#allocation71_spill] sm:$0xff]  ;;  %v5191_v14 = vld [vmem:[#allocation72_spill] sm:$0xff]  ;;  %s4715_s2 = sld [smem:[#allocation2 + $0x197]] }
 0x2a3   :  { %v4261_v3 = vpop.permute.xlu1 %1874  ;;  %v762_v43 = vadd.f32 %v760_v45, %v665_v11  ;;  %v845_v62 = vsel %vm772_vm5, %v5187_v57, %v5186_v56  ;;  %v857_v11 = vsel %vm772_vm5, %v5189_v10, %v5188_v9  ;;  %v870_v15 = vsel %vm869_vm6, %v5191_v14, %v5190_v8  ;;  %v5192_v25 = vld [vmem:[#allocation73_spill] sm:$0xff]  ;;  %v5193_v29 = vld [vmem:[#allocation74_spill] sm:$0xff]  ;;  %v5194_v59 = vld [vmem:[#allocation75_spill] sm:$0xff] }
 0x2a4   :  { %v4272_v54 = vpop.permute.xlu0 %1872  ;;  %v2245_v18 = vmul.f32 %v3825_v7, %v2243_v31  ;;  %v799_v20 = vadd.f32 %v797_v32, %v702_v55  ;;  %v882_v30 = vsel %vm869_vm6, %v5193_v29, %v5192_v25  ;;  %v2255_v38 = vstv %s4256_s28  ;;  %v5196_v35 = vld [vmem:[#allocation77_spill] sm:$0xff]  ;;  %v5201_v26 = vld [vmem:[#allocation82_spill] sm:$0xff]  ;;  %v5203_v42 = vld [vmem:[#allocation84_spill] sm:$0xff] }
 0x2a5   :  { %2225 = vrot.lane.b32.xlu1 %v2220_v52, %s2826_s29  ;;  %v5184_v52 = vld [vmem:[#allocation65_spill] sm:$0xff]  ;;  %v811_v45 = vadd.f32 %v809_v41, %v714_v0  ;;  %v823_v48 = vadd.f32 %v821_v47, %v726_v22  ;;  %v847_v39 = vadd.f32 %v845_v62, %v750_v44  ;;  %v859_v13 = vadd.f32 %v857_v11, %v762_v43  ;;  %v5198_v0 = vld [vmem:[#allocation79_spill] sm:$0xff]  ;;  %v5199_v22 = vld [vmem:[#allocation80_spill] sm:$0xff] }
 0x2a6   :  { %2223 = vrot.lane.b32.xlu0 %v2219_v5, %s2826_s29  ;;  %v833_v50 = vsel %vm772_vm5, %v5185_v40, %v5184_v52  ;;  %v787_v5 = vadd.f32 %v785_v21, %v690_v12  ;;  %v2244_v12 = vmul.f32 %v3832_v49, %v2243_v31  ;;  %v872_v55 = vadd.f32 %v870_v15, %v775_v58  ;;  %v5195_v21 = vld [vmem:[#allocation76_spill] sm:$0xff]  ;;  %v5200_v44 = vld [vmem:[#allocation81_spill] sm:$0xff]  ;;  %v5202_v41 = vld [vmem:[#allocation83_spill] sm:$0xff] }
 0x2a7   :  { %v4287_v37 = vpop.permute.xlu1 %1886  ;;  %v835_v24 = vadd.f32 %v833_v50, %v738_v34  ;;  %v894_v36 = vsel %vm869_vm6, %v5195_v21, %v5194_v59  ;;  %v918_v34 = vsel %vm869_vm6, %v5199_v22, %v5198_v0  ;;  %v930_v43 = vsel %vm869_vm6, %v5201_v26, %v5200_v44  ;;  %v5204_v47 = vld [vmem:[#allocation85_spill] sm:$0xff]  ;;  %v5205_v52 = vld [vmem:[#allocation86_spill] sm:$0xff]  ;;  %v5207_v9 = vld [vmem:[#allocation88_spill] sm:$0xff] }
 0x2a8   :  { %v4301_v4 = vpop.permute.xlu0 %1884  ;;  %v884_v1 = vadd.f32 %v882_v30, %v787_v5  ;;  %v2257_v58 = vmul.f32 %v3825_v7, %v2255_v38  ;;  %v942_v46 = vsel %vm869_vm6, %v5203_v42, %v5202_v41  ;;  %v954_v40 = vsel %vm869_vm6, %v5205_v52, %v5204_v47  ;;  %v5206_v5 = vld [vmem:[#allocation87_spill] sm:$0xff]  ;;  %v5208_v11 = vld [vmem:[#allocation89_spill] sm:$0xff]  ;;  %v5209_v8 = vld [vmem:[#allocation90_spill] sm:$0xff] }
 0x2a9   :  { %2238 = vrot.lane.b32.xlu1 %v2233_v63, %s2826_s29  ;;  %v2256_v50 = vmul.f32 %v3832_v49, %v2255_v38  ;;  %v2267_v56 = vstv %s4282_s30  ;;  %v896_v57 = vadd.f32 %v894_v36, %v799_v20  ;;  %v967_v10 = vsel %vm966_vm7, %v5207_v9, %v5206_v5  ;;  %v5210_v25 = vld [vmem:[#allocation91_spill] sm:$0xff]  ;;  %v5211_v29 = vld [vmem:[#allocation92_spill] sm:$0xff]  ;;  %v5213_v20 = vld [vmem:[#allocation94_spill] sm:$0xff] }
 0x2aa   :  { %2236 = vrot.lane.b32.xlu0 %v2232_v6, %s2826_s29  ;;  %v5197_v6 = vld [vmem:[#allocation78_spill] sm:$0xff]  ;;  %v979_v14 = vsel %vm966_vm7, %v5209_v8, %v5208_v11  ;;  %v991_v30 = vsel %vm966_vm7, %v5211_v29, %v5210_v25  ;;  %v5215_v59 = vld [vmem:[#allocation96_spill] sm:$0xff]  ;;  %v969_v0 = vadd.f32 %v967_v10, %v872_v55  ;;  %v2279_v44 = vstv %s4317_s4  ;;  %v5216_v47 = vld [vmem:[#allocation97_spill] sm:$0xff] }
 0x2ab   :  { %v4319_v63 = vpop.permute.xlu1 %1898  ;;  %v906_v31 = vsel %vm869_vm6, %v5197_v6, %v5196_v35  ;;  %v932_v35 = vadd.f32 %v930_v43, %v835_v24  ;;  %v944_v6 = vadd.f32 %v942_v46, %v847_v39  ;;  %v981_v22 = vadd.f32 %v979_v14, %v884_v1  ;;  %v5217_v24 = vld [vmem:[#allocation98_spill] sm:$0xff]  ;;  %v5218_v43 = vld [vmem:[#allocation99_spill] sm:$0xff]  ;;  %v5220_v1 = vld [vmem:[#allocation101_spill] sm:$0xff] }
 0x2ac   :  { %v4327_v32 = vpop.permute.xlu0 %1896  ;;  %v908_v62 = vadd.f32 %v906_v31, %v811_v45  ;;  %v5214_v45 = vld [vmem:[#allocation95_spill] sm:$0xff]  ;;  %v956_v31 = vadd.f32 %v954_v40, %v859_v13  ;;  %v993_v26 = vadd.f32 %v991_v30, %v896_v57  ;;  %v1027_v39 = vsel %vm966_vm7, %v5217_v24, %v5216_v47  ;;  %v5221_v46 = vld [vmem:[#allocation102_spill] sm:$0xff]  ;;  %v5227_v11 = vld [vmem:[#allocation108_spill] sm:$0xff] }
 0x2ad   :  { %2250 = vrot.lane.b32.xlu1 %v2245_v18, %s2826_s29  ;;  %v920_v18 = vadd.f32 %v918_v34, %v823_v48  ;;  %v1015_v21 = vsel %vm966_vm7, %v5215_v59, %v5214_v45  ;;  %v2269_v48 = vmul.f32 %v3825_v7, %v2267_v56  ;;  %v2268_v34 = vmul.f32 %v3832_v49, %v2267_v56  ;;  %v5222_v40 = vld [vmem:[#allocation103_spill] sm:$0xff]  ;;  %v5225_v5 = vld [vmem:[#allocation106_spill] sm:$0xff]  ;;  %v5228_v45 = vld [vmem:[#allocation109_spill] sm:$0xff] }
 0x2ae   :  { %2248 = vrot.lane.b32.xlu0 %v2244_v12, %s2826_s29  ;;  %v5212_v12 = vld [vmem:[#allocation93_spill] sm:$0xff]  ;;  %v1051_v52 = vsel %vm966_vm7, %v5221_v46, %v5220_v1  ;;  %v5226_v10 = vld [vmem:[#allocation107_spill] sm:$0xff]  ;;  %v1029_v25 = vadd.f32 %v1027_v39, %v932_v35  ;;  %v2280_v29 = vmul.f32 %v3832_v49, %v2279_v44  ;;  %v2291_v30 = vstv %s4346_s5  ;;  %v5229_v59 = vld [vmem:[#allocation110_spill] sm:$0xff] }
 0x2af   :  { %v4354_v15 = vpop.permute.xlu1 %1910  ;;  %v1003_v38 = vsel %vm966_vm7, %v5213_v20, %v5212_v12  ;;  %v1017_v42 = vadd.f32 %v1015_v21, %v920_v18  ;;  %v1088_v8 = vsel %vm1063_vm8, %v5227_v11, %v5226_v10  ;;  %v2281_v18 = vmul.f32 %v3825_v7, %v2279_v44  ;;  %v5230_v35 = vld [vmem:[#allocation111_spill] sm:$0xff]  ;;  %v5231_v39 = vld [vmem:[#allocation112_spill] sm:$0xff]  ;;  %v5233_v44 = vld [vmem:[#allocation114_spill] sm:$0xff] }
 0x2b0   :  { %v4365_v36 = vpop.permute.xlu0 %1908  ;;  %v1005_v41 = vadd.f32 %v1003_v38, %v908_v62  ;;  %v5224_v62 = vld [vmem:[#allocation105_spill] sm:$0xff]  ;;  %v1053_v20 = vadd.f32 %v1051_v52, %v956_v31  ;;  %v1100_v21 = vsel %vm1063_vm8, %v5229_v59, %v5228_v45  ;;  %v1090_v24 = vadd.f32 %v1088_v8, %v993_v26  ;;  %v5235_v31 = vld [vmem:[#allocation116_spill] sm:$0xff]  ;;  %v5237_v1 = vld [vmem:[#allocation118_spill] sm:$0xff] }
 0x2b1   :  { %2262 = vrot.lane.b32.xlu1 %v2257_v58, %s2826_s29  ;;  %v5219_v58 = vld [vmem:[#allocation100_spill] sm:$0xff]  ;;  %v1076_v9 = vsel %vm1063_vm8, %v5225_v5, %v5224_v62  ;;  %v2293_v26 = vmul.f32 %v3825_v7, %v2291_v30  ;;  %v2303_v62 = vstv %s4372_s6  ;;  %v5240_v10 = vld [vmem:[#allocation121_spill] sm:$0xff]  ;;  %v5241_v11 = vld [vmem:[#allocation122_spill] sm:$0xff]  ;;  %vm1645_vm0 = vcmask 924672  }
 0x2b2   :  { %2260 = vrot.lane.b32.xlu0 %v2256_v50, %s2826_s29  ;;  %v1039_v55 = vsel %vm966_vm7, %v5219_v58, %v5218_v43  ;;  %v5223_v50 = vld [vmem:[#allocation104_spill] sm:$0xff]  ;;  %v1102_v52 = vadd.f32 %v1100_v21, %v1005_v41  ;;  %v1173_v8 = vsel %vm1160_vm9, %v5241_v11, %v5240_v10  ;;  %v5254_v10 = vld [vmem:[#allocation135_spill] sm:$0xff]  ;;  %vm1742_vm1 = vcmask 916480  }
 0x2b3   :  { %v1923_v13 = vpop.permute.xlu1 %1922  ;;  %v1064_v56 = vsel %vm1063_vm8, %v5223_v50, %v5222_v40  ;;  %v1041_v12 = vadd.f32 %v1039_v55, %v944_v6  ;;  %v5234_v6 = vld [vmem:[#allocation115_spill] sm:$0xff]  ;;  %v5236_v55 = vld [vmem:[#allocation117_spill] sm:$0xff]  ;;  %v5239_v50 = vld [vmem:[#allocation120_spill] sm:$0xff]  ;;  %vm2033_vm2 = vcmask 891904   ;;  %vm2130_vm3 = vcmask 883712  }
 0x2b4   :  { %v1921_v57 = vpop.permute.xlu0 %1920  ;;  %v1066_v38 = vadd.f32 %v1064_v56, %v969_v0  ;;  %v1136_v0 = vsel %vm1063_vm8, %v5235_v31, %v5234_v6  ;;  %v1148_v46 = vsel %vm1063_vm8, %v5237_v1, %v5236_v55  ;;  %v5238_v40 = vld [vmem:[#allocation119_spill] sm:$0xff]  ;;  %v5243_v41 = vld [vmem:[#allocation124_spill] sm:$0xff]  ;;  %v2315_v55 = vstv %s4400_s7 }
 0x2b5   :  { %v4393_v14 = vsel %vm1839_vm10, %v1921_v57, %v1923_v13  ;;  %2274 = vrot.lane.b32.xlu1 %v2269_v48, %s2826_s29  ;;  %v1078_v48 = vadd.f32 %v1076_v9, %v981_v22  ;;  %v5232_v13 = vld [vmem:[#allocation113_spill] sm:$0xff]  ;;  %v1161_v56 = vsel %vm1160_vm9, %v5239_v50, %v5238_v40  ;;  %v2292_v57 = vmul.f32 %v3832_v49, %v2291_v30  ;;  %v5251_v40 = vld [vmem:[#allocation132_spill] sm:$0xff] }
 0x2b6   :  { %2272 = vrot.lane.b32.xlu0 %v2268_v34, %s2826_s29  ;;  %v1112_v34 = vsel %vm1063_vm8, %v5231_v39, %v5230_v35  ;;  %v1124_v43 = vsel %vm1063_vm8, %v5233_v44, %v5232_v13  ;;  %v1138_v21 = vadd.f32 %v1136_v0, %v1041_v12  ;;  %v5245_v35 = vld [vmem:[#allocation126_spill] sm:$0xff]  ;;  %v5246_v39 = vld [vmem:[#allocation127_spill] sm:$0xff]  ;;  %v5247_v13 = vld [vmem:[#allocation128_spill] sm:$0xff]  ;;  %v2305_v12 = vmul.f32 %v3825_v7, %v2303_v62 }
 0x2b7   :  { %v1935_v47 = vpop.permute.xlu1 %1934  ;;  %v1114_v5 = vadd.f32 %v1112_v34, %v1017_v42  ;;  %v1126_v9 = vadd.f32 %v1124_v43, %v1029_v25  ;;  %v1209_v42 = vsel %vm1160_vm9, %v5247_v13, %v5246_v39  ;;  %v1163_v34 = vadd.f32 %v1161_v56, %v1066_v38  ;;  %v5248_v44 = vld [vmem:[#allocation129_spill] sm:$0xff]  ;;  %v5249_v43 = vld [vmem:[#allocation130_spill] sm:$0xff]  ;;  %v5255_v11 = vld [vmem:[#allocation136_spill] sm:$0xff] }
 0x2b8   :  { %v1933_v58 = vpop.permute.xlu0 %1932  ;;  %v2304_v0 = vmul.f32 %v3832_v49, %v2303_v62  ;;  %v5252_v56 = vld [vmem:[#allocation133_spill] sm:$0xff]  ;;  %v5257_v62 = vld [vmem:[#allocation138_spill] sm:$0xff]  ;;  %vm2227_vm4 = vcmask 875520   ;;  %vm2324_vm5 = vcmask 867328   ;;  %vm2421_vm6 = vcmask 859136  }
 0x2b9   :  { %v4418_v22 = vsel %vm1936_vm12, %v1933_v58, %v1935_v47  ;;  %2286 = vrot.lane.b32.xlu1 %v2281_v18, %s2826_s29  ;;  %v5242_v18 = vld [vmem:[#allocation123_spill] sm:$0xff]  ;;  %v1150_v47 = vadd.f32 %v1148_v46, %v1053_v20  ;;  %v1221_v58 = vsel %vm1160_vm9, %v5249_v43, %v5248_v44  ;;  %v1175_v20 = vadd.f32 %v1173_v8, %v1078_v48  ;;  %v5256_v49 = vld [vmem:[#allocation137_spill] sm:$0xff]  ;;  %v5259_v8 = vld [vmem:[#allocation140_spill] sm:$0xff] }
 0x2ba   :  { %2284 = vrot.lane.b32.xlu0 %v2280_v29, %s2826_s29  ;;  %v1185_v45 = vsel %vm1160_vm9, %v5243_v41, %v5242_v18  ;;  %v5244_v29 = vld [vmem:[#allocation125_spill] sm:$0xff]  ;;  %v1211_v1 = vadd.f32 %v1209_v42, %v1114_v5  ;;  %v5250_v46 = vld [vmem:[#allocation131_spill] sm:$0xff]  ;;  %v4490_v43 = vld [vmem:[%s4906_s0] sm:$0xff] }
 0x2bb   :  { %v1948_v59 = vpop.permute.xlu1 %1947  ;;  %v1197_v30 = vsel %vm1160_vm9, %v5245_v35, %v5244_v29  ;;  %v1187_v31 = vadd.f32 %v1185_v45, %v1090_v24  ;;  %v1233_v50 = vsel %vm1160_vm9, %v5251_v40, %v5250_v46  ;;  %v1223_v24 = vadd.f32 %v1221_v58, %v1126_v9  ;;  %v5258_v5 = vld [vmem:[#allocation139_spill] sm:$0xff]  ;;  %v5260_v45 = vld [vmem:[#allocation141_spill] sm:$0xff]  ;;  %v5263_v9 = vld [vmem:[#allocation144_spill] sm:$0xff] }
 0x2bc   :  { %v1946_v25 = vpop.permute.xlu0 %1945  ;;  %v1199_v38 = vadd.f32 %v1197_v30, %v1102_v52  ;;  %v1270_v52 = vsel %vm1257_vm11, %v5257_v62, %v5256_v49  ;;  %v1282_v18 = vsel %vm1257_vm11, %v5259_v8, %v5258_v5  ;;  %v5262_v35 = vld [vmem:[#allocation143_spill] sm:$0xff]  ;;  %v4483_v13 = vld [vmem:[%s4906_s0 + $0x8] sm:$0xff]  ;;  %v2316_v58 = vmul.f32 %v4490_v43, %v2315_v55  ;;  %v5273_v8 = vld [vmem:[#allocation154_spill] sm:$0xff]  ;;  %s2827_s0 = smov 106  }
 0x2bd   :  { %v4446_v6 = vsel %vm1936_vm12, %v1946_v25, %v1948_v59  ;;  %2298 = vrot.lane.b32.xlu1 %v2293_v26, %s2826_s29  ;;  %v5253_v26 = vld [vmem:[#allocation134_spill] sm:$0xff]  ;;  %v1306_v30 = vsel %vm1257_vm11, %v5263_v9, %v5262_v35  ;;  %v2317_v42 = vmul.f32 %v4483_v13, %v2315_v55  ;;  %v1235_v25 = vadd.f32 %v1233_v50, %v1138_v21  ;;  %v5267_v50 = vld [vmem:[#allocation148_spill] sm:$0xff]  ;;  %v5268_v49 = vld [vmem:[#allocation149_spill] sm:$0xff] }
 0x2be   :  { %2296 = vrot.lane.b32.xlu0 %v2292_v57, %s2826_s29  ;;  %v1245_v7 = vsel %vm1160_vm9, %v5253_v26, %v5252_v56  ;;  %v1258_v57 = vsel %vm1257_vm11, %v5255_v11, %v5254_v10  ;;  %v5261_v59 = vld [vmem:[#allocation142_spill] sm:$0xff]  ;;  %v1272_v40 = vadd.f32 %v1270_v52, %v1175_v20  ;;  %v5264_v56 = vld [vmem:[#allocation145_spill] sm:$0xff]  ;;  %v1308_v11 = vadd.f32 %v1306_v30, %v1211_v1  ;;  %v5270_v20 = vld [vmem:[#allocation151_spill] sm:$0xff] }
 0x2bf   :  { %v1960_v48 = vpop.permute.xlu1 %1959  ;;  %v1294_v29 = vsel %vm1257_vm11, %v5261_v59, %v5260_v45  ;;  %v1247_v44 = vadd.f32 %v1245_v7, %v1150_v47  ;;  %v1260_v46 = vadd.f32 %v1258_v57, %v1163_v34  ;;  %v5265_v26 = vld [vmem:[#allocation146_spill] sm:$0xff]  ;;  %v5266_v47 = vld [vmem:[#allocation147_spill] sm:$0xff]  ;;  %v5271_v57 = vld [vmem:[#allocation152_spill] sm:$0xff]  ;;  %v2340_v59 = vstv %s4453_s9 }
 0x2c0   :  { %v1958_v41 = vpop.permute.xlu0 %1957  ;;  %v1318_v21 = vsel %vm1257_vm11, %v5265_v26, %v5264_v56  ;;  %v1296_v10 = vadd.f32 %v1294_v29, %v1199_v38  ;;  %v5269_v55 = vld [vmem:[#allocation150_spill] sm:$0xff]  ;;  %v1355_v52 = vsel %vm1354_vm13, %v5271_v57, %v5270_v20  ;;  %v5272_v5 = vld [vmem:[#allocation153_spill] sm:$0xff]  ;;  %v5274_v35 = vld [vmem:[#allocation155_spill] sm:$0xff] }
 0x2c1   :  { %v4477_v39 = vsel %vm1936_vm12, %v1958_v41, %v1960_v48  ;;  %2310 = vrot.lane.b32.xlu1 %v2305_v12, %s2826_s29  ;;  %v2328_v12 = vstv %s4428_s8  ;;  %v1284_v48 = vadd.f32 %v1282_v18, %v1187_v31  ;;  %v1342_v62 = vsel %vm1257_vm11, %v5269_v55, %v5268_v49  ;;  %v5275_v9 = vld [vmem:[#allocation156_spill] sm:$0xff]  ;;  %v5276_v56 = vld [vmem:[#allocation165_spill] sm:$0xff]  ;;  %v5277_v26 = vld [vmem:[#allocation166_spill] sm:$0xff] }
 0x2c2   :  { %2308 = vrot.lane.b32.xlu0 %v2304_v0, %s2826_s29  ;;  %v1330_v0 = vsel %vm1257_vm11, %v5267_v50, %v5266_v47  ;;  %v1367_v41 = vsel %vm1354_vm13, %v5273_v8, %v5272_v5  ;;  %v2330_v31 = vmul.f32 %v4483_v13, %v2328_v12  ;;  %v1320_v38 = vadd.f32 %v1318_v21, %v1223_v24  ;;  %v5279_v47 = vld [vmem:[#allocation158_spill] sm:$0xff]  ;;  %v5280_v50 = vld [vmem:[#allocation159_spill] sm:$0xff]  ;;  %v5283_v55 = vld [vmem:[#allocation168_spill] sm:$0xff] }
 0x2c3   :  { %v1972_v7 = vpop.permute.xlu1 %1971  ;;  %v1332_v1 = vadd.f32 %v1330_v0, %v1235_v25  ;;  %v2329_v18 = vmul.f32 %v4490_v43, %v2328_v12  ;;  %v1344_v29 = vadd.f32 %v1342_v62, %v1247_v44  ;;  %v1379_v30 = vsel %vm1354_vm13, %v5275_v9, %v5274_v35  ;;  %v5281_v0 = vld [vmem:[#allocation160_spill] sm:$0xff]  ;;  %v5282_v49 = vld [vmem:[#allocation167_spill] sm:$0xff]  ;;  %v5285_v20 = vld [vmem:[#allocation182_spill] sm:$0xff] }
 0x2c4   :  { %v1970_v34 = vpop.permute.xlu0 %1969  ;;  %v1357_v25 = vadd.f32 %v1355_v52, %v1260_v46  ;;  %v1369_v21 = vadd.f32 %v1367_v41, %v1272_v40  ;;  %v1403_v44 = vsel %vm1354_vm13, %v5281_v0, %v5280_v50  ;;  %v1452_v62 = vsel %vm1451_vm14, %v5283_v55, %v5282_v49  ;;  %v5294_v0 = vld [vmem:[#allocation183_spill] sm:$0xff]  ;;  %v5296_v49 = vld [vmem:[#allocation213_spill] sm:$0xff]  ;;  %v5297_v55 = vld [vmem:[#allocation214_spill] sm:$0xff] }
 0x2c5   :  { %v4512_v45 = vsel %vm1936_vm12, %v1970_v34, %v1972_v7  ;;  %2322 = vrot.lane.b32.xlu1 %v2317_v42, %s2827_s0  ;;  %v1439_v42 = vsel %vm1354_vm13, %v5277_v26, %v5276_v56  ;;  %v5284_v34 = vld [vmem:[#allocation181_spill] sm:$0xff]  ;;  %v2342_v40 = vmul.f32 %v4483_v13, %v2340_v59  ;;  %v1381_v52 = vadd.f32 %v1379_v30, %v1284_v48  ;;  %v5287_v26 = vld [vmem:[#allocation162_spill] sm:$0xff]  ;;  %v5291_v30 = vld [vmem:[#allocation164_spill] sm:$0xff] }
 0x2c6   :  { %2320 = vrot.lane.b32.xlu0 %v2316_v58, %s2827_s0  ;;  %v5278_v58 = vld [vmem:[#allocation157_spill] sm:$0xff]  ;;  %v1536_v57 = vsel %vm1451_vm14, %v5285_v20, %v5284_v34  ;;  %v1441_v5 = vadd.f32 %v1439_v42, %v1344_v29  ;;  %v2341_v8 = vmul.f32 %v4490_v43, %v2340_v59  ;;  %v2352_v41 = vstv %s4494_s14 }
 0x2c7   :  { %v1984_v24 = vpop.permute.xlu1 %1983  ;;  %v1391_v12 = vsel %vm1354_vm13, %v5279_v47, %v5278_v58  ;;  %v4551_v9 = vadd.f32 %v1403_v44, %v1308_v11  ;;  %v5286_v56 = vld [vmem:[#allocation161_spill] sm:$0xff]  ;;  %v5289_v58 = vld [vmem:[#allocation198_spill] sm:$0xff]  ;;  %v1454_v42 = vadd.f32 %v1452_v62, %v1357_v25  ;;  %v5295_v44 = vld [vmem:[#allocation184_spill] sm:$0xff]  ;;  %v1730_v34 = vsel %vm1645_vm0, %v5297_v55, %v5296_v49 }
 0x2c8   :  { %v1982_v7 = vpop.permute.xlu0 %1981  ;;  %v4549_v35 = vadd.f32 %v1391_v12, %v1296_v10  ;;  %v5292_v47 = vld [vmem:[#allocation169_spill] sm:$0xff]  ;;  %v5293_v10 = vld [vmem:[#allocation170_spill] sm:$0xff]  ;;  %v1538_v12 = vadd.f32 %v1536_v57, %v1441_v5  ;;  %v2354_v25 = vmul.f32 %v4483_v13, %v2352_v41  ;;  %v5298_v62 = vld [vmem:[#allocation171_spill] sm:$0xff] }
 0x2c9   :  { %v4540_v46 = vsel %vm1936_vm12, %v1982_v7, %v1984_v24  ;;  %2335 = vrot.lane.b32.xlu1 %v2330_v31, %s2827_s0  ;;  %v1415_v24 = vsel %vm1354_vm13, %v5287_v26, %v5286_v56  ;;  %v5288_v31 = vld [vmem:[#allocation197_spill] sm:$0xff]  ;;  %v1464_v11 = vsel %vm1451_vm14, %v5293_v10, %v5292_v47  ;;  %v1549_v7 = vsel %vm1548_vm15, %v5295_v44, %v5294_v0  ;;  %v5299_v56 = vld [vmem:[#allocation172_spill] sm:$0xff] }
 0x2ca   :  { %2333 = vrot.lane.b32.xlu0 %v2329_v18, %s2827_s0  ;;  %v1633_v48 = vsel %vm1548_vm15, %v5289_v58, %v5288_v31  ;;  %v5290_v18 = vld [vmem:[#allocation163_spill] sm:$0xff]  ;;  %v1476_v57 = vsel %vm1451_vm14, %v5299_v56, %v5298_v62  ;;  %v2353_v26 = vmul.f32 %v4490_v43, %v2352_v41  ;;  %v2364_v31 = vstv %s4519_s15  ;;  %v5302_v41 = vld [vmem:[#allocation185_spill] sm:$0xff]  ;;  %v5305_v0 = vld [vmem:[#allocation216_spill] sm:$0xff] }
 0x2cb   :  { %v1996_v29 = vpop.permute.xlu1 %1995  ;;  %v1427_v59 = vsel %vm1354_vm13, %v5291_v30, %v5290_v18  ;;  %v1635_v5 = vadd.f32 %v1633_v48, %v1538_v12  ;;  %v4584_v58 = vadd.f32 %v1415_v24, %v1320_v38  ;;  %v5300_v18 = vld [vmem:[#allocation199_spill] sm:$0xff]  ;;  %v1827_v47 = vsel %vm1742_vm1, %v4147_v53, %v4133_v17  ;;  %v5303_v12 = vld [vmem:[#allocation186_spill] sm:$0xff]  ;;  %v5308_v62 = vld [vmem:[#allocation201_spill] sm:$0xff] }
 0x2cc   :  { %v1994_v50 = vpop.permute.xlu0 %1993  ;;  %v1551_v10 = vadd.f32 %v1549_v7, %v1454_v42  ;;  %v2366_v17 = vmul.f32 %v4483_v13, %v2364_v31  ;;  %v2365_v42 = vmul.f32 %v4490_v43, %v2364_v31  ;;  %v5307_v7 = vld [vmem:[#allocation174_spill] sm:$0xff]  ;;  %v5311_v31 = vld [vmem:[#allocation188_spill] sm:$0xff] }
 0x2cd   :  { %v4572_v20 = vsel %vm1936_vm12, %v1994_v50, %v1996_v29  ;;  %2347 = vrot.lane.b32.xlu1 %v2342_v40, %s2827_s0  ;;  %v4586_v29 = vadd.f32 %v1427_v59, %v1332_v1  ;;  %v5301_v40 = vld [vmem:[#allocation200_spill] sm:$0xff]  ;;  %v1561_v50 = vsel %vm1548_vm15, %v5303_v12, %v5302_v41  ;;  %v1732_v38 = vadd.f32 %v1730_v34, %v1635_v5  ;;  %v5304_v59 = vld [vmem:[#allocation215_spill] sm:$0xff]  ;;  %v5309_v56 = vld [vmem:[#allocation202_spill] sm:$0xff] }
 0x2ce   :  { %2345 = vrot.lane.b32.xlu0 %v2341_v8, %s2827_s0  ;;  %v1646_v30 = vsel %vm1645_vm0, %v5301_v40, %v5300_v18  ;;  %v1466_v8 = vadd.f32 %v1464_v11, %v1369_v21  ;;  %v1478_v1 = vadd.f32 %v1476_v57, %v1381_v52  ;;  %v1743_v44 = vsel %vm1742_vm1, %v5305_v0, %v5304_v59  ;;  %v5306_v52 = vld [vmem:[#allocation173_spill] sm:$0xff]  ;;  %v5314_v59 = vld [vmem:[#allocation175_spill] sm:$0xff]  ;;  %v5315_v0 = vld [vmem:[#allocation176_spill] sm:$0xff] }
 0x2cf   :  { %v2008_v48 = vpop.permute.xlu1 %2007  ;;  %v1648_v53 = vadd.f32 %v1646_v30, %v1551_v10  ;;  %v1829_v21 = vadd.f32 %v1827_v47, %v1732_v38  ;;  %v2376_v11 = vstv %s4547_s16  ;;  %v1488_v55 = vsel %vm1451_vm14, %v5307_v7, %v5306_v52  ;;  %v5318_v7 = vld [vmem:[#allocation189_spill] sm:$0xff] }
 0x2d0   :  { %v2006_v24 = vpop.permute.xlu0 %2005  ;;  %v1563_v34 = vadd.f32 %v1561_v50, %v1466_v8  ;;  %v1840_v57 = vsel %vm1839_vm10, %v4179_v16, %v4168_v60  ;;  %v5313_v8 = vld [vmem:[#allocation218_spill] sm:$0xff]  ;;  %v2378_v60 = vmul.f32 %v4483_v13, %v2376_v11  ;;  %v2377_v16 = vmul.f32 %v4490_v43, %v2376_v11 }
 0x2d1   :  { %v4601_v49 = vsel %vm1936_vm12, %v2006_v24, %v2008_v48  ;;  %2359 = vrot.lane.b32.xlu1 %v2354_v25, %s2827_s0  ;;  %v1658_v25 = vsel %vm1645_vm0, %v5309_v56, %v5308_v62  ;;  %v1745_v40 = vadd.f32 %v1743_v44, %v1648_v53  ;;  %v1926_v30 = vadd.f32 %v4393_v14, %v1829_v21  ;;  %v5312_v48 = vld [vmem:[#allocation217_spill] sm:$0xff]  ;;  %v5317_v53 = vld [vmem:[#allocation204_spill] sm:$0xff] }
 0x2d2   :  { %2357 = vrot.lane.b32.xlu0 %v2353_v26, %s2827_s0  ;;  %v5310_v26 = vld [vmem:[#allocation187_spill] sm:$0xff]  ;;  %v1755_v10 = vsel %vm1742_vm1, %v5313_v8, %v5312_v48  ;;  %v1660_v12 = vadd.f32 %v1658_v25, %v1563_v34  ;;  %v2388_v14 = vstv %s4582_s17  ;;  %v1490_v24 = vadd.f32 %v1488_v55, %v4549_v35  ;;  %v5319_v34 = vld [vmem:[#allocation190_spill] sm:$0xff]  ;;  %v5324_v8 = vld [vmem:[#allocation205_spill] sm:$0xff] }
 0x2d3   :  { %v2020_v5 = vpop.permute.xlu1 %2019  ;;  %v1573_v18 = vsel %vm1548_vm15, %v5311_v31, %v5310_v26  ;;  %v1842_v50 = vadd.f32 %v1840_v57, %v1745_v40  ;;  %v1500_v44 = vsel %vm1451_vm14, %v5315_v0, %v5314_v59  ;;  %v1852_v11 = vsel %vm1839_vm10, %v4211_v19, %v4197_v61  ;;  %v5320_v25 = vld [vmem:[#allocation219_spill] sm:$0xff]  ;;  %v5321_v57 = vld [vmem:[#allocation220_spill] sm:$0xff] }
 0x2d4   :  { %v2018_v47 = vpop.permute.xlu0 %2017  ;;  %v1585_v62 = vsel %vm1548_vm15, %v5319_v34, %v5318_v7  ;;  %v1757_v35 = vadd.f32 %v1755_v10, %v1660_v12  ;;  %v2390_v61 = vmul.f32 %v4483_v13, %v2388_v14  ;;  %v2389_v19 = vmul.f32 %v4490_v43, %v2388_v14  ;;  %v5325_v10 = vld [vmem:[#allocation206_spill] sm:$0xff]  ;;  %v5327_v14 = vld [vmem:[#allocation192_spill] sm:$0xff]  ;;  %v5330_v34 = vld [vmem:[#allocation179_spill] sm:$0xff] }
 0x2d5   :  { %v2021_v41 = vsel %vm1936_vm12, %v2018_v47, %v2020_v5  ;;  %2371 = vrot.lane.b32.xlu1 %v2366_v17, %s2827_s0  ;;  %v5316_v17 = vld [vmem:[#allocation203_spill] sm:$0xff]  ;;  %v1939_v55 = vadd.f32 %v4418_v22, %v1842_v50  ;;  %v1767_v5 = vsel %vm1742_vm1, %v5321_v57, %v5320_v25  ;;  %v2400_v22 = vstv %s4608_s18  ;;  %v5323_v47 = vld [vmem:[#allocation178_spill] sm:$0xff] }
 0x2d6   :  { %v4630_v38 = vadd.f32 %v2021_v41, %v1926_v30  ;;  %2369 = vrot.lane.b32.xlu0 %v2365_v42, %s2827_s0  ;;  %v1670_v21 = vsel %vm1645_vm0, %v5317_v53, %v5316_v17  ;;  %v1575_v42 = vadd.f32 %v1573_v18, %v1478_v1  ;;  %v1854_v31 = vadd.f32 %v1852_v11, %v1757_v35  ;;  %v5322_v30 = vld [vmem:[#allocation177_spill] sm:$0xff]  ;;  %v5326_v50 = vld [vmem:[#allocation191_spill] sm:$0xff]  ;;  %v5329_v53 = vld [vmem:[#allocation222_spill] sm:$0xff] }
 0x2d7   :  { %v2032_v52 = vpop.permute.xlu1 %2031  ;;  %v1502_v40 = vadd.f32 %v1500_v44, %v4551_v9  ;;  %v1512_v48 = vsel %vm1451_vm14, %v5323_v47, %v5322_v30  ;;  %v1682_v41 = vsel %vm1645_vm0, %v5325_v10, %v5324_v8  ;;  %v1597_v59 = vsel %vm1548_vm15, %v5327_v14, %v5326_v50  ;;  %v5328_v17 = vld [vmem:[#allocation221_spill] sm:$0xff]  ;;  %v5336_v30 = vld [vmem:[#allocation223_spill] sm:$0xff]  ;;  %v5337_v47 = vld [vmem:[#allocation224_spill] sm:$0xff] }
 0x2d8   :  { %v2030_v56 = vpop.permute.xlu0 %2029  ;;  %v1672_v1 = vadd.f32 %v1670_v21, %v1575_v42  ;;  %v1951_v0 = vadd.f32 %v4446_v6, %v1854_v31  ;;  %v1779_v21 = vsel %vm1742_vm1, %v5329_v53, %v5328_v17  ;;  %v2412_v6 = vstv %s4634_s19 }
 0x2d9   :  { %v2034_v26 = vsel %vm2033_vm2, %v2030_v56, %v2032_v52  ;;  %2383 = vrot.lane.b32.xlu1 %v2378_v60, %s2827_s0  ;;  %v1864_v60 = vsel %vm1839_vm10, %v4237_v23, %v4226_v28  ;;  %v2402_v28 = vmul.f32 %v4483_v13, %v2400_v22  ;;  %v2401_v23 = vmul.f32 %v4490_v43, %v2400_v22  ;;  %v5333_v56 = vld [vmem:[#allocation208_spill] sm:$0xff] }
 0x2da   :  { %v4657_v18 = vadd.f32 %v2034_v26, %v1939_v55  ;;  %2381 = vrot.lane.b32.xlu0 %v2377_v16, %s2827_s0  ;;  %v1587_v16 = vadd.f32 %v1585_v62, %v1490_v24  ;;  %v1769_v9 = vadd.f32 %v1767_v5, %v1672_v1  ;;  %v1514_v7 = vadd.f32 %v1512_v48, %v4584_v58  ;;  %v5331_v62 = vld [vmem:[#allocation180_spill] sm:$0xff]  ;;  %v5332_v55 = vld [vmem:[#allocation207_spill] sm:$0xff] }
 0x2db   :  { %v2045_v12 = vpop.permute.xlu1 %2044  ;;  %v1524_v35 = vsel %vm1451_vm14, %v5331_v62, %v5330_v34  ;;  %v1694_v25 = vsel %vm1645_vm0, %v5333_v56, %v5332_v55  ;;  %v1876_v57 = vsel %vm1839_vm10, %v4272_v54, %v4261_v3  ;;  %v1599_v26 = vadd.f32 %v1597_v59, %v1502_v40 }
 0x2dc   :  { %v2043_v44 = vpop.permute.xlu0 %2042  ;;  %v1684_v24 = vadd.f32 %v1682_v41, %v1587_v16  ;;  %v1866_v52 = vadd.f32 %v1864_v60, %v1769_v9  ;;  %v1791_v48 = vsel %vm1742_vm1, %v5337_v47, %v5336_v30  ;;  %v2414_v3 = vmul.f32 %v4483_v13, %v2412_v6  ;;  %v5339_v16 = vld [vmem:[#allocation210_spill] sm:$0xff] }
 0x2dd   :  { %v2046_v11 = vsel %vm2033_vm2, %v2043_v44, %v2045_v12  ;;  %2395 = vrot.lane.b32.xlu1 %v2390_v61, %s2827_s0  ;;  %v5334_v61 = vld [vmem:[#allocation193_spill] sm:$0xff]  ;;  %v2413_v54 = vmul.f32 %v4490_v43, %v2412_v6  ;;  %v1696_v40 = vadd.f32 %v1694_v25, %v1599_v26  ;;  %v1526_v60 = vadd.f32 %v1524_v35, %v4586_v29  ;;  %v5341_v44 = vld [vmem:[#allocation196_spill] sm:$0xff]  ;;  %v5342_v6 = vld [vmem:[#allocation211_spill] sm:$0xff] }
 0x2de   :  { %v4684_v42 = vadd.f32 %v2046_v11, %v1951_v0  ;;  %2393 = vrot.lane.b32.xlu0 %v2389_v19, %s2827_s0  ;;  %v5335_v19 = vld [vmem:[#allocation194_spill] sm:$0xff]  ;;  %v1781_v58 = vadd.f32 %v1779_v21, %v1684_v24  ;;  %v1963_v31 = vadd.f32 %v4477_v39, %v1866_v52  ;;  %v2425_v39 = vstv %s4661_s20  ;;  %v5338_v12 = vld [vmem:[#allocation209_spill] sm:$0xff]  ;;  %v5340_v0 = vld [vmem:[#allocation195_spill] sm:$0xff] }
 0x2df   :  { %v2057_v5 = vpop.permute.xlu1 %2056  ;;  %v1609_v1 = vsel %vm1548_vm15, %v5335_v19, %v5334_v61  ;;  %v1706_v50 = vsel %vm1645_vm0, %v5339_v16, %v5338_v12  ;;  %v1888_v14 = vsel %vm1839_vm10, %v4301_v4, %v4287_v37  ;;  %v1621_v17 = vsel %vm1548_vm15, %v5341_v44, %v5340_v0 }
 0x2e0   :  { %v2055_v22 = vpop.permute.xlu0 %2054  ;;  %v1878_v10 = vadd.f32 %v1876_v57, %v1781_v58  ;;  %v1611_v9 = vadd.f32 %v1609_v1, %v1514_v7  ;;  %v1793_v53 = vadd.f32 %v1791_v48, %v1696_v40  ;;  %v1803_v29 = vsel %vm1742_vm1, %v4086_v2, %v4080_v33  ;;  %v5343_v2 = vld [vmem:[#allocation212_spill] sm:$0xff] }
 0x2e1   :  { %v2058_v8 = vsel %vm2033_vm2, %v2055_v22, %v2057_v5  ;;  %2407 = vrot.lane.b32.xlu1 %v2402_v28, %s2827_s0  ;;  %v2427_v37 = vmul.f32 %v4483_v13, %v2425_v39  ;;  %v2426_v4 = vmul.f32 %v4490_v43, %v2425_v39  ;;  %v1718_v33 = vsel %vm1645_vm0, %v5343_v2, %v5342_v6 }
 0x2e2   :  { %v4711_v41 = vadd.f32 %v2058_v8, %v1963_v31  ;;  %2405 = vrot.lane.b32.xlu0 %v2401_v23, %s2827_s0  ;;  %v1975_v21 = vadd.f32 %v4512_v45, %v1878_v10  ;;  %v1708_v23 = vadd.f32 %v1706_v50, %v1611_v9  ;;  %v1890_v24 = vadd.f32 %v1888_v14, %v1793_v53 }
 0x2e3   :  { %v2069_v59 = vpop.permute.xlu1 %2068  ;;  %v2437_v45 = vstv %s4688_s1  ;;  %v1900_v7 = vsel %vm1839_vm10, %v4327_v32, %v4319_v63  ;;  %v1623_v62 = vadd.f32 %v1621_v17, %v1526_v60  ;;  %v1815_v25 = vsel %vm1742_vm1, %v4121_v51, %v4107_v27 }
 0x2e4   :  { %v2067_v11 = vpop.permute.xlu0 %2066  ;;  %v1805_v35 = vadd.f32 %v1803_v29, %v1708_v23  ;;  %v1987_v55 = vadd.f32 %v4540_v46, %v1890_v24  ;;  %v2439_v5 = vmul.f32 %v4483_v13, %v2437_v45  ;;  %v2438_v26 = vmul.f32 %v4490_v43, %v2437_v45 }
 0x2e5   :  { %v2070_v28 = vsel %vm2033_vm2, %v2067_v11, %v2069_v59  ;;  %2419 = vrot.lane.b32.xlu1 %v2414_v3, %s2828_s21  ;;  %v1720_v61 = vadd.f32 %v1718_v33, %v1623_v62  ;;  %v2449_v46 = vstv %s4715_s2  ;;  %v1912_v27 = vsel %vm1839_vm10, %v4365_v36, %v4354_v15 }
 0x2e6   :  { %v4735_v52 = vadd.f32 %v2070_v28, %v1975_v21  ;;  %2417 = vrot.lane.b32.xlu0 %v2413_v54, %s2828_s21  ;;  %v1902_v63 = vadd.f32 %v1900_v7, %v1805_v35  ;;  %v2451_v22 = vmul.f32 %v4483_v13, %v2449_v46  ;;  %v2450_v48 = vmul.f32 %v4490_v43, %v2449_v46 }
 0x2e7   :  { %v2081_v34 = vpop.permute.xlu1 %2080  ;;  %v1817_v19 = vadd.f32 %v1815_v25, %v1720_v61  ;;  %v2461_v8 = vstv %s4739_s22  ;;  %v2473_v39 = vstv %s4759_s23  ;;  %v2485_v59 = vstv %s2706_s24 }
 0x2e8   :  { %v2079_v56 = vpop.permute.xlu0 %2078  ;;  %v1999_v1 = vadd.f32 %v4572_v20, %v1902_v63  ;;  %v2463_v54 = vmul.f32 %v4483_v13, %v2461_v8  ;;  %v2462_v10 = vmul.f32 %v4490_v43, %v2461_v8  ;;  %v2474_v14 = vmul.f32 %v4490_v43, %v2473_v39 }
 0x2e9   :  { %v2082_v57 = vsel %vm2033_vm2, %v2079_v56, %v2081_v34  ;;  %2432 = vrot.lane.b32.xlu1 %v2427_v37, %s2828_s21  ;;  %v1914_v30 = vadd.f32 %v1912_v27, %v1817_v19  ;;  %v2487_v17 = vmul.f32 %v4483_v13, %v2485_v59  ;;  %v2497_v21 = vstv %s2730_s25 }
 0x2ea   :  { %v4755_v32 = vadd.f32 %v2082_v57, %v1987_v55  ;;  %2430 = vrot.lane.b32.xlu0 %v2426_v4, %s2828_s21  ;;  %v2499_v37 = vmul.f32 %v4483_v13, %v2497_v21 }
 0x2eb   :  { %v2093_v51 = vpop.permute.xlu1 %2092  ;;  %v2011_v36 = vadd.f32 %v4601_v49, %v1914_v30  ;;  %v2475_v49 = vmul.f32 %v4483_v13, %v2473_v39 }
 0x2ec   :  { %v2091_v58 = vpop.permute.xlu0 %2090 }
 0x2ed   :  { %v2094_v31 = vsel %vm2033_vm2, %v2091_v58, %v2093_v51  ;;  %2444 = vrot.lane.b32.xlu1 %v2439_v5, %s2828_s21 }
 0x2ee   :  { %v2096_v47 = vadd.f32 %v2094_v31, %v1999_v1  ;;  %2442 = vrot.lane.b32.xlu0 %v2438_v26, %s2828_s21 }
 0x2ef   :  { %v2105_v15 = vpop.permute.xlu1 %2104 }
 0x2f0   :  { %v2103_v20 = vpop.permute.xlu0 %2102 }
 0x2f1   :  { %v2106_v3 = vsel %vm2033_vm2, %v2103_v20, %v2105_v15  ;;  %2456 = vrot.lane.b32.xlu1 %v2451_v22, %s2828_s21 }
 0x2f2   :  { %v2108_v40 = vadd.f32 %v2106_v3, %v2011_v36  ;;  %2454 = vrot.lane.b32.xlu0 %v2450_v48, %s2828_s21 }
 0x2f3   :  { %v2117_v60 = vpop.permute.xlu1 %2116 }
 0x2f4   :  { %v2115_v12 = vpop.permute.xlu0 %2114 }
 0x2f5   :  { %v2118_v16 = vsel %vm2033_vm2, %v2115_v12, %v2117_v60  ;;  %2468 = vrot.lane.b32.xlu1 %v2463_v54, %s2828_s21 }
 0x2f6   :  { %v2120_v50 = vadd.f32 %v2118_v16, %v4630_v38  ;;  %2466 = vrot.lane.b32.xlu0 %v2462_v10, %s2828_s21  ;;  %v2486_v38 = vmul.f32 %v4490_v43, %v2485_v59 }
 0x2f7   :  { %v2129_v9 = vpop.permute.xlu1 %2128 }
 0x2f8   :  { %v2127_v0 = vpop.permute.xlu0 %2126 }
 0x2f9   :  { %v2131_v44 = vsel %vm2130_vm3, %v2127_v0, %v2129_v9  ;;  %2480 = vrot.lane.b32.xlu1 %v2475_v49, %s2828_s21 }
 0x2fa   :  { %v4788_v53 = vadd.f32 %v2131_v44, %v4657_v18  ;;  %2478 = vrot.lane.b32.xlu0 %v2474_v14, %s2828_s21  ;;  %v2498_v18 = vmul.f32 %v4490_v43, %v2497_v21 }
 0x2fb   :  { %v2142_v11 = vpop.permute.xlu1 %2141 }
 0x2fc   :  { %v2140_v29 = vpop.permute.xlu0 %2139 }
 0x2fd   :  { %v2143_v28 = vsel %vm2130_vm3, %v2140_v29, %v2142_v11  ;;  %2492 = vrot.lane.b32.xlu1 %v2487_v17, %s2828_s21 }
 0x2fe   :  { %v4796_v4 = vadd.f32 %v2143_v28, %v4684_v42  ;;  %2490 = vrot.lane.b32.xlu0 %v2486_v38, %s2828_s21 }
 0x2ff   :  { %v2154_v23 = vpop.permute.xlu1 %2153 }
 0x300   :  { %v2152_v24 = vpop.permute.xlu0 %2151 }
 0x301   :  { %v2155_v45 = vsel %vm2130_vm3, %v2152_v24, %v2154_v23  ;;  %2504 = vrot.lane.b32.xlu1 %v2499_v37, %s2828_s21 }
 0x302   :  { %v4803_v6 = vadd.f32 %v2155_v45, %v4711_v41  ;;  %2502 = vrot.lane.b32.xlu0 %v2498_v18, %s2828_s21 }
 0x303   :  { %v2166_v2 = vpop.permute.xlu1 %2165 }
 0x304   :  { %v2164_v13 = vpop.permute.xlu0 %2163 }
 0x305   :  { %v2167_v42 = vsel %vm2130_vm3, %v2164_v13, %v2166_v2 }
 0x306   :  { %v4808_v33 = vadd.f32 %v2167_v42, %v4735_v52 }
 0x307   :  { %v2178_v7 = vpop.permute.xlu1 %2177 }
 0x308   :  { %v2176_v43 = vpop.permute.xlu0 %2175 }
 0x309   :  { %v2179_v34 = vsel %vm2130_vm3, %v2176_v43, %v2178_v7 }
 0x30a   :  { %v4812_v62 = vadd.f32 %v2179_v34, %v4755_v32 }
 0x30b   :  { %v2190_v35 = vpop.permute.xlu1 %2189 }
 0x30c   :  { %v2188_v55 = vpop.permute.xlu0 %2187 }
 0x30d   :  { %v2191_v41 = vsel %vm2130_vm3, %v2188_v55, %v2190_v35 }
 0x30e   :  { %v4815_v56 = vadd.f32 %v2191_v41, %v2096_v47 }
 0x30f   :  { %v2202_v25 = vpop.permute.xlu1 %2201 }
 0x310   :  { %v2200_v57 = vpop.permute.xlu0 %2199 }
 0x311   :  { %v2203_v5 = vsel %vm2130_vm3, %v2200_v57, %v2202_v25 }
 0x312   :  { %v4818_v26 = vadd.f32 %v2203_v5, %v2108_v40 }
 0x313   :  { %v2214_v52 = vpop.permute.xlu1 %2213 }
 0x314   :  { %v2212_v61 = vpop.permute.xlu0 %2211 }
 0x315   :  { %v2215_v63 = vsel %vm2130_vm3, %v2212_v61, %v2214_v52 }
 0x316   :  { %v4821_v46 = vadd.f32 %v2215_v63, %v2120_v50 }
 0x317   :  { %v2226_v32 = vpop.permute.xlu1 %2225 }
 0x318   :  { %v2224_v27 = vpop.permute.xlu0 %2223 }
 0x319   :  { %v2228_v17 = vsel %vm2227_vm4, %v2224_v27, %v2226_v32 }
 0x31a   :  { %v2230_v29 = vadd.f32 %v2228_v17, %v4788_v53 }
 0x31b   :  { %v2239_v51 = vpop.permute.xlu1 %2238 }
 0x31c   :  { %v2237_v19 = vpop.permute.xlu0 %2236 }
 0x31d   :  { %v2240_v28 = vsel %vm2227_vm4, %v2237_v19, %v2239_v51 }
 0x31e   :  { %v2242_v2 = vadd.f32 %v2240_v28, %v4796_v4 }
 0x31f   :  { %v2251_v1 = vpop.permute.xlu1 %2250 }
 0x320   :  { %v2249_v58 = vpop.permute.xlu0 %2248 }
 0x321   :  { %v2252_v42 = vsel %vm2227_vm4, %v2249_v58, %v2251_v1 }
 0x322   :  { %v2254_v41 = vadd.f32 %v2252_v42, %v4803_v6 }
 0x323   :  { %v2263_v31 = vpop.permute.xlu1 %2262 }
 0x324   :  { %v2261_v22 = vpop.permute.xlu0 %2260 }
 0x325   :  { %v2264_v4 = vsel %vm2227_vm4, %v2261_v22, %v2263_v31 }
 0x326   :  { %v2266_v27 = vadd.f32 %v2264_v4, %v4808_v33 }
 0x327   :  { %v2275_v30 = vpop.permute.xlu1 %2274 }
 0x328   :  { %v2273_v47 = vpop.permute.xlu0 %2272 }
 0x329   :  { %v2276_v51 = vsel %vm2227_vm4, %v2273_v47, %v2275_v30 }
 0x32b   :  { %v4823_v48 = vpop.permute.xlu1 %2286 }
 0x32c   :  { %v4825_v8 = vpop.permute.xlu0 %2284 }
 0x32f   :  { %v4827_v15 = vpop.permute.xlu1 %2298 }
 0x330   :  { %v4829_v36 = vpop.permute.xlu0 %2296 }
 0x333   :  { %v4831_v20 = vpop.permute.xlu1 %2310 }
 0x334   :  { %v4833_v3 = vpop.permute.xlu0 %2308 }
 0x337   :  { %v2323_v54 = vpop.permute.xlu1 %2322 }
 0x338   :  { %v2321_v40 = vpop.permute.xlu0 %2320 }
 0x339   :  { %v2325_v11 = vsel %vm2324_vm5, %v2321_v40, %v2323_v54  ;;  %v2278_v40 = vadd.f32 %v2276_v51, %v4812_v62 }
 0x33a   :  { %v2327_v18 = vadd.f32 %v2325_v11, %v2230_v29 }
 0x33b   :  { %v2336_v10 = vpop.permute.xlu1 %2335 }
 0x33c   :  { %v2334_v39 = vpop.permute.xlu0 %2333 }
 0x33d   :  { %v2337_v24 = vsel %vm2324_vm5, %v2334_v39, %v2336_v10  ;;  %v2288_v10 = vsel %vm2227_vm4, %v4825_v8, %v4823_v48 }
 0x33e   :  { %v2339_v43 = vadd.f32 %v2337_v24, %v2242_v2 }
 0x33f   :  { %v2348_v60 = vpop.permute.xlu1 %2347 }
 0x340   :  { %v2346_v12 = vpop.permute.xlu0 %2345 }
 0x341   :  { %v2349_v53 = vsel %vm2324_vm5, %v2346_v12, %v2348_v60 }
 0x342   :  { %v2351_v5 = vadd.f32 %v2349_v53, %v2254_v41 }
 0x343   :  { %v2360_v16 = vpop.permute.xlu1 %2359 }
 0x344   :  { %v2358_v49 = vpop.permute.xlu0 %2357 }
 0x345   :  { %v2361_v63 = vsel %vm2324_vm5, %v2358_v49, %v2360_v16  ;;  %v2290_v49 = vadd.f32 %v2288_v10, %v4815_v56 }
 0x346   :  { %v2363_v1 = vadd.f32 %v2361_v63, %v2266_v27 }
 0x347   :  { %v2372_v50 = vpop.permute.xlu1 %2371 }
 0x348   :  { %v2370_v14 = vpop.permute.xlu0 %2369 }
 0x349   :  { %v2373_v22 = vsel %vm2324_vm5, %v2370_v14, %v2372_v50  ;;  %v2300_v50 = vsel %vm2227_vm4, %v4829_v36, %v4827_v15  ;;  %v2312_v15 = vsel %vm2227_vm4, %v4833_v3, %v4831_v20 }
 0x34a   :  { %v2375_v47 = vadd.f32 %v2373_v22, %v2278_v40  ;;  %v2302_v56 = vadd.f32 %v2300_v50, %v4818_v26  ;;  %v2314_v26 = vadd.f32 %v2312_v15, %v4821_v46 }
 0x34b   :  { %v2384_v59 = vpop.permute.xlu1 %2383 }
 0x34c   :  { %v2382_v9 = vpop.permute.xlu0 %2381 }
 0x34d   :  { %v2385_v12 = vsel %vm2324_vm5, %v2382_v9, %v2384_v59 }
 0x34e   :  { %v2387_v8 = vadd.f32 %v2385_v12, %v2290_v49 }
 0x34f   :  { %v4835_v0 = vpop.permute.xlu1 %2395 }
 0x350   :  { %v2394_v44 = vpop.permute.xlu0 %2393 }
 0x351   :  { %v2397_v59 = vsel %vm2324_vm5, %v2394_v44, %v4835_v0 }
 0x352   :  { %v2399_v29 = vadd.f32 %v2397_v59, %v2302_v56 }
 0x353   :  { %v4838_v38 = vpop.permute.xlu1 %2407 }
 0x354   :  { %v4840_v21 = vpop.permute.xlu0 %2405 }
 0x355   :  { %v2409_v0 = vsel %vm2324_vm5, %v4840_v21, %v4838_v38 }
 0x356   :  { %v2411_v24 = vadd.f32 %v2409_v0, %v2314_v26 }
 0x357   :  { %v2420_v37 = vpop.permute.xlu1 %2419 }
 0x358   :  { %v2418_v23 = vpop.permute.xlu0 %2417 }
 0x359   :  { %v2422_v45 = vsel %vm2421_vm6, %v2418_v23, %v2420_v37 }
 0x35a   :  { %v2424_v13 = vadd.f32 %v2422_v45, %v2327_v18 }
 0x35b   :  { %v2433_v7 = vpop.permute.xlu1 %2432 }
 0x35c   :  { %v2509_v34 = vmax.f32 %v2424_v13, 0.0  ;;  %v2431_v35 = vpop.permute.xlu0 %2430 }
 0x35d   :  { %v2434_v55 = vsel %vm2421_vm6, %v2431_v35, %v2433_v7 }
 0x35e   :  { %2510 = vst [vmem:[%s4909_s3] sm:$0xff] %v2509_v34  ;;  %v2436_v25 = vadd.f32 %v2434_v55, %v2339_v43 }
 0x35f   :  { %v2445_v57 = vpop.permute.xlu1 %2444 }
 0x360   :  { %v2511_v52 = vmax.f32 %v2436_v25, 0.0  ;;  %v2443_v61 = vpop.permute.xlu0 %2442 }
 0x361   :  { %v2446_v32 = vsel %vm2421_vm6, %v2443_v61, %v2445_v57 }
 0x362   :  { %2738 = vst [vmem:[%s4909_s3 + $0x8] sm:$0xff] %v2511_v52  ;;  %v2448_v6 = vadd.f32 %v2446_v32, %v2351_v5 }
 0x363   :  { %v2457_v19 = vpop.permute.xlu1 %2456 }
 0x364   :  { %v2514_v58 = vmax.f32 %v2448_v6, 0.0  ;;  %v2455_v31 = vpop.permute.xlu0 %2454 }
 0x365   :  { %v2458_v54 = vsel %vm2421_vm6, %v2455_v31, %v2457_v19 }
 0x366   :  { %2739 = vst [vmem:[%s4909_s3 + $0x10] sm:$0xff] %v2514_v58  ;;  %v2460_v33 = vadd.f32 %v2458_v54, %v2363_v1 }
 0x367   :  { %v2469_v30 = vpop.permute.xlu1 %2468 }
 0x368   :  { %v2517_v39 = vmax.f32 %v2460_v33, 0.0  ;;  %v2467_v60 = vpop.permute.xlu0 %2466 }
 0x369   :  { %v2470_v16 = vsel %vm2421_vm6, %v2467_v60, %v2469_v30 }
 0x36a   :  { %2740 = vst [vmem:[%s4909_s3 + $0x18] sm:$0xff] %v2517_v39  ;;  %v2472_v62 = vadd.f32 %v2470_v16, %v2375_v47 }
 0x36b   :  { %v2481_v48 = vpop.permute.xlu1 %2480 }
 0x36c   :  { %v2520_v14 = vmax.f32 %v2472_v62, 0.0  ;;  %v2479_v17 = vpop.permute.xlu0 %2478 }
 0x36d   :  { %v2482_v9 = vsel %vm2421_vm6, %v2479_v17, %v2481_v48 }
 0x36e   :  { %2741 = vst [vmem:[%s4909_s3 + $0x20] sm:$0xff] %v2520_v14  ;;  %v2484_v11 = vadd.f32 %v2482_v9, %v2387_v8 }
 0x36f   :  { %v2493_v36 = vpop.permute.xlu1 %2492 }
 0x370   :  { %v2523_v28 = vmax.f32 %v2484_v11, 0.0  ;;  %v2491_v37 = vpop.permute.xlu0 %2490 }
 0x371   :  { %v2494_v44 = vsel %vm2421_vm6, %v2491_v37, %v2493_v36 }
 0x372   :  { %2742 = vst [vmem:[%s4909_s3 + $0x28] sm:$0xff] %v2523_v28  ;;  %v2496_v18 = vadd.f32 %v2494_v44, %v2399_v29 }
 0x373   :  { %v2505_v23 = vpop.permute.xlu1 %2504 }
 0x374   :  { %v2526_v20 = vmax.f32 %v2496_v18, 0.0  ;;  %v2503_v3 = vpop.permute.xlu0 %2502 }
 0x375   :  { %v2506_v45 = vsel %vm2421_vm6, %v2503_v3, %v2505_v23 }
 0x376   :  { %2743 = vst [vmem:[%s4909_s3 + $0x30] sm:$0xff] %v2526_v20  ;;  %v2508_v38 = vadd.f32 %v2506_v45, %v2411_v24 }
 0x378   :  { %v2529_v21 = vmax.f32 %v2508_v38, 0.0 }
 0x37a   :  { %2744 = vst [vmem:[%s4909_s3 + $0x38] sm:$0xff] %v2529_v21 }
 0x37b   :  { %2536 = vsyncpa [#allocation3], 1 }
 0x37c   :  { %2537 = vsyncpa [#allocation5], 1 }

</bundles_post_ra>
